<compile_context>
chip_gen: v6e
topology: v6e:2x2x1
jax: 0.10.0
libtpu: 0.0.40
codegen_flags: <defaults>
</compile_context>

<pallas_src>
import numpy as np
import jax
import jax.numpy as jnp
from jax.experimental import pallas as pl
from jax.experimental.pallas import tpu as pltpu

KERNEL_SIZE = 5
IN_CHANNELS = 1
CHANNEL1 = 20
CHANNEL2 = 50
FC_HIDDEN = 500
NUM_CLASSES = 10
IMAGE_HW = 28


# ----------------------------- Pallas kernels -----------------------------

def _mm(a, b):
    """MXU matmul; lhs is cast to the rhs dtype (bf16 weights -> bf16 inputs),
    accumulation stays in f32.  0/1 selection matrices are kept f32 so the
    pooling path never rounds activations."""
    return jnp.dot(a.astype(b.dtype), b, preferred_element_type=jnp.float32)


def _conv_stack_kernel(x_ref, bw1_ref, b1_ref, sh1_ref, ew1_ref,
                       bw2_ref, b2_ref, sh2_ref, ew2_ref, out_ref):
    """Per-image fused conv1+bias -> pool -> conv2+bias -> pool.

    Activations live in a (rows, W*C) layout (channels innermost on lanes), so
    every step is a plain 2-D matmul or elementwise max:
      * the K vertical conv taps are banded weight matrices (built on host),
      * 2x2/stride-2 max-pool = max of two row-selection matmuls (H axis)
        followed by max of two column-selection matmuls (W axis).
    """
    x = x_ref[0]                                  # (H, W*Cin), f32
    k = bw1_ref.shape[0]                          # kernel size (vertical taps)

    # ---- conv1 + bias : (OH1, OW1*C1) ----
    oh1 = x.shape[0] - k + 1
    y1 = _mm(x[0:oh1, :], bw1_ref[0])
    for i in range(1, k):
        y1 = y1 + _mm(x[i:i + oh1, :], bw1_ref[i])
    y1 = y1 + b1_ref[...]

    # ---- maxpool 2x2 : (OH1/2, OW1/2*C1) ----
    h1 = jnp.maximum(_mm(sh1_ref[0], y1), _mm(sh1_ref[1], y1))
    p1 = jnp.maximum(_mm(h1, ew1_ref[0]), _mm(h1, ew1_ref[1]))

    # ---- conv2 + bias : (OH2, OW2*C2) ----
    oh2 = p1.shape[0] - k + 1
    y2 = _mm(p1[0:oh2, :], bw2_ref[0])
    for i in range(1, k):
        y2 = y2 + _mm(p1[i:i + oh2, :], bw2_ref[i])
    y2 = y2 + b2_ref[...]

    # ---- maxpool 2x2 : (OH2/2, OW2/2*C2) ----
    h2 = jnp.maximum(_mm(sh2_ref[0], y2), _mm(sh2_ref[1], y2))
    p2 = jnp.maximum(_mm(h2, ew2_ref[0]), _mm(h2, ew2_ref[1]))

    out_ref[0] = p2


def _fc_head_kernel(f_ref, w1_ref, b1_ref, w2_ref, b2_ref, o_ref):
    """Fused fc1 + relu + fc2 + log_softmax; both weight matrices stay in VMEM."""
    h = _mm(f_ref[...], w1_ref[...]) + b1_ref[...]
    h = jnp.maximum(h, 0.0)
    o = _mm(h, w2_ref[...]) + b2_ref[...]
    m = jnp.max(o, axis=-1, keepdims=True)
    z = o - m
    lse = jnp.log(jnp.sum(jnp.exp(z), axis=-1, keepdims=True))
    o_ref[...] = z - lse


# ------------------------------ pallas wrappers ------------------------------

def _full_spec(a):
    return pl.BlockSpec(a.shape, lambda i, _nd=a.ndim: (0,) * _nd)


def conv_stack(x, params):
    """x: (N, H, W*Cin) f32 -> pooled conv features (N, PH2, PW2*C2) f32."""
    n, h, wc = x.shape
    bw1, bw2 = params["bw1"], params["bw2"]
    b1, b2 = params["b1row"], params["b2row"]
    sh1, ew1 = params["sh1"], params["ew1"]
    sh2, ew2 = params["sh2"], params["ew2"]
    out_rows, out_cols = sh2.shape[1], ew2.shape[2]

    return pl.pallas_call(
        _conv_stack_kernel,
        out_shape=jax.ShapeDtypeStruct((n, out_rows, out_cols), jnp.float32),
        grid=(n,),
        in_specs=[
            pl.BlockSpec((1, h, wc), lambda i: (i, 0, 0)),
            _full_spec(bw1), _full_spec(b1), _full_spec(sh1), _full_spec(ew1),
            _full_spec(bw2), _full_spec(b2), _full_spec(sh2), _full_spec(ew2),
        ],
        out_specs=pl.BlockSpec((1, out_rows, out_cols), lambda i: (i, 0, 0)),
        compiler_params=pltpu.CompilerParams(
            dimension_semantics=("parallel",),           # batch shards across TCs
            vmem_limit_bytes=32 * 1024 * 1024),
    )(x, bw1, b1, sh1, ew1, bw2, b2, sh2, ew2)


def fc_head(feats, params):
    """feats: (N, 800) f32 -> log-probs (N, 10)."""
    n, fdim = feats.shape
    w1, b1 = params["w_fc1"], params["b_fc1row"]
    w2, b2 = params["w_fc2"], params["b_fc2row"]
    # Batch is tiny (N=2) so a single full block is used; for large N this
    # would become a ("parallel",) grid over row tiles.
    return pl.pallas_call(
        _fc_head_kernel,
        out_shape=jax.ShapeDtypeStruct((n, w2.shape[1]), jnp.float32),
        grid=(1,),
        in_specs=[pl.BlockSpec((n, fdim), lambda i: (0, 0)),
                  _full_spec(w1), _full_spec(b1), _full_spec(w2), _full_spec(b2)],
        out_specs=pl.BlockSpec((n, w2.shape[1]), lambda i: (0, 0)),
        compiler_params=pltpu.CompilerParams(
            dimension_semantics=("arbitrary",),
            vmem_limit_bytes=32 * 1024 * 1024),
    )(feats, w1, b1, w2, b2)


# -------------------- parameter / Gabor-filter setup (host) --------------------

def gabor_filters(theta, Lambda, psi, kernel_size):
    """Vectorized version of Net.whole_filter / one_filter / filter_fn."""
    half = (kernel_size - 1) // 2
    yy, xx = np.meshgrid(np.arange(-half, half + 1), np.arange(-half, half + 1))
    y = jnp.asarray(yy, dtype=jnp.float32)       # same convention as np.meshgrid('xy')
    x = jnp.asarray(xx, dtype=jnp.float32)
    th = theta[:, :, None, None]
    lam = Lambda[:, :, None, None]
    ps = psi[:, :, None, None]
    x_theta = x * jnp.cos(th) + y * jnp.sin(th)
    y_theta = -x * jnp.sin(th) + y * jnp.cos(th)
    return jnp.cos(y_theta) * jnp.sin(2.0 * np.pi / lam * x_theta + ps)  # (Cout, Cin, K, K)


def _banded_conv_weights(filt, w_in):
    """filt: (Cout, Cin, K, K) torch conv weight -> (K, w_in*Cin, w_out*Cout)
    banded matrices so that, in the (rows, W*C) layout,
        conv(x) = sum_i  x[i:i+oh, :] @ bw[i]        (valid, stride 1)."""
    f = np.asarray(filt, np.float32)
    cout, cin, k, _ = f.shape
    w_out = w_in - k + 1
    bw = np.zeros((k, w_in * cin, w_out * cout), np.float32)
    for i in range(k):
        for j in range(k):
            blk = f[:, :, i, j].T                                 # (Cin, Cout)
            for ow in range(w_out):
                w = ow + j
                bw[i, w * cin:(w + 1) * cin, ow * cout:(ow + 1) * cout] = blk
    return bw


def _pool_selectors(h, w, c):
    """0/1 matrices implementing 2x2/stride-2 max-pool via matmuls:
       rows :  max(sh[0] @ x, sh[1] @ x)   (h, w*c)   -> (h/2, w*c)
       lanes:  max(x @ ew[0], x @ ew[1])   (h/2, w*c) -> (h/2, w/2*c)"""
    sh = np.zeros((2, h // 2, h), np.float32)
    for p in range(h // 2):
        sh[0, p, 2 * p] = 1.0
        sh[1, p, 2 * p + 1] = 1.0
    ew = np.zeros((2, w * c, (w // 2) * c), np.float32)
    for pw in range(w // 2):
        for ch in range(c):
            ew[0, (2 * pw) * c + ch, pw * c + ch] = 1.0
            ew[1, (2 * pw + 1) * c + ch, pw * c + ch] = 1.0
    return jnp.asarray(sh), jnp.asarray(ew)


def init_params(key, kernel_size, in_channels, channel1, channel2,
                image_hw=IMAGE_HW, weight_dtype=jnp.bfloat16):
    ks = jax.random.split(key, 12)
    theta1 = jax.random.normal(ks[0], (channel1, in_channels), jnp.float32)
    Lambda1 = jax.random.normal(ks[1], (channel1, in_channels), jnp.float32)
    psi1 = jax.random.normal(ks[2], (channel1, in_channels), jnp.float32)
    bias1 = jax.random.normal(ks[3], (channel1,), jnp.float32)
    theta2 = jax.random.normal(ks[4], (channel2, channel1), jnp.float32)
    Lambda2 = jax.random.normal(ks[5], (channel2, channel1), jnp.float32)
    psi2 = jax.random.normal(ks[6], (channel2, channel1), jnp.float32)
    bias2 = jax.random.normal(ks[7], (channel2,), jnp.float32)
    filter1 = gabor_filters(theta1, Lambda1, psi1, kernel_size)   # (C1, Cin, K, K)
    filter2 = gabor_filters(theta2, Lambda2, psi2, kernel_size)   # (C2, C1, K, K)

    # spatial bookkeeping: 28 -> 24 -> 12 -> 8 -> 4 for k=5
    oh1 = image_hw - kernel_size + 1
    ph1 = oh1 // 2
    oh2 = ph1 - kernel_size + 1
    ph2 = oh2 // 2

    # banded conv weights (bf16, precomputed once) + lane-replicated bias rows.
    bw1 = jnp.asarray(_banded_conv_weights(filter1, image_hw)).astype(weight_dtype)
    bw2 = jnp.asarray(_banded_conv_weights(filter2, ph1)).astype(weight_dtype)
    b1row = jnp.tile(bias1, oh1).reshape(1, oh1 * channel1)
    b2row = jnp.tile(bias2, oh2).reshape(1, oh2 * channel2)

    # max-pool selection matrices (exact 0/1 -> keep f32).
    sh1, ew1 = _pool_selectors(oh1, oh1, channel1)
    sh2, ew2 = _pool_selectors(oh2, oh2, channel2)

    # fc weights stored (in, out) so kernels compute x @ W + b (== torch Linear).
    fan1 = ph2 * ph2 * channel2                                   # 4*4*50 = 800
    w_fc1 = jax.random.normal(ks[8], (fan1, FC_HIDDEN), jnp.float32) / np.sqrt(fan1)
    b_fc1 = jax.random.normal(ks[9], (FC_HIDDEN,), jnp.float32) * 0.01
    w_fc2 = jax.random.normal(ks[10], (FC_HIDDEN, NUM_CLASSES), jnp.float32) / np.sqrt(FC_HIDDEN)
    b_fc2 = jax.random.normal(ks[11], (NUM_CLASSES,), jnp.float32) * 0.01

    # Pre-permute fc1 rows: torch flattens in (C, H, W) order, the kernel emits
    # features in (H, W, C) order -> row k=(p*C2+c) must pick torch row c*16+p.
    kk = np.arange(fan1)
    perm = (kk % channel2) * (ph2 * ph2) + kk // channel2
    w_fc1p = w_fc1[jnp.asarray(perm)].astype(weight_dtype)

    return dict(
        bw1=bw1, b1row=b1row, bw2=bw2, b2row=b2row,
        sh1=sh1, ew1=ew1, sh2=sh2, ew2=ew2,
        w_fc1=w_fc1p, b_fc1row=b_fc1.reshape(1, -1),
        w_fc2=w_fc2.astype(weight_dtype), b_fc2row=b_fc2.reshape(1, -1),
    )


# ---------------------------------- forward ----------------------------------

def net_forward(x_nchw, params):
    n, cin, h, w = x_nchw.shape
    # NCHW -> (N, H, W*Cin): channels innermost on the lane axis.
    x = jnp.transpose(x_nchw, (0, 2, 3, 1)).reshape(n, h, w * cin).astype(jnp.float32)
    feats = conv_stack(x, params)                  # (N, 4, 4*C2), fused conv/pool stack
    feats = feats.reshape(n, -1)                   # (N, 800) -- tiny XLA reshape
    return fc_head(feats, params)                  # (N, 10) log-probs


if __name__ == "__main__":
    key = jax.random.PRNGKey(0)
    k_x, k_p = jax.random.split(key)
    # shapes implied by the module: 28x28 input, k=5, C1=20, C2=50 -> 4*4*50 flatten
    x = jax.random.normal(k_x, (2, IN_CHANNELS, IMAGE_HW, IMAGE_HW), jnp.float32)  # NCHW
    params = init_params(k_p, KERNEL_SIZE, IN_CHANNELS, CHANNEL1, CHANNEL2)

    fwd = jax.jit(net_forward)
    out = jax.block_until_ready(fwd(x, params))

    assert out.shape == (2, NUM_CLASSES)
    # log_softmax sanity: each row exponentiates to ~1
    s = jnp.exp(out).sum(axis=1)
    assert bool(jnp.all(jnp.abs(s - 1.0) < 1e-3))
    print("KERNEL_OK")
</pallas_src>

<mosaic_0001>
module attributes {stable_mosaic.version = 11 : i64} {
  func.func @_conv_stack_kernel(%arg0: i32, %arg1: memref<1x28x28xf32, #tpu.memory_space<vmem>>, %arg2: memref<5x28x480xbf16, #tpu.memory_space<vmem>>, %arg3: memref<1x480xf32, #tpu.memory_space<vmem>>, %arg4: memref<2x12x24xf32, #tpu.memory_space<vmem>>, %arg5: memref<2x480x240xf32, #tpu.memory_space<vmem>>, %arg6: memref<5x240x400xbf16, #tpu.memory_space<vmem>>, %arg7: memref<1x400xf32, #tpu.memory_space<vmem>>, %arg8: memref<2x4x8xf32, #tpu.memory_space<vmem>>, %arg9: memref<2x400x200xf32, #tpu.memory_space<vmem>>, %arg10: memref<1x4x200xf32, #tpu.memory_space<vmem>>) attributes {dimension_semantics = [#tpu.dimension_semantics<parallel>], iteration_bounds = array<i64: 2>, scalar_prefetch = 0 : i64, scratch_operands = 0 : i64, tpu.core_type = #tpu.core_type<tc>, window_params = [{transform_indices = @transform_0, window_bounds = array<i64: 1, 28, 28>}, {pipeline_mode = #tpu.pipeline_mode<synchronous>, transform_indices = @transform_1, window_bounds = array<i64: 5, 28, 480>}, {pipeline_mode = #tpu.pipeline_mode<synchronous>, transform_indices = @transform_2, window_bounds = array<i64: 1, 480>}, {pipeline_mode = #tpu.pipeline_mode<synchronous>, transform_indices = @transform_3, window_bounds = array<i64: 2, 12, 24>}, {pipeline_mode = #tpu.pipeline_mode<synchronous>, transform_indices = @transform_4, window_bounds = array<i64: 2, 480, 240>}, {pipeline_mode = #tpu.pipeline_mode<synchronous>, transform_indices = @transform_5, window_bounds = array<i64: 5, 240, 400>}, {pipeline_mode = #tpu.pipeline_mode<synchronous>, transform_indices = @transform_6, window_bounds = array<i64: 1, 400>}, {pipeline_mode = #tpu.pipeline_mode<synchronous>, transform_indices = @transform_7, window_bounds = array<i64: 2, 4, 8>}, {pipeline_mode = #tpu.pipeline_mode<synchronous>, transform_indices = @transform_8, window_bounds = array<i64: 2, 400, 200>}, {transform_indices = @transform_9, window_bounds = array<i64: 1, 4, 200>}]} {
    %c0 = arith.constant 0 : index
    %c0_0 = arith.constant 0 : index
    %c0_1 = arith.constant 0 : index
    %0 = vector.load %arg1[%c0, %c0_0, %c0_1] : memref<1x28x28xf32, #tpu.memory_space<vmem>>, vector<1x28x28xf32>
    %1 = vector.shape_cast %0 : vector<1x28x28xf32> to vector<28x28xf32>
    %2 = vector.extract_strided_slice %1 {offsets = [0, 0], sizes = [24, 28], strides = [1, 1]} : vector<28x28xf32> to vector<24x28xf32>
    %c0_2 = arith.constant 0 : index
    %c0_3 = arith.constant 0 : index
    %c0_4 = arith.constant 0 : index
    %3 = vector.load %arg2[%c0_2, %c0_3, %c0_4] : memref<5x28x480xbf16, #tpu.memory_space<vmem>>, vector<1x28x480xbf16>
    %4 = vector.shape_cast %3 : vector<1x28x480xbf16> to vector<28x480xbf16>
    %5 = arith.truncf %2 : vector<24x28xf32> to vector<24x28xbf16>
    %cst = arith.constant dense<0.000000e+00> : vector<24x480xf32>
    %6 = tpu.matmul %5, %4, %cst {dimension_numbers = #tpu.dot_dimension_numbers<[1], [0], [0], [1], [0, 0, 1, 1], [], []>} : vector<24x28xbf16>, vector<28x480xbf16>, vector<24x480xf32> -> vector<24x480xf32>
    %7 = vector.extract_strided_slice %1 {offsets = [1, 0], sizes = [24, 28], strides = [1, 1]} : vector<28x28xf32> to vector<24x28xf32>
    %c1 = arith.constant 1 : index
    %c0_5 = arith.constant 0 : index
    %c0_6 = arith.constant 0 : index
    %8 = vector.load %arg2[%c1, %c0_5, %c0_6] : memref<5x28x480xbf16, #tpu.memory_space<vmem>>, vector<1x28x480xbf16>
    %9 = vector.shape_cast %8 : vector<1x28x480xbf16> to vector<28x480xbf16>
    %10 = arith.truncf %7 : vector<24x28xf32> to vector<24x28xbf16>
    %cst_7 = arith.constant dense<0.000000e+00> : vector<24x480xf32>
    %11 = tpu.matmul %10, %9, %cst_7 {dimension_numbers = #tpu.dot_dimension_numbers<[1], [0], [0], [1], [0, 0, 1, 1], [], []>} : vector<24x28xbf16>, vector<28x480xbf16>, vector<24x480xf32> -> vector<24x480xf32>
    %12 = arith.addf %6, %11 : vector<24x480xf32>
    %13 = vector.extract_strided_slice %1 {offsets = [2, 0], sizes = [24, 28], strides = [1, 1]} : vector<28x28xf32> to vector<24x28xf32>
    %c2 = arith.constant 2 : index
    %c0_8 = arith.constant 0 : index
    %c0_9 = arith.constant 0 : index
    %14 = vector.load %arg2[%c2, %c0_8, %c0_9] : memref<5x28x480xbf16, #tpu.memory_space<vmem>>, vector<1x28x480xbf16>
    %15 = vector.shape_cast %14 : vector<1x28x480xbf16> to vector<28x480xbf16>
    %16 = arith.truncf %13 : vector<24x28xf32> to vector<24x28xbf16>
    %cst_10 = arith.constant dense<0.000000e+00> : vector<24x480xf32>
    %17 = tpu.matmul %16, %15, %cst_10 {dimension_numbers = #tpu.dot_dimension_numbers<[1], [0], [0], [1], [0, 0, 1, 1], [], []>} : vector<24x28xbf16>, vector<28x480xbf16>, vector<24x480xf32> -> vector<24x480xf32>
    %18 = arith.addf %12, %17 : vector<24x480xf32>
    %19 = vector.extract_strided_slice %1 {offsets = [3, 0], sizes = [24, 28], strides = [1, 1]} : vector<28x28xf32> to vector<24x28xf32>
    %c3 = arith.constant 3 : index
    %c0_11 = arith.constant 0 : index
    %c0_12 = arith.constant 0 : index
    %20 = vector.load %arg2[%c3, %c0_11, %c0_12] : memref<5x28x480xbf16, #tpu.memory_space<vmem>>, vector<1x28x480xbf16>
    %21 = vector.shape_cast %20 : vector<1x28x480xbf16> to vector<28x480xbf16>
    %22 = arith.truncf %19 : vector<24x28xf32> to vector<24x28xbf16>
    %cst_13 = arith.constant dense<0.000000e+00> : vector<24x480xf32>
    %23 = tpu.matmul %22, %21, %cst_13 {dimension_numbers = #tpu.dot_dimension_numbers<[1], [0], [0], [1], [0, 0, 1, 1], [], []>} : vector<24x28xbf16>, vector<28x480xbf16>, vector<24x480xf32> -> vector<24x480xf32>
    %24 = arith.addf %18, %23 : vector<24x480xf32>
    %25 = vector.extract_strided_slice %1 {offsets = [4, 0], sizes = [24, 28], strides = [1, 1]} : vector<28x28xf32> to vector<24x28xf32>
    %c4 = arith.constant 4 : index
    %c0_14 = arith.constant 0 : index
    %c0_15 = arith.constant 0 : index
    %26 = vector.load %arg2[%c4, %c0_14, %c0_15] : memref<5x28x480xbf16, #tpu.memory_space<vmem>>, vector<1x28x480xbf16>
    %27 = vector.shape_cast %26 : vector<1x28x480xbf16> to vector<28x480xbf16>
    %28 = arith.truncf %25 : vector<24x28xf32> to vector<24x28xbf16>
    %cst_16 = arith.constant dense<0.000000e+00> : vector<24x480xf32>
    %29 = tpu.matmul %28, %27, %cst_16 {dimension_numbers = #tpu.dot_dimension_numbers<[1], [0], [0], [1], [0, 0, 1, 1], [], []>} : vector<24x28xbf16>, vector<28x480xbf16>, vector<24x480xf32> -> vector<24x480xf32>
    %30 = arith.addf %24, %29 : vector<24x480xf32>
    %c0_17 = arith.constant 0 : index
    %c0_18 = arith.constant 0 : index
    %31 = vector.load %arg3[%c0_17, %c0_18] : memref<1x480xf32, #tpu.memory_space<vmem>>, vector<1x480xf32>
    %32 = vector.broadcast %31 : vector<1x480xf32> to vector<24x480xf32>
    %33 = arith.addf %30, %32 : vector<24x480xf32>
    %c0_19 = arith.constant 0 : index
    %c0_20 = arith.constant 0 : index
    %c0_21 = arith.constant 0 : index
    %34 = vector.load %arg4[%c0_19, %c0_20, %c0_21] : memref<2x12x24xf32, #tpu.memory_space<vmem>>, vector<1x12x24xf32>
    %35 = vector.shape_cast %34 : vector<1x12x24xf32> to vector<12x24xf32>
    %cst_22 = arith.constant dense<0.000000e+00> : vector<12x480xf32>
    %36 = tpu.matmul %35, %33, %cst_22 {dimension_numbers = #tpu.dot_dimension_numbers<[1], [0], [0], [1], [0, 0, 1, 1], [], []>} : vector<12x24xf32>, vector<24x480xf32>, vector<12x480xf32> -> vector<12x480xf32>
    %c1_23 = arith.constant 1 : index
    %c0_24 = arith.constant 0 : index
    %c0_25 = arith.constant 0 : index
    %37 = vector.load %arg4[%c1_23, %c0_24, %c0_25] : memref<2x12x24xf32, #tpu.memory_space<vmem>>, vector<1x12x24xf32>
    %38 = vector.shape_cast %37 : vector<1x12x24xf32> to vector<12x24xf32>
    %cst_26 = arith.constant dense<0.000000e+00> : vector<12x480xf32>
    %39 = tpu.matmul %38, %33, %cst_26 {dimension_numbers = #tpu.dot_dimension_numbers<[1], [0], [0], [1], [0, 0, 1, 1], [], []>} : vector<12x24xf32>, vector<24x480xf32>, vector<12x480xf32> -> vector<12x480xf32>
    %40 = arith.maximumf %36, %39 : vector<12x480xf32>
    %c0_27 = arith.constant 0 : index
    %c0_28 = arith.constant 0 : index
    %c0_29 = arith.constant 0 : index
    %41 = vector.load %arg5[%c0_27, %c0_28, %c0_29] : memref<2x480x240xf32, #tpu.memory_space<vmem>>, vector<1x480x240xf32>
    %42 = vector.shape_cast %41 : vector<1x480x240xf32> to vector<480x240xf32>
    %cst_30 = arith.constant dense<0.000000e+00> : vector<12x240xf32>
    %43 = tpu.matmul %40, %42, %cst_30 {dimension_numbers = #tpu.dot_dimension_numbers<[1], [0], [0], [1], [0, 0, 1, 1], [], []>} : vector<12x480xf32>, vector<480x240xf32>, vector<12x240xf32> -> vector<12x240xf32>
    %c1_31 = arith.constant 1 : index
    %c0_32 = arith.constant 0 : index
    %c0_33 = arith.constant 0 : index
    %44 = vector.load %arg5[%c1_31, %c0_32, %c0_33] : memref<2x480x240xf32, #tpu.memory_space<vmem>>, vector<1x480x240xf32>
    %45 = vector.shape_cast %44 : vector<1x480x240xf32> to vector<480x240xf32>
    %cst_34 = arith.constant dense<0.000000e+00> : vector<12x240xf32>
    %46 = tpu.matmul %40, %45, %cst_34 {dimension_numbers = #tpu.dot_dimension_numbers<[1], [0], [0], [1], [0, 0, 1, 1], [], []>} : vector<12x480xf32>, vector<480x240xf32>, vector<12x240xf32> -> vector<12x240xf32>
    %47 = arith.maximumf %43, %46 : vector<12x240xf32>
    %48 = vector.extract_strided_slice %47 {offsets = [0, 0], sizes = [8, 240], strides = [1, 1]} : vector<12x240xf32> to vector<8x240xf32>
    %c0_35 = arith.constant 0 : index
    %c0_36 = arith.constant 0 : index
    %c0_37 = arith.constant 0 : index
    %49 = vector.load %arg6[%c0_35, %c0_36, %c0_37] : memref<5x240x400xbf16, #tpu.memory_space<vmem>>, vector<1x240x400xbf16>
    %50 = vector.shape_cast %49 : vector<1x240x400xbf16> to vector<240x400xbf16>
    %51 = arith.truncf %48 : vector<8x240xf32> to vector<8x240xbf16>
    %cst_38 = arith.constant dense<0.000000e+00> : vector<8x400xf32>
    %52 = tpu.matmul %51, %50, %cst_38 {dimension_numbers = #tpu.dot_dimension_numbers<[1], [0], [0], [1], [0, 0, 1, 1], [], []>} : vector<8x240xbf16>, vector<240x400xbf16>, vector<8x400xf32> -> vector<8x400xf32>
    %53 = vector.extract_strided_slice %47 {offsets = [1, 0], sizes = [8, 240], strides = [1, 1]} : vector<12x240xf32> to vector<8x240xf32>
    %c1_39 = arith.constant 1 : index
    %c0_40 = arith.constant 0 : index
    %c0_41 = arith.constant 0 : index
    %54 = vector.load %arg6[%c1_39, %c0_40, %c0_41] : memref<5x240x400xbf16, #tpu.memory_space<vmem>>, vector<1x240x400xbf16>
    %55 = vector.shape_cast %54 : vector<1x240x400xbf16> to vector<240x400xbf16>
    %56 = arith.truncf %53 : vector<8x240xf32> to vector<8x240xbf16>
    %cst_42 = arith.constant dense<0.000000e+00> : vector<8x400xf32>
    %57 = tpu.matmul %56, %55, %cst_42 {dimension_numbers = #tpu.dot_dimension_numbers<[1], [0], [0], [1], [0, 0, 1, 1], [], []>} : vector<8x240xbf16>, vector<240x400xbf16>, vector<8x400xf32> -> vector<8x400xf32>
    %58 = arith.addf %52, %57 : vector<8x400xf32>
    %59 = vector.extract_strided_slice %47 {offsets = [2, 0], sizes = [8, 240], strides = [1, 1]} : vector<12x240xf32> to vector<8x240xf32>
    %c2_43 = arith.constant 2 : index
    %c0_44 = arith.constant 0 : index
    %c0_45 = arith.constant 0 : index
    %60 = vector.load %arg6[%c2_43, %c0_44, %c0_45] : memref<5x240x400xbf16, #tpu.memory_space<vmem>>, vector<1x240x400xbf16>
    %61 = vector.shape_cast %60 : vector<1x240x400xbf16> to vector<240x400xbf16>
    %62 = arith.truncf %59 : vector<8x240xf32> to vector<8x240xbf16>
    %cst_46 = arith.constant dense<0.000000e+00> : vector<8x400xf32>
    %63 = tpu.matmul %62, %61, %cst_46 {dimension_numbers = #tpu.dot_dimension_numbers<[1], [0], [0], [1], [0, 0, 1, 1], [], []>} : vector<8x240xbf16>, vector<240x400xbf16>, vector<8x400xf32> -> vector<8x400xf32>
    %64 = arith.addf %58, %63 : vector<8x400xf32>
    %65 = vector.extract_strided_slice %47 {offsets = [3, 0], sizes = [8, 240], strides = [1, 1]} : vector<12x240xf32> to vector<8x240xf32>
    %c3_47 = arith.constant 3 : index
    %c0_48 = arith.constant 0 : index
    %c0_49 = arith.constant 0 : index
    %66 = vector.load %arg6[%c3_47, %c0_48, %c0_49] : memref<5x240x400xbf16, #tpu.memory_space<vmem>>, vector<1x240x400xbf16>
    %67 = vector.shape_cast %66 : vector<1x240x400xbf16> to vector<240x400xbf16>
    %68 = arith.truncf %65 : vector<8x240xf32> to vector<8x240xbf16>
    %cst_50 = arith.constant dense<0.000000e+00> : vector<8x400xf32>
    %69 = tpu.matmul %68, %67, %cst_50 {dimension_numbers = #tpu.dot_dimension_numbers<[1], [0], [0], [1], [0, 0, 1, 1], [], []>} : vector<8x240xbf16>, vector<240x400xbf16>, vector<8x400xf32> -> vector<8x400xf32>
    %70 = arith.addf %64, %69 : vector<8x400xf32>
    %71 = vector.extract_strided_slice %47 {offsets = [4, 0], sizes = [8, 240], strides = [1, 1]} : vector<12x240xf32> to vector<8x240xf32>
    %c4_51 = arith.constant 4 : index
    %c0_52 = arith.constant 0 : index
    %c0_53 = arith.constant 0 : index
    %72 = vector.load %arg6[%c4_51, %c0_52, %c0_53] : memref<5x240x400xbf16, #tpu.memory_space<vmem>>, vector<1x240x400xbf16>
    %73 = vector.shape_cast %72 : vector<1x240x400xbf16> to vector<240x400xbf16>
    %74 = arith.truncf %71 : vector<8x240xf32> to vector<8x240xbf16>
    %cst_54 = arith.constant dense<0.000000e+00> : vector<8x400xf32>
    %75 = tpu.matmul %74, %73, %cst_54 {dimension_numbers = #tpu.dot_dimension_numbers<[1], [0], [0], [1], [0, 0, 1, 1], [], []>} : vector<8x240xbf16>, vector<240x400xbf16>, vector<8x400xf32> -> vector<8x400xf32>
    %76 = arith.addf %70, %75 : vector<8x400xf32>
    %c0_55 = arith.constant 0 : index
    %c0_56 = arith.constant 0 : index
    %77 = vector.load %arg7[%c0_55, %c0_56] : memref<1x400xf32, #tpu.memory_space<vmem>>, vector<1x400xf32>
    %78 = vector.broadcast %77 : vector<1x400xf32> to vector<8x400xf32>
    %79 = arith.addf %76, %78 : vector<8x400xf32>
    %c0_57 = arith.constant 0 : index
    %c0_58 = arith.constant 0 : index
    %c0_59 = arith.constant 0 : index
    %80 = vector.load %arg8[%c0_57, %c0_58, %c0_59] : memref<2x4x8xf32, #tpu.memory_space<vmem>>, vector<1x4x8xf32>
    %81 = vector.shape_cast %80 : vector<1x4x8xf32> to vector<4x8xf32>
    %cst_60 = arith.constant dense<0.000000e+00> : vector<4x400xf32>
    %82 = tpu.matmul %81, %79, %cst_60 {dimension_numbers = #tpu.dot_dimension_numbers<[1], [0], [0], [1], [0, 0, 1, 1], [], []>} : vector<4x8xf32>, vector<8x400xf32>, vector<4x400xf32> -> vector<4x400xf32>
    %c1_61 = arith.constant 1 : index
    %c0_62 = arith.constant 0 : index
    %c0_63 = arith.constant 0 : index
    %83 = vector.load %arg8[%c1_61, %c0_62, %c0_63] : memref<2x4x8xf32, #tpu.memory_space<vmem>>, vector<1x4x8xf32>
    %84 = vector.shape_cast %83 : vector<1x4x8xf32> to vector<4x8xf32>
    %cst_64 = arith.constant dense<0.000000e+00> : vector<4x400xf32>
    %85 = tpu.matmul %84, %79, %cst_64 {dimension_numbers = #tpu.dot_dimension_numbers<[1], [0], [0], [1], [0, 0, 1, 1], [], []>} : vector<4x8xf32>, vector<8x400xf32>, vector<4x400xf32> -> vector<4x400xf32>
    %86 = arith.maximumf %82, %85 : vector<4x400xf32>
    %c0_65 = arith.constant 0 : index
    %c0_66 = arith.constant 0 : index
    %c0_67 = arith.constant 0 : index
    %87 = vector.load %arg9[%c0_65, %c0_66, %c0_67] : memref<2x400x200xf32, #tpu.memory_space<vmem>>, vector<1x400x200xf32>
    %88 = vector.shape_cast %87 : vector<1x400x200xf32> to vector<400x200xf32>
    %cst_68 = arith.constant dense<0.000000e+00> : vector<4x200xf32>
    %89 = tpu.matmul %86, %88, %cst_68 {dimension_numbers = #tpu.dot_dimension_numbers<[1], [0], [0], [1], [0, 0, 1, 1], [], []>} : vector<4x400xf32>, vector<400x200xf32>, vector<4x200xf32> -> vector<4x200xf32>
    %c1_69 = arith.constant 1 : index
    %c0_70 = arith.constant 0 : index
    %c0_71 = arith.constant 0 : index
    %90 = vector.load %arg9[%c1_69, %c0_70, %c0_71] : memref<2x400x200xf32, #tpu.memory_space<vmem>>, vector<1x400x200xf32>
    %91 = vector.shape_cast %90 : vector<1x400x200xf32> to vector<400x200xf32>
    %cst_72 = arith.constant dense<0.000000e+00> : vector<4x200xf32>
    %92 = tpu.matmul %86, %91, %cst_72 {dimension_numbers = #tpu.dot_dimension_numbers<[1], [0], [0], [1], [0, 0, 1, 1], [], []>} : vector<4x400xf32>, vector<400x200xf32>, vector<4x200xf32> -> vector<4x200xf32>
    %93 = arith.maximumf %89, %92 : vector<4x200xf32>
    %c0_73 = arith.constant 0 : index
    %c0_74 = arith.constant 0 : index
    %c0_75 = arith.constant 0 : index
    %94 = vector.load %arg10[%c0_73, %c0_74, %c0_75] : memref<1x4x200xf32, #tpu.memory_space<vmem>>, vector<1x4x200xf32>
    %95 = vector.shape_cast %94 : vector<1x4x200xf32> to vector<4x200xf32>
    %96 = vector.shape_cast %93 : vector<4x200xf32> to vector<1x4x200xf32>
    tpu.vector_store %arg10[%c0_73, %c0_74, %c0_75], %96 {strides = array<i32>} : memref<1x4x200xf32, #tpu.memory_space<vmem>>, vector<1x4x200xf32>,
    return
  }
  func.func @transform_0(%arg0: i32) -> (i32, i32, i32) {
    %c0_i32 = arith.constant 0 : i32
    %c0_i32_0 = arith.constant 0 : i32
    %c0_i32_1 = arith.constant 0 : i32
    return %arg0, %c0_i32, %c0_i32_0 : i32, i32, i32
  }
  func.func @transform_1(%arg0: i32) -> (i32, i32, i32) {
    %c0_i32 = arith.constant 0 : i32
    %c0_i32_0 = arith.constant 0 : i32
    %c0_i32_1 = arith.constant 0 : i32
    %c0_i32_2 = arith.constant 0 : i32
    return %c0_i32, %c0_i32_0, %c0_i32_1 : i32, i32, i32
  }
  func.func @transform_2(%arg0: i32) -> (i32, i32) {
    %c0_i32 = arith.constant 0 : i32
    %c0_i32_0 = arith.constant 0 : i32
    %c0_i32_1 = arith.constant 0 : i32
    return %c0_i32, %c0_i32_0 : i32, i32
  }
  func.func @transform_3(%arg0: i32) -> (i32, i32, i32) {
    %c0_i32 = arith.constant 0 : i32
    %c0_i32_0 = arith.constant 0 : i32
    %c0_i32_1 = arith.constant 0 : i32
    %c0_i32_2 = arith.constant 0 : i32
    return %c0_i32, %c0_i32_0, %c0_i32_1 : i32, i32, i32
  }
  func.func @transform_4(%arg0: i32) -> (i32, i32, i32) {
    %c0_i32 = arith.constant 0 : i32
    %c0_i32_0 = arith.constant 0 : i32
    %c0_i32_1 = arith.constant 0 : i32
    %c0_i32_2 = arith.constant 0 : i32
    return %c0_i32, %c0_i32_0, %c0_i32_1 : i32, i32, i32
  }
  func.func @transform_5(%arg0: i32) -> (i32, i32, i32) {
    %c0_i32 = arith.constant 0 : i32
    %c0_i32_0 = arith.constant 0 : i32
    %c0_i32_1 = arith.constant 0 : i32
    %c0_i32_2 = arith.constant 0 : i32
    return %c0_i32, %c0_i32_0, %c0_i32_1 : i32, i32, i32
  }
  func.func @transform_6(%arg0: i32) -> (i32, i32) {
    %c0_i32 = arith.constant 0 : i32
    %c0_i32_0 = arith.constant 0 : i32
    %c0_i32_1 = arith.constant 0 : i32
    return %c0_i32, %c0_i32_0 : i32, i32
  }
  func.func @transform_7(%arg0: i32) -> (i32, i32, i32) {
    %c0_i32 = arith.constant 0 : i32
    %c0_i32_0 = arith.constant 0 : i32
    %c0_i32_1 = arith.constant 0 : i32
    %c0_i32_2 = arith.constant 0 : i32
    return %c0_i32, %c0_i32_0, %c0_i32_1 : i32, i32, i32
  }
  func.func @transform_8(%arg0: i32) -> (i32, i32, i32) {
    %c0_i32 = arith.constant 0 : i32
    %c0_i32_0 = arith.constant 0 : i32
    %c0_i32_1 = arith.constant 0 : i32
    %c0_i32_2 = arith.constant 0 : i32
    return %c0_i32, %c0_i32_0, %c0_i32_1 : i32, i32, i32
  }
  func.func @transform_9(%arg0: i32) -> (i32, i32, i32) {
    %c0_i32 = arith.constant 0 : i32
    %c0_i32_0 = arith.constant 0 : i32
    %c0_i32_1 = arith.constant 0 : i32
    return %arg0, %c0_i32, %c0_i32_0 : i32, i32, i32
  }
}

module attributes {stable_mosaic.version = 11 : i64} {
  func.func @_fc_head_kernel(%arg0: i32, %arg1: memref<2x800xf32, #tpu.memory_space<vmem>>, %arg2: memref<800x500xbf16, #tpu.memory_space<vmem>>, %arg3: memref<1x500xf32, #tpu.memory_space<vmem>>, %arg4: memref<500x10xbf16, #tpu.memory_space<vmem>>, %arg5: memref<1x10xf32, #tpu.memory_space<vmem>>, %arg6: memref<2x10xf32, #tpu.memory_space<vmem>>) attributes {dimension_semantics = [#tpu.dimension_semantics<arbitrary>], iteration_bounds = array<i64: 1>, scalar_prefetch = 0 : i64, scratch_operands = 0 : i64, tpu.core_type = #tpu.core_type<tc>, window_params = [{pipeline_mode = #tpu.pipeline_mode<synchronous>, transform_indices = @transform_0, window_bounds = array<i64: 2, 800>}, {pipeline_mode = #tpu.pipeline_mode<synchronous>, transform_indices = @transform_1, window_bounds = array<i64: 800, 500>}, {pipeline_mode = #tpu.pipeline_mode<synchronous>, transform_indices = @transform_2, window_bounds = array<i64: 1, 500>}, {pipeline_mode = #tpu.pipeline_mode<synchronous>, transform_indices = @transform_3, window_bounds = array<i64: 500, 10>}, {pipeline_mode = #tpu.pipeline_mode<synchronous>, transform_indices = @transform_4, window_bounds = array<i64: 1, 10>}, {pipeline_mode = #tpu.pipeline_mode<synchronous>, transform_indices = @transform_5, window_bounds = array<i64: 2, 10>}]} {
    %c0 = arith.constant 0 : index
    %c0_0 = arith.constant 0 : index
    %0 = vector.load %arg1[%c0, %c0_0] : memref<2x800xf32, #tpu.memory_space<vmem>>, vector<2x800xf32>
    %c0_1 = arith.constant 0 : index
    %c0_2 = arith.constant 0 : index
    %1 = vector.load %arg2[%c0_1, %c0_2] : memref<800x500xbf16, #tpu.memory_space<vmem>>, vector<800x500xbf16>
    %2 = arith.truncf %0 : vector<2x800xf32> to vector<2x800xbf16>
    %cst = arith.constant dense<0.000000e+00> : vector<2x500xf32>
    %3 = tpu.matmul %2, %1, %cst {dimension_numbers = #tpu.dot_dimension_numbers<[1], [0], [0], [1], [0, 0, 1, 1], [], []>} : vector<2x800xbf16>, vector<800x500xbf16>, vector<2x500xf32> -> vector<2x500xf32>
    %c0_3 = arith.constant 0 : index
    %c0_4 = arith.constant 0 : index
    %4 = vector.load %arg3[%c0_3, %c0_4] : memref<1x500xf32, #tpu.memory_space<vmem>>, vector<1x500xf32>
    %5 = vector.broadcast %4 : vector<1x500xf32> to vector<2x500xf32>
    %6 = arith.addf %3, %5 : vector<2x500xf32>
    %cst_5 = arith.constant 0.000000e+00 : f32
    %7 = vector.broadcast %cst_5 : f32 to vector<2x500xf32>
    %8 = arith.maximumf %6, %7 : vector<2x500xf32>
    %c0_6 = arith.constant 0 : index
    %c0_7 = arith.constant 0 : index
    %9 = vector.load %arg4[%c0_6, %c0_7] : memref<500x10xbf16, #tpu.memory_space<vmem>>, vector<500x10xbf16>
    %10 = arith.truncf %8 : vector<2x500xf32> to vector<2x500xbf16>
    %cst_8 = arith.constant dense<0.000000e+00> : vector<2x10xf32>
    %11 = tpu.matmul %10, %9, %cst_8 {dimension_numbers = #tpu.dot_dimension_numbers<[1], [0], [0], [1], [0, 0, 1, 1], [], []>} : vector<2x500xbf16>, vector<500x10xbf16>, vector<2x10xf32> -> vector<2x10xf32>
    %c0_9 = arith.constant 0 : index
    %c0_10 = arith.constant 0 : index
    %12 = vector.load %arg5[%c0_9, %c0_10] : memref<1x10xf32, #tpu.memory_space<vmem>>, vector<1x10xf32>
    %13 = vector.broadcast %12 : vector<1x10xf32> to vector<2x10xf32>
    %14 = arith.addf %11, %13 : vector<2x10xf32>
    %cst_11 = arith.constant dense<0xFF800000> : vector<2xf32>
    %15 = vector.multi_reduction <maximumf>, %14, %cst_11 [1] : vector<2x10xf32> to vector<2xf32>
    %16 = vector.shape_cast %15 : vector<2xf32> to vector<2x1xf32>
    %17 = vector.broadcast %16 : vector<2x1xf32> to vector<2x10xf32>
    %18 = arith.subf %14, %17 : vector<2x10xf32>
    %19 = math.exp %18 : vector<2x10xf32>
    %cst_12 = arith.constant dense<0.000000e+00> : vector<2xf32>
    %20 = vector.multi_reduction <add>, %19, %cst_12 [1] : vector<2x10xf32> to vector<2xf32>
    %21 = vector.shape_cast %20 : vector<2xf32> to vector<2x1xf32>
    %22 = math.log %21 : vector<2x1xf32>
    %23 = vector.broadcast %22 : vector<2x1xf32> to vector<2x10xf32>
    %24 = arith.subf %18, %23 : vector<2x10xf32>
    %c0_13 = arith.constant 0 : index
    %c0_14 = arith.constant 0 : index
    %25 = vector.load %arg6[%c0_13, %c0_14] : memref<2x10xf32, #tpu.memory_space<vmem>>, vector<2x10xf32>
    tpu.vector_store %arg6[%c0_13, %c0_14], %24 {strides = array<i32>} : memref<2x10xf32, #tpu.memory_space<vmem>>, vector<2x10xf32>,
    return
  }
  func.func @transform_0(%arg0: i32) -> (i32, i32) {
    %c0_i32 = arith.constant 0 : i32
    %c0_i32_0 = arith.constant 0 : i32
    %c0_i32_1 = arith.constant 0 : i32
    return %c0_i32, %c0_i32_0 : i32, i32
  }
  func.func @transform_1(%arg0: i32) -> (i32, i32) {
    %c0_i32 = arith.constant 0 : i32
    %c0_i32_0 = arith.constant 0 : i32
    %c0_i32_1 = arith.constant 0 : i32
    return %c0_i32, %c0_i32_0 : i32, i32
  }
  func.func @transform_2(%arg0: i32) -> (i32, i32) {
    %c0_i32 = arith.constant 0 : i32
    %c0_i32_0 = arith.constant 0 : i32
    %c0_i32_1 = arith.constant 0 : i32
    return %c0_i32, %c0_i32_0 : i32, i32
  }
  func.func @transform_3(%arg0: i32) -> (i32, i32) {
    %c0_i32 = arith.constant 0 : i32
    %c0_i32_0 = arith.constant 0 : i32
    %c0_i32_1 = arith.constant 0 : i32
    return %c0_i32, %c0_i32_0 : i32, i32
  }
  func.func @transform_4(%arg0: i32) -> (i32, i32) {
    %c0_i32 = arith.constant 0 : i32
    %c0_i32_0 = arith.constant 0 : i32
    %c0_i32_1 = arith.constant 0 : i32
    return %c0_i32, %c0_i32_0 : i32, i32
  }
  func.func @transform_5(%arg0: i32) -> (i32, i32) {
    %c0_i32 = arith.constant 0 : i32
    %c0_i32_0 = arith.constant 0 : i32
    %c0_i32_1 = arith.constant 0 : i32
    return %c0_i32, %c0_i32_0 : i32, i32
  }
}

</mosaic_0001>

<bundles_post_ra>
// kernel: net_forward.3
= control target key start
LH: loop header
LB: loop body
LE: loop exit
PB: predicated region body
PF: predicated region fallthrough
CT: control target
= control target key end

     0   :  { %v2654_v36 = vmov 1983009808   ;;  %v230_v38 = vlaneseq  ;;  %vm1295_vm0 = vcmask 261120   ;;  %s3452_s0 = inlined_call_operand.vmem [shape: f32[2,800], index: 0, kind: input, shape index: {}]   ;;  %s3453_s1 = inlined_call_operand.vmem [shape: bf16[800,500], index: 1, kind: input, shape index: {}]   ;;  %s3454_s2 = inlined_call_operand.vmem [shape: f32[1,500], index: 2, kind: input, shape index: {}]   ;;  %s3455_s3 = inlined_call_operand.vmem [shape: bf16[500,10], index: 3, kind: input, shape index: {}]   ;;  %s3456_s4 = inlined_call_operand.vmem [shape: f32[1,10], index: 4, kind: input, shape index: {}]   ;;  %s3457_s5 = inlined_call_operand.hbm [shape: f32[2,10], index: 5, kind: output, shape index: {}]  }
   0x1   :  { %v2294_v0 = vld [vmem:[%s3453_s1 + $0xe4] ss:$16 sps:$4 sm:$0xff]   ;;  %v2298_v2 = vld [vmem:[%s3453_s1 + $0xe0] ss:$16 sps:$4 sm:$0xff]   ;;  %v228_v37 = vunpack.c.l.s4 %v2654_v36 }
   0x2   :  { %v2296_v1 = vld [vmem:[%s3453_s1 + $0x2e4] ss:$16 sps:$4 sm:$0xff]   ;;  %1299 = vmatprep.subr.bf16.mxu0 %v2294_v0  ;;  %v2299_v3 = vld [vmem:[%s3453_s1 + $0x2e0] ss:$16 sps:$4 sm:$0xff]   ;;  %v2804_v43 = vshrl.u32 %v230_v38, 7 }
   0x3   :  { %1340 = vmatprep.subr.bf16.mxu1 %v2296_v1  ;;  %v2300_v4 = vld [vmem:[%s3453_s1 + $0xc4] ss:$16 sps:$4 sm:$0xff]   ;;  %1300 = vmatpush1.bf16.msra.mxu0 %v2298_v2  ;;  %v2304_v6 = vld [vmem:[%s3453_s1 + $0xc0] ss:$16 sps:$4 sm:$0xff]   ;;  %v229_v42 = vunpack.c.0.s8 %v228_v37  ;;  %v2415_v37 = vld [vmem:[%s3453_s1 + $0xcc] ss:$16 sps:$4 sm:$0xff]  }
   0x4   :  { %1341 = vmatpush1.bf16.msra.mxu1 %v2299_v3  ;;  %v2302_v5 = vld [vmem:[%s3453_s1 + $0x2c4] ss:$16 sps:$4 sm:$0xff]   ;;  %1301 = vmatprep.subr.bf16.mxu0 %v2300_v4  ;;  %v2305_v7 = vld [vmem:[%s3453_s1 + $0x2c0] ss:$16 sps:$4 sm:$0xff]  }
   0x5   :  { %1342 = vmatprep.subr.bf16.mxu1 %v2302_v5  ;;  %v2306_v8 = vld [vmem:[%s3453_s1 + $0xa4] ss:$16 sps:$4 sm:$0xff]   ;;  %v2310_v10 = vld [vmem:[%s3453_s1 + $0xa0] ss:$16 sps:$4 sm:$0xff]   ;;  %v2822_v49 = vsub.s32 %v229_v42, %v2804_v43 }
   0x6   :  { %v2308_v9 = vld [vmem:[%s3453_s1 + $0x2a4] ss:$16 sps:$4 sm:$0xff]   ;;  %v2311_v11 = vld [vmem:[%s3453_s1 + $0x2a0] ss:$16 sps:$4 sm:$0xff]  }
   0x7   :  { %1302 = vmatpush1.bf16.msra.mxu0 %v2304_v6  ;;  %v2312_v12 = vld [vmem:[%s3453_s1 + $0x84] ss:$16 sps:$4 sm:$0xff]   ;;  %v2316_v14 = vld [vmem:[%s3453_s1 + $0x80] ss:$16 sps:$4 sm:$0xff]  }
   0x8   :  { %1343 = vmatpush1.bf16.msra.mxu1 %v2305_v7  ;;  %1303 = vmatprep.subr.bf16.mxu0 %v2306_v8  ;;  %v2314_v13 = vld [vmem:[%s3453_s1 + $0x284] ss:$16 sps:$4 sm:$0xff]   ;;  %v2317_v15 = vld [vmem:[%s3453_s1 + $0x280] ss:$16 sps:$4 sm:$0xff]  }
   0x9   :  { %1344 = vmatprep.subr.bf16.mxu1 %v2308_v9  ;;  %v2318_v16 = vld [vmem:[%s3453_s1 + $0x64] ss:$16 sps:$4 sm:$0xff]   ;;  %v2322_v18 = vld [vmem:[%s3453_s1 + $0x60] ss:$16 sps:$4 sm:$0xff]  }
   0xa   :  { %v2320_v17 = vld [vmem:[%s3453_s1 + $0x264] ss:$16 sps:$4 sm:$0xff]   ;;  %v2323_v19 = vld [vmem:[%s3453_s1 + $0x260] ss:$16 sps:$4 sm:$0xff]  }
   0xb   :  { %1304 = vmatpush1.bf16.msra.mxu0 %v2310_v10  ;;  %v2324_v20 = vld [vmem:[%s3453_s1 + $0x44] ss:$16 sps:$4 sm:$0xff]   ;;  %v2328_v22 = vld [vmem:[%s3453_s1 + $0x40] ss:$16 sps:$4 sm:$0xff]  }
   0xc   :  { %1345 = vmatpush1.bf16.msra.mxu1 %v2311_v11  ;;  %1305 = vmatprep.subr.bf16.mxu0 %v2312_v12  ;;  %v2326_v21 = vld [vmem:[%s3453_s1 + $0x244] ss:$16 sps:$4 sm:$0xff]   ;;  %v2329_v23 = vld [vmem:[%s3453_s1 + $0x240] ss:$16 sps:$4 sm:$0xff]   ;;  %v23_v12 = vld [vmem:[%s3452_s0 + $0x8] sm:$0x3f] }
   0xd   :  { %1346 = vmatprep.subr.bf16.mxu1 %v2314_v13  ;;  %v2330_v24 = vld [vmem:[%s3453_s1 + $0x24] ss:$16 sps:$4 sm:$0xff]   ;;  %v2334_v26 = vld [vmem:[%s3453_s1 + $0x20] ss:$16 sps:$4 sm:$0xff]   ;;  %v2893_v13 = vrot.slane %v23_v12, %v2822_v49 }
   0xe   :  { %v2332_v25 = vld [vmem:[%s3453_s1 + $0x224] ss:$16 sps:$4 sm:$0xff]   ;;  %v2335_v27 = vld [vmem:[%s3453_s1 + $0x220] ss:$16 sps:$4 sm:$0xff]  }
   0xf   :  { %1306 = vmatpush1.bf16.msra.mxu0 %v2316_v14  ;;  %v2336_v28 = vld [vmem:[%s3453_s1 + $0x4] ss:$16 sps:$4 sm:$0xff]   ;;  %v2340_v30 = vld [vmem:[%s3453_s1] ss:$16 sps:$4 sm:$0xff]  }
  0x10   :  { %1347 = vmatpush1.bf16.msra.mxu1 %v2317_v15  ;;  %1307 = vmatprep.subr.bf16.mxu0 %v2318_v16  ;;  %v2338_v29 = vld [vmem:[%s3453_s1 + $0x204] ss:$16 sps:$4 sm:$0xff]   ;;  %v2341_v31 = vld [vmem:[%s3453_s1 + $0x200] ss:$16 sps:$4 sm:$0xff]  }
  0x11   :  { %1348 = vmatprep.subr.bf16.mxu1 %v2320_v17  ;;  %v2342_v32 = vld [vmem:[%s3453_s1 + $0x1e4] ss:$16 sps:$4 sm:$0xff]   ;;  %v2346_v34 = vld [vmem:[%s3453_s1 + $0x1e0] ss:$16 sps:$4 sm:$0xff]  }
  0x12   :  { %v2344_v33 = vld [vmem:[%s3453_s1 + $0x3e4] ss:$16 sps:$4 sm:$0xff]   ;;  %v2347_v35 = vld [vmem:[%s3453_s1 + $0x3e0] ss:$16 sps:$4 sm:$0xff]  }
  0x13   :  { %1308 = vmatpush1.bf16.msra.mxu0 %v2322_v18  ;;  %v2348_v39 = vld [vmem:[%s3453_s1 + $0x1c4] ss:$16 sps:$4 sm:$0xff]   ;;  %v2352_v41 = vld [vmem:[%s3453_s1 + $0x1c0] ss:$16 sps:$4 sm:$0xff]   ;;  %v258_v18 = vcombine.high %v2893_v13, %v2893_v13 }
  0x14   :  { %1349 = vmatpush1.bf16.msra.mxu1 %v2323_v19  ;;  %1309 = vmatprep.subr.bf16.mxu0 %v2324_v20  ;;  %v2350_v40 = vld [vmem:[%s3453_s1 + $0x3c4] ss:$16 sps:$4 sm:$0xff]   ;;  %v2353_v44 = vld [vmem:[%s3453_s1 + $0x3c0] ss:$16 sps:$4 sm:$0xff]  }
  0x15   :  { %1350 = vmatprep.subr.bf16.mxu1 %v2326_v21  ;;  %v2354_v45 = vld [vmem:[%s3453_s1 + $0x1a4] ss:$16 sps:$4 sm:$0xff]   ;;  %v2358_v47 = vld [vmem:[%s3453_s1 + $0x1a0] ss:$16 sps:$4 sm:$0xff]   ;;  %v243_v21 = vcombine.high %v23_v12, %v23_v12 }
  0x16   :  { %v2356_v46 = vld [vmem:[%s3453_s1 + $0x3a4] ss:$16 sps:$4 sm:$0xff]   ;;  %v2359_v48 = vld [vmem:[%s3453_s1 + $0x3a0] ss:$16 sps:$4 sm:$0xff]  }
  0x17   :  { %1310 = vmatpush1.bf16.msra.mxu0 %v2328_v22  ;;  %v2360_v50 = vld [vmem:[%s3453_s1 + $0x184] ss:$16 sps:$4 sm:$0xff]   ;;  %v2364_v53 = vld [vmem:[%s3453_s1 + $0x180] ss:$16 sps:$4 sm:$0xff]  }
  0x18   :  { %1351 = vmatpush1.bf16.msra.mxu1 %v2329_v23  ;;  %1311 = vmatprep.subr.bf16.mxu0 %v2330_v24  ;;  %v2362_v51 = vld [vmem:[%s3453_s1 + $0x384] ss:$16 sps:$4 sm:$0xff]   ;;  %v2365_v56 = vld [vmem:[%s3453_s1 + $0x380] ss:$16 sps:$4 sm:$0xff]  }
  0x19   :  { %1352 = vmatprep.subr.bf16.mxu1 %v2332_v25  ;;  %v22_v52 = vld [vmem:[%s3452_s0] sm:$0xff] }
  0x1a   :  { %v233_v54 = vrot.slane %v22_v52, %v2822_v49  ;;  %v226_v55 = vcombine.high %v22_v52, %v22_v52  ;;  %v2366_v57 = vld [vmem:[%s3453_s1 + $0x164] ss:$16 sps:$4 sm:$0xff]   ;;  %v2370_v61 = vld [vmem:[%s3453_s1 + $0x160] ss:$16 sps:$4 sm:$0xff]   ;;  %v2431_v52 = vld [vmem:[%s3453_s1 + $0x68] ss:$16 sps:$4 sm:$0xff]  }
  0x1b   :  { %1312 = vmatpush1.bf16.msra.mxu0 %v2334_v26  ;;  %v2368_v58 = vld [vmem:[%s3453_s1 + $0x364] ss:$16 sps:$4 sm:$0xff]   ;;  %v2371_v0 = vld [vmem:[%s3453_s1 + $0x360] ss:$16 sps:$4 sm:$0xff]   ;;  %v2925_v26 = vpack.c.bf16 %v258_v18, %v258_v18  ;;  %v2473_v18 = vld [vmem:[%s3453_s1 + $0x188] ss:$16 sps:$4 sm:$0xff]  }
  0x1c   :  { %1353 = vmatpush1.bf16.msra.mxu1 %v2335_v27  ;;  %1313 = vmatprep.subr.bf16.mxu0 %v2336_v28  ;;  %v241_v59 = vcombine.high %v233_v54, %v233_v54  ;;  %v240_v60 = vrot.slane %v226_v55, %v2822_v49  ;;  %v2372_v1 = vld [vmem:[%s3453_s1 + $0x144] ss:$16 sps:$4 sm:$0xff]   ;;  %v2376_v4 = vld [vmem:[%s3453_s1 + $0x140] ss:$16 sps:$4 sm:$0xff]   ;;  %v2909_v19 = vpack.c.bf16 %v233_v54, %v233_v54  ;;  %v2439_v54 = vld [vmem:[%s3453_s1 + $0x4c] ss:$16 sps:$4 sm:$0xff]  }
  0x1d   :  { %1354 = vmatprep.subr.bf16.mxu1 %v2338_v29  ;;  %v2374_v2 = vld [vmem:[%s3453_s1 + $0x344] ss:$16 sps:$4 sm:$0xff]   ;;  %v2377_v5 = vld [vmem:[%s3453_s1 + $0x340] ss:$16 sps:$4 sm:$0xff]   ;;  %v257_v27 = vrot.slane %v243_v21, %v2822_v49 }
  0x1e   :  { %v2850_v62 = vpack.c.bf16 %v241_v59, %v241_v59  ;;  %v242_v63 = vcombine.high %v240_v60, %v240_v60  ;;  %v2378_v6 = vld [vmem:[%s3453_s1 + $0x124] ss:$16 sps:$4 sm:$0xff]   ;;  %v2382_v8 = vld [vmem:[%s3453_s1 + $0x120] ss:$16 sps:$4 sm:$0xff]   ;;  %v2911_v20 = vpack.c.bf16 %v240_v60, %v240_v60  ;;  %v2443_v60 = vld [vmem:[%s3453_s1 + $0x28] ss:$16 sps:$4 sm:$0xff]  }
  0x1f   :  { %1314 = vmatpush1.bf16.msra.mxu0 %v2340_v30  ;;  %v2380_v7 = vld [vmem:[%s3453_s1 + $0x324] ss:$16 sps:$4 sm:$0xff]   ;;  %v2383_v9 = vld [vmem:[%s3453_s1 + $0x320] ss:$16 sps:$4 sm:$0xff]  }
  0x20   :  { %1355 = vmatpush1.bf16.msra.mxu1 %v2341_v31  ;;  %1315 = vmatprep.subr.bf16.mxu0 %v2342_v32  ;;  %v2861_v3 = vpack.c.bf16 %v242_v63, %v242_v63  ;;  %v2384_v10 = vld [vmem:[%s3453_s1 + $0x104] ss:$16 sps:$4 sm:$0xff]   ;;  %v2388_v14 = vld [vmem:[%s3453_s1 + $0x100] ss:$16 sps:$4 sm:$0xff]   ;;  %v2409_v31 = vld [vmem:[%s3453_s1 + $0xec] ss:$16 sps:$4 sm:$0xff]  }
  0x21   :  { %1356 = vmatprep.subr.bf16.mxu1 %v2344_v33  ;;  %1331 = vmatprep.mubr.bf16.mxu0 %v2850_v62  ;;  %v2386_v11 = vld [vmem:[%s3453_s1 + $0x304] ss:$16 sps:$4 sm:$0xff]   ;;  %v2389_v15 = vld [vmem:[%s3453_s1 + $0x300] ss:$16 sps:$4 sm:$0xff]   ;;  %v2655_v32 = vmov 0   ;;  %v2944_v33 = vpack.c.bf16 %v257_v27, %v257_v27 }
  0x22   :  { %1372 = vmatprep.mubr.bf16.mxu1 %v2861_v3  ;;  %v2393_v16 = vld [vmem:[%s3453_s1 + $0x4e4] ss:$16 sps:$4 sm:$0xff]   ;;  %v2391_v22 = vld [vmem:[%s3453_s1 + $0x4e0] ss:$16 sps:$4 sm:$0xff]   ;;  %v2487_v27 = vld [vmem:[%s3453_s1 + $0x14c] ss:$16 sps:$4 sm:$0xff]  }
  0x23   :  { %1316 = vmatpush2.bf16.msra.mxu0 %v2346_v34  ;;  %v2396_v17 = vld [vmem:[%s3453_s1 + $0x624] ss:$16 sps:$4 sm:$0xff]   ;;  %v2394_v23 = vld [vmem:[%s3453_s1 + $0x620] ss:$16 sps:$4 sm:$0xff]  }
  0x24   :  { %1357 = vmatpush2.bf16.msra.mxu1 %v2347_v35  ;;  %1317 = vmatprep.subr.bf16.mxu0 %v2348_v39  ;;  %v2399_v24 = vld [vmem:[%s3453_s1 + $0x4c4] ss:$16 sps:$4 sm:$0xff]   ;;  %v2397_v28 = vld [vmem:[%s3453_s1 + $0x4c0] ss:$16 sps:$4 sm:$0xff]   ;;  %v2407_v35 = vld [vmem:[%s3453_s1 + $0xe8] ss:$16 sps:$4 sm:$0xff]  }
  0x25   :  { %1358 = vmatprep.subr.bf16.mxu1 %v2350_v40  ;;  %v2402_v25 = vld [vmem:[%s3453_s1 + $0x604] ss:$16 sps:$4 sm:$0xff]   ;;  %v2400_v29 = vld [vmem:[%s3453_s1 + $0x600] ss:$16 sps:$4 sm:$0xff]   ;;  %v2413_v39 = vld [vmem:[%s3453_s1 + $0xc8] ss:$16 sps:$4 sm:$0xff]  }
  0x26   :  { %v2405_v30 = vld [vmem:[%s3453_s1 + $0x4a4] ss:$16 sps:$4 sm:$0xff]   ;;  %v2403_v34 = vld [vmem:[%s3453_s1 + $0x4a0] ss:$16 sps:$4 sm:$0xff]  }
  0x27   :  { %1318 = vmatpush2.bf16.msra.mxu0 %v2352_v41  ;;  %v2412_v36 = vld [vmem:[%s3453_s1 + $0x484] ss:$16 sps:$4 sm:$0xff]   ;;  %v2410_v38 = vld [vmem:[%s3453_s1 + $0x480] ss:$16 sps:$4 sm:$0xff]   ;;  %v2421_v41 = vld [vmem:[%s3453_s1 + $0xac] ss:$16 sps:$4 sm:$0xff]  }
  0x28   :  { %1359 = vmatpush2.bf16.msra.mxu1 %v2353_v44  ;;  %1319 = vmatprep.subr.bf16.mxu0 %v2354_v45  ;;  %v2418_v40 = vld [vmem:[%s3453_s1 + $0x464] ss:$16 sps:$4 sm:$0xff]   ;;  %v2416_v42 = vld [vmem:[%s3453_s1 + $0x460] ss:$16 sps:$4 sm:$0xff]   ;;  %v2419_v44 = vld [vmem:[%s3453_s1 + $0xa8] ss:$16 sps:$4 sm:$0xff]  }
  0x29   :  { %1360 = vmatprep.subr.bf16.mxu1 %v2356_v46  ;;  %v2424_v45 = vld [vmem:[%s3453_s1 + $0x444] ss:$16 sps:$4 sm:$0xff]   ;;  %v2427_v46 = vld [vmem:[%s3453_s1 + $0x8c] ss:$16 sps:$4 sm:$0xff]   ;;  %v2434_v55 = vld [vmem:[%s3453_s1 + $0x400] ss:$16 sps:$4 sm:$0xff]  }
  0x2a   :  { %v2430_v49 = vld [vmem:[%s3453_s1 + $0x424] ss:$16 sps:$4 sm:$0xff]   ;;  %v2440_v59 = vld [vmem:[%s3453_s1 + $0x5e0] ss:$16 sps:$4 sm:$0xff]  }
  0x2b   :  { %1320 = vmatpush2.bf16.msra.mxu0 %v2358_v47  ;;  %v2422_v47 = vld [vmem:[%s3453_s1 + $0x440] ss:$16 sps:$4 sm:$0xff]   ;;  %v2478_v21 = vld [vmem:[%s3453_s1 + $0x524] ss:$16 sps:$4 sm:$0xff]  }
  0x2c   :  { %1361 = vmatpush2.bf16.msra.mxu1 %v2359_v48  ;;  %1321 = vmatprep.subr.bf16.mxu0 %v2360_v50  ;;  %v2425_v48 = vld [vmem:[%s3453_s1 + $0x88] ss:$16 sps:$4 sm:$0xff]   ;;  %v2433_v50 = vld [vmem:[%s3453_s1 + $0x6c] ss:$16 sps:$4 sm:$0xff]   ;;  %v2446_v63 = vld [vmem:[%s3453_s1 + $0x5c0] ss:$16 sps:$4 sm:$0xff]  }
  0x2d   :  { %1362 = vmatprep.subr.bf16.mxu1 %v2362_v51  ;;  %v2428_v51 = vld [vmem:[%s3453_s1 + $0x420] ss:$16 sps:$4 sm:$0xff]  }
  0x2e   :  { %v2464_v12 = vld [vmem:[%s3453_s1 + $0x560] ss:$16 sps:$4 sm:$0xff]  }
  0x2f   :  { %1322 = vmatpush2.bf16.msra.mxu0 %v2364_v53  ;;  %v2436_v53 = vld [vmem:[%s3453_s1 + $0x404] ss:$16 sps:$4 sm:$0xff]  }
  0x30   :  { %1363 = vmatpush2.bf16.msra.mxu1 %v2365_v56  ;;  %1323 = vmatprep.subr.bf16.mxu0 %v2366_v57  ;;  %v2437_v56 = vld [vmem:[%s3453_s1 + $0x48] ss:$16 sps:$4 sm:$0xff]   ;;  %v2442_v57 = vld [vmem:[%s3453_s1 + $0x5e4] ss:$16 sps:$4 sm:$0xff]  }
  0x31   :  { %1364 = vmatprep.subr.bf16.mxu1 %v2368_v58  ;;  %v2445_v58 = vld [vmem:[%s3453_s1 + $0x2c] ss:$16 sps:$4 sm:$0xff]  }
  0x33   :  { %1324 = vmatpush2.bf16.msra.mxu0 %v2370_v61  ;;  %v2448_v61 = vld [vmem:[%s3453_s1 + $0x5c4] ss:$16 sps:$4 sm:$0xff]  }
  0x34   :  { %1365 = vmatpush2.bf16.msra.mxu1 %v2371_v0  ;;  %1325 = vmatprep.subr.bf16.mxu0 %v2372_v1  ;;  %v2449_v0 = vld [vmem:[%s3453_s1 + $0x8] ss:$16 sps:$4 sm:$0xff]   ;;  %v2454_v1 = vld [vmem:[%s3453_s1 + $0x5a4] ss:$16 sps:$4 sm:$0xff]  }
  0x35   :  { %1366 = vmatprep.subr.bf16.mxu1 %v2374_v2  ;;  %v2457_v2 = vld [vmem:[%s3453_s1 + $0x1ec] ss:$16 sps:$4 sm:$0xff]  }
  0x37   :  { %1326 = vmatpush2.bf16.msra.mxu0 %v2376_v4  ;;  %v2452_v4 = vld [vmem:[%s3453_s1 + $0x5a0] ss:$16 sps:$4 sm:$0xff]  }
  0x38   :  { %1367 = vmatpush2.bf16.msra.mxu1 %v2377_v5  ;;  %1327 = vmatprep.subr.bf16.mxu0 %v2378_v6  ;;  %v2455_v5 = vld [vmem:[%s3453_s1 + $0x1e8] ss:$16 sps:$4 sm:$0xff]   ;;  %v2460_v6 = vld [vmem:[%s3453_s1 + $0x584] ss:$16 sps:$4 sm:$0xff]  }
  0x39   :  { %1368 = vmatprep.subr.bf16.mxu1 %v2380_v7  ;;  %v2463_v7 = vld [vmem:[%s3453_s1 + $0x1cc] ss:$16 sps:$4 sm:$0xff]  }
  0x3b   :  { %1328 = vmatpush2.bf16.msra.mxu0 %v2382_v8  ;;  %v2458_v8 = vld [vmem:[%s3453_s1 + $0x580] ss:$16 sps:$4 sm:$0xff]  }
  0x3c   :  { %1369 = vmatpush2.bf16.msra.mxu1 %v2383_v9  ;;  %1329 = vmatprep.subr.bf16.mxu0 %v2384_v10  ;;  %v2461_v9 = vld [vmem:[%s3453_s1 + $0x1c8] ss:$16 sps:$4 sm:$0xff]   ;;  %v2466_v10 = vld [vmem:[%s3453_s1 + $0x564] ss:$16 sps:$4 sm:$0xff]  }
  0x3d   :  { %1370 = vmatprep.subr.bf16.mxu1 %v2386_v11  ;;  %v2469_v11 = vld [vmem:[%s3453_s1 + $0x1ac] ss:$16 sps:$4 sm:$0xff]  }
  0x3f   :  { %1330 = vmatpush2.bf16.msra.mxu0 %v2388_v14  ;;  %v2467_v14 = vld [vmem:[%s3453_s1 + $0x1a8] ss:$16 sps:$4 sm:$0xff]  }
  0x40   :  { %1371 = vmatpush2.bf16.msra.mxu1 %v2389_v15  ;;  %1381 = vmatprep.subr.bf16.mxu0 %v2393_v16  ;;  %v2472_v15 = vld [vmem:[%s3453_s1 + $0x544] ss:$16 sps:$4 sm:$0xff]   ;;  %v2475_v16 = vld [vmem:[%s3453_s1 + $0x18c] ss:$16 sps:$4 sm:$0xff]  }
  0x41   :  { %1434 = vmatprep.subr.bf16.mxu1 %v2396_v17  ;;  %v2470_v17 = vld [vmem:[%s3453_s1 + $0x540] ss:$16 sps:$4 sm:$0xff]  }
  0x42   :  { %1332 = vmatmul.mubr.bf16.vlgmr.msra.gmra.mxu0 %v2909_v19 }
  0x43   :  { %1373 = vmatmul.mubr.bf16.vlgmr.msra.gmra.mxu1 %v2911_v20  ;;  %1382 = vmatpush1.bf16.msra.mxu0 %v2391_v22  ;;  %v2481_v22 = vld [vmem:[%s3453_s1 + $0x16c] ss:$16 sps:$4 sm:$0xff]  }
  0x44   :  { %1435 = vmatpush1.bf16.msra.mxu1 %v2394_v23  ;;  %1383 = vmatprep.subr.bf16.mxu0 %v2399_v24  ;;  %v2476_v23 = vld [vmem:[%s3453_s1 + $0x520] ss:$16 sps:$4 sm:$0xff]   ;;  %v2479_v24 = vld [vmem:[%s3453_s1 + $0x168] ss:$16 sps:$4 sm:$0xff]  }
  0x45   :  { %1436 = vmatprep.subr.bf16.mxu1 %v2402_v25  ;;  %1454 = vmatprep.mubr.bf16.mxu1 %v2655_v32  ;;  %v2484_v25 = vld [vmem:[%s3453_s1 + $0x504] ss:$16 sps:$4 sm:$0xff]  }
  0x46   :  { %1413 = vmatprep.mubr.bf16.mxu0 %v2925_v26 }
  0x47   :  { %1384 = vmatpush1.bf16.msra.mxu0 %v2397_v28  ;;  %v2482_v28 = vld [vmem:[%s3453_s1 + $0x500] ss:$16 sps:$4 sm:$0xff]  }
  0x48   :  { %1437 = vmatpush1.bf16.msra.mxu1 %v2400_v29  ;;  %1385 = vmatprep.subr.bf16.mxu0 %v2405_v30  ;;  %v2485_v29 = vld [vmem:[%s3453_s1 + $0x148] ss:$16 sps:$4 sm:$0xff]   ;;  %v2490_v30 = vld [vmem:[%s3453_s1 + $0x12c] ss:$16 sps:$4 sm:$0xff]  }
  0x49   :  { %1463 = vmatprep.subr.bf16.mxu1 %v2409_v31  ;;  %v2493_v31 = vld [vmem:[%s3453_s1 + $0x2ec] ss:$16 sps:$4 sm:$0xff]  }
  0x4b   :  { %2210 = vmatmul.mubr.msk.bf16.vlgmr.msra.gmra.mxu1 %vm1295_vm0, %v2944_v33  ;;  %1386 = vmatpush1.bf16.msra.mxu0 %v2403_v34  ;;  %v3119_v34 = vpack.c.bf16 %v2893_v13, %v2893_v13  ;;  %v2499_v13 = vld [vmem:[%s3453_s1 + $0x2cc] ss:$16 sps:$4 sm:$0xff]  }
  0x4c   :  { %1464 = vmatpush1.bf16.msra.mxu1 %v2407_v35  ;;  %1387 = vmatprep.subr.bf16.mxu0 %v2412_v36  ;;  %v2488_v35 = vld [vmem:[%s3453_s1 + $0x128] ss:$16 sps:$4 sm:$0xff]  }
  0x4d   :  { %1465 = vmatprep.subr.bf16.mxu1 %v2415_v37  ;;  %1495 = vmatprep.mubr.bf16.mxu1 %v2850_v62  ;;  %v2451_v62 = vld [vmem:[%s3453_s1 + $0xc] ss:$16 sps:$4 sm:$0xff]   ;;  %v2491_v36 = vld [vmem:[%s3453_s1 + $0x2e8] ss:$16 sps:$4 sm:$0xff]  }
  0x4e   :  { %v2496_v37 = vld [vmem:[%s3453_s1 + $0x10c] ss:$16 sps:$4 sm:$0xff]  }
  0x4f   :  { %1388 = vmatpush1.bf16.msra.mxu0 %v2410_v38  ;;  %v2494_v38 = vld [vmem:[%s3453_s1 + $0x108] ss:$16 sps:$4 sm:$0xff]  }
  0x50   :  { %1466 = vmatpush1.bf16.msra.mxu1 %v2413_v39  ;;  %1389 = vmatprep.subr.bf16.mxu0 %v2418_v40  ;;  %v2497_v39 = vld [vmem:[%s3453_s1 + $0x2c8] ss:$16 sps:$4 sm:$0xff]   ;;  %v2502_v40 = vld [vmem:[%s3453_s1 + $0x2ac] ss:$16 sps:$4 sm:$0xff]  }
  0x51   :  { %1467 = vmatprep.subr.bf16.mxu1 %v2421_v41  ;;  %v2505_v41 = vld [vmem:[%s3453_s1 + $0x4ec] ss:$16 sps:$4 sm:$0xff]  }
  0x53   :  { %1390 = vmatpush1.bf16.msra.mxu0 %v2416_v42  ;;  %v2500_v42 = vld [vmem:[%s3453_s1 + $0x2a8] ss:$16 sps:$4 sm:$0xff]  }
  0x54   :  { %1468 = vmatpush1.bf16.msra.mxu1 %v2419_v44  ;;  %1391 = vmatprep.subr.bf16.mxu0 %v2424_v45  ;;  %v2503_v44 = vld [vmem:[%s3453_s1 + $0x4e8] ss:$16 sps:$4 sm:$0xff]   ;;  %v2508_v45 = vld [vmem:[%s3453_s1 + $0x28c] ss:$16 sps:$4 sm:$0xff]  }
  0x55   :  { %1469 = vmatprep.subr.bf16.mxu1 %v2427_v46  ;;  %v2511_v46 = vld [vmem:[%s3453_s1 + $0x4cc] ss:$16 sps:$4 sm:$0xff]  }
  0x57   :  { %1392 = vmatpush1.bf16.msra.mxu0 %v2422_v47  ;;  %v2506_v47 = vld [vmem:[%s3453_s1 + $0x288] ss:$16 sps:$4 sm:$0xff]  }
  0x58   :  { %1470 = vmatpush1.bf16.msra.mxu1 %v2425_v48  ;;  %1393 = vmatprep.subr.bf16.mxu0 %v2430_v49  ;;  %v2514_v48 = vld [vmem:[%s3453_s1 + $0x26c] ss:$16 sps:$4 sm:$0xff]  }
  0x59   :  { %1471 = vmatprep.subr.bf16.mxu1 %v2433_v50  ;;  %v2517_v49 = vld [vmem:[%s3453_s1 + $0x4ac] ss:$16 sps:$4 sm:$0xff]   ;;  %v2512_v50 = vld [vmem:[%s3453_s1 + $0x268] ss:$16 sps:$4 sm:$0xff]  }
  0x5b   :  { %1394 = vmatpush1.bf16.msra.mxu0 %v2428_v51  ;;  %v2520_v51 = vld [vmem:[%s3453_s1 + $0x24c] ss:$16 sps:$4 sm:$0xff]  }
  0x5c   :  { %1472 = vmatpush1.bf16.msra.mxu1 %v2431_v52  ;;  %1395 = vmatprep.subr.bf16.mxu0 %v2436_v53  ;;  %v2523_v52 = vld [vmem:[%s3453_s1 + $0x48c] ss:$16 sps:$4 sm:$0xff]   ;;  %v2518_v53 = vld [vmem:[%s3453_s1 + $0x248] ss:$16 sps:$4 sm:$0xff]  }
  0x5d   :  { %1473 = vmatprep.subr.bf16.mxu1 %v2439_v54  ;;  %v2526_v54 = vld [vmem:[%s3453_s1 + $0x22c] ss:$16 sps:$4 sm:$0xff]  }
  0x5f   :  { %1396 = vmatpush1.bf16.msra.mxu0 %v2434_v55  ;;  %v2529_v55 = vld [vmem:[%s3453_s1 + $0x46c] ss:$16 sps:$4 sm:$0xff]  }
  0x60   :  { %1474 = vmatpush1.bf16.msra.mxu1 %v2437_v56  ;;  %1397 = vmatprep.subr.bf16.mxu0 %v2442_v57  ;;  %v2524_v56 = vld [vmem:[%s3453_s1 + $0x228] ss:$16 sps:$4 sm:$0xff]  }
  0x61   :  { %1475 = vmatprep.subr.bf16.mxu1 %v2445_v58  ;;  %v2527_v57 = vld [vmem:[%s3453_s1 + $0x468] ss:$16 sps:$4 sm:$0xff]   ;;  %v2532_v58 = vld [vmem:[%s3453_s1 + $0x20c] ss:$16 sps:$4 sm:$0xff]  }
  0x63   :  { %1398 = vmatpush2.bf16.msra.mxu0 %v2440_v59  ;;  %v2535_v59 = vld [vmem:[%s3453_s1 + $0x44c] ss:$16 sps:$4 sm:$0xff]  }
  0x64   :  { %1476 = vmatpush1.bf16.msra.mxu1 %v2443_v60  ;;  %1399 = vmatprep.subr.bf16.mxu0 %v2448_v61  ;;  %v2530_v60 = vld [vmem:[%s3453_s1 + $0x208] ss:$16 sps:$4 sm:$0xff]  }
  0x65   :  { %1477 = vmatprep.subr.bf16.mxu1 %v2451_v62  ;;  %v2533_v61 = vld [vmem:[%s3453_s1 + $0x448] ss:$16 sps:$4 sm:$0xff]   ;;  %v2538_v62 = vld [vmem:[%s3453_s1 + $0x3ec] ss:$16 sps:$4 sm:$0xff]  }
  0x67   :  { %1400 = vmatpush2.bf16.msra.mxu0 %v2446_v63  ;;  %v2541_v63 = vld [vmem:[%s3453_s1 + $0x42c] ss:$16 sps:$4 sm:$0xff]  }
  0x68   :  { %1478 = vmatpush1.bf16.msra.mxu1 %v2449_v0  ;;  %1401 = vmatprep.subr.bf16.mxu0 %v2454_v1 }
  0x69   :  { %1479 = vmatprep.subr.bf16.mxu1 %v2457_v2 }
  0x6b   :  { %1402 = vmatpush2.bf16.msra.mxu0 %v2452_v4 }
  0x6c   :  { %1480 = vmatpush2.bf16.msra.mxu1 %v2455_v5  ;;  %1403 = vmatprep.subr.bf16.mxu0 %v2460_v6 }
  0x6d   :  { %1481 = vmatprep.subr.bf16.mxu1 %v2463_v7 }
  0x6f   :  { %1404 = vmatpush2.bf16.msra.mxu0 %v2458_v8 }
  0x70   :  { %1482 = vmatpush2.bf16.msra.mxu1 %v2461_v9  ;;  %1405 = vmatprep.subr.bf16.mxu0 %v2466_v10 }
  0x71   :  { %1483 = vmatprep.subr.bf16.mxu1 %v2469_v11 }
  0x73   :  { %1406 = vmatpush2.bf16.msra.mxu0 %v2464_v12 }
  0x74   :  { %1484 = vmatpush2.bf16.msra.mxu1 %v2467_v14  ;;  %1407 = vmatprep.subr.bf16.mxu0 %v2472_v15 }
  0x75   :  { %1485 = vmatprep.subr.bf16.mxu1 %v2475_v16 }
  0x77   :  { %1408 = vmatpush2.bf16.msra.mxu0 %v2470_v17 }
  0x78   :  { %1486 = vmatpush2.bf16.msra.mxu1 %v2473_v18  ;;  %1409 = vmatprep.subr.bf16.mxu0 %v2478_v21 }
  0x79   :  { %1487 = vmatprep.subr.bf16.mxu1 %v2481_v22 }
  0x7b   :  { %1410 = vmatpush2.bf16.msra.mxu0 %v2476_v23 }
  0x7c   :  { %1488 = vmatpush2.bf16.msra.mxu1 %v2479_v24  ;;  %1411 = vmatprep.subr.bf16.mxu0 %v2484_v25 }
  0x7d   :  { %1489 = vmatprep.subr.bf16.mxu1 %v2487_v27 }
  0x7f   :  { %1412 = vmatpush2.bf16.msra.mxu0 %v2482_v28 }
  0x80   :  { %1490 = vmatpush2.bf16.msra.mxu1 %v2485_v29  ;;  %1504 = vmatprep.subr.bf16.mxu0 %v2493_v31 }
  0x81   :  { %1491 = vmatprep.subr.bf16.mxu1 %v2490_v30 }
  0x82   :  { %1414 = vmatmul.mubr.bf16.vlgmr.msra.gmra.mxu0 %v3119_v34 }
  0x83   :  { %1505 = vmatpush1.bf16.msra.mxu0 %v2491_v36  ;;  %1536 = vmatprep.mubr.bf16.mxu0 %v2861_v3  ;;  %v2509_v3 = vld [vmem:[%s3453_s1 + $0x4c8] ss:$16 sps:$4 sm:$0xff]  }
  0x84   :  { %1492 = vmatpush2.bf16.msra.mxu1 %v2488_v35  ;;  %1506 = vmatprep.subr.bf16.mxu0 %v2499_v13 }
  0x85   :  { %1493 = vmatprep.subr.bf16.mxu1 %v2496_v37 }
  0x87   :  { %1507 = vmatpush1.bf16.msra.mxu0 %v2497_v39 }
  0x88   :  { %1494 = vmatpush2.bf16.msra.mxu1 %v2494_v38  ;;  %1508 = vmatprep.subr.bf16.mxu0 %v2502_v40 }
  0x89   :  { %1545 = vmatprep.subr.bf16.mxu1 %v2505_v41 }
  0x8b   :  { %1496 = vmatmul.mubr.bf16.vlgmr.msra.gmra.mxu1 %v2909_v19  ;;  %1509 = vmatpush1.bf16.msra.mxu0 %v2500_v42  ;;  %v2515_v19 = vld [vmem:[%s3453_s1 + $0x4a8] ss:$16 sps:$4 sm:$0xff]  }
  0x8c   :  { %1546 = vmatpush1.bf16.msra.mxu1 %v2503_v44  ;;  %1510 = vmatprep.subr.bf16.mxu0 %v2508_v45 }
  0x8d   :  { %1547 = vmatprep.subr.bf16.mxu1 %v2511_v46  ;;  %1577 = vmatprep.mubr.bf16.mxu1 %v2925_v26  ;;  %v2521_v26 = vld [vmem:[%s3453_s1 + $0x488] ss:$16 sps:$4 sm:$0xff]  }
  0x8f   :  { %1511 = vmatpush1.bf16.msra.mxu0 %v2506_v47 }
  0x90   :  { %1548 = vmatpush1.bf16.msra.mxu1 %v2509_v3  ;;  %1512 = vmatprep.subr.bf16.mxu0 %v2514_v48 }
  0x91   :  { %1549 = vmatprep.subr.bf16.mxu1 %v2517_v49 }
  0x93   :  { %1513 = vmatpush1.bf16.msra.mxu0 %v2512_v50 }
  0x94   :  { %1550 = vmatpush1.bf16.msra.mxu1 %v2515_v19  ;;  %1514 = vmatprep.subr.bf16.mxu0 %v2520_v51 }
  0x95   :  { %1551 = vmatprep.subr.bf16.mxu1 %v2523_v52 }
  0x97   :  { %1515 = vmatpush1.bf16.msra.mxu0 %v2518_v53 }
  0x98   :  { %1552 = vmatpush1.bf16.msra.mxu1 %v2521_v26  ;;  %1516 = vmatprep.subr.bf16.mxu0 %v2526_v54 }
  0x99   :  { %1553 = vmatprep.subr.bf16.mxu1 %v2529_v55 }
  0x9b   :  { %1517 = vmatpush1.bf16.msra.mxu0 %v2524_v56 }
  0x9c   :  { %1554 = vmatpush1.bf16.msra.mxu1 %v2527_v57  ;;  %1518 = vmatprep.subr.bf16.mxu0 %v2532_v58 }
  0x9d   :  { %1555 = vmatprep.subr.bf16.mxu1 %v2535_v59 }
  0x9e   :  { %10 = vsyncpa [#allocation3], 0  ;;  %v2536_v0 = vld [vmem:[%s3453_s1 + $0x3e8] ss:$16 sps:$4 sm:$0xff]   ;;  %v2544_v2 = vld [vmem:[%s3453_s1 + $0x3cc] ss:$16 sps:$4 sm:$0xff]  }
  0x9f   :  { %1519 = vmatpush1.bf16.msra.mxu0 %v2530_v60  ;;  %v2539_v1 = vld [vmem:[%s3453_s1 + $0x428] ss:$16 sps:$4 sm:$0xff]   ;;  %v2547_v4 = vld [vmem:[%s3453_s1 + $0x40c] ss:$16 sps:$4 sm:$0xff]   ;;  %v2598_v47 = vld [vmem:[%s3455_s3 + $0x70] sm:$0xff]   ;;  %vm1898_vm1 = vcmask 1041408  }
  0xa0   :  { %1556 = vmatpush1.bf16.msra.mxu1 %v2533_v61  ;;  %1520 = vmatprep.subr.bf16.mxu0 %v2538_v62  ;;  %v2542_v5 = vld [vmem:[%s3453_s1 + $0x3c8] ss:$16 sps:$4 sm:$0xff]   ;;  %v2550_v7 = vld [vmem:[%s3453_s1 + $0x3ac] ss:$16 sps:$4 sm:$0xff]   ;;  %v2614_v50 = vld [vmem:[%s3455_s3 + $0xf0] sm:$0xff]   ;;  %vm1894_vm2 = vcmask 949248  }
  0xa1   :  { %1557 = vmatprep.subr.bf16.mxu1 %v2541_v63  ;;  %v2545_v6 = vld [vmem:[%s3453_s1 + $0x408] ss:$16 sps:$4 sm:$0xff]   ;;  %v2553_v8 = vld [vmem:[%s3453_s1 + $0x5ec] ss:$16 sps:$4 sm:$0xff]   ;;  %v2603_v19 = vld [vmem:[%s3455_s3 + $0x20] sm:$0xff]   ;;  %vm1982_vm3 = vcmask 74752  }
  0xa2   :  { %v2548_v9 = vld [vmem:[%s3453_s1 + $0x3a8] ss:$16 sps:$4 sm:$0xff]   ;;  %v2556_v11 = vld [vmem:[%s3453_s1 + $0x38c] ss:$16 sps:$4 sm:$0xff]   ;;  %v2615_v51 = vld [vmem:[%s3455_s3 + $0xb0] sm:$0xff]  }
  0xa3   :  { %1521 = vmatpush2.bf16.msra.mxu0 %v2536_v0  ;;  %v2551_v10 = vld [vmem:[%s3453_s1 + $0x5e8] ss:$16 sps:$4 sm:$0xff]   ;;  %v2559_v12 = vld [vmem:[%s3453_s1 + $0x5cc] ss:$16 sps:$4 sm:$0xff]   ;;  %v2606_v55 = vld [vmem:[%s3455_s3 + $0x50] sm:$0xff]  }
  0xa4   :  { %1558 = vmatpush1.bf16.msra.mxu1 %v2539_v1  ;;  %1522 = vmatprep.subr.bf16.mxu0 %v2544_v2  ;;  %v2554_v14 = vld [vmem:[%s3453_s1 + $0x388] ss:$16 sps:$4 sm:$0xff]   ;;  %v2562_v16 = vld [vmem:[%s3453_s1 + $0x36c] ss:$16 sps:$4 sm:$0xff]   ;;  %v2607_v56 = vld [vmem:[%s3455_s3 + $0x10] sm:$0xff]  }
  0xa5   :  { %1559 = vmatprep.subr.bf16.mxu1 %v2547_v4  ;;  %v2557_v15 = vld [vmem:[%s3453_s1 + $0x5c8] ss:$16 sps:$4 sm:$0xff]   ;;  %v2565_v17 = vld [vmem:[%s3453_s1 + $0x5ac] ss:$16 sps:$4 sm:$0xff]   ;;  %v2610_v59 = vld [vmem:[%s3455_s3 + $0x40] sm:$0xff]  }
  0xa6   :  { %v2560_v18 = vld [vmem:[%s3453_s1 + $0x368] ss:$16 sps:$4 sm:$0xff]   ;;  %v2568_v22 = vld [vmem:[%s3453_s1 + $0x34c] ss:$16 sps:$4 sm:$0xff]   ;;  %v2611_v60 = vld [vmem:[%s3455_s3] sm:$0xff]  }
  0xa7   :  { %1523 = vmatpush2.bf16.msra.mxu0 %v2542_v5  ;;  %v2563_v21 = vld [vmem:[%s3453_s1 + $0x5a8] ss:$16 sps:$4 sm:$0xff]   ;;  %v2571_v23 = vld [vmem:[%s3453_s1 + $0x58c] ss:$16 sps:$4 sm:$0xff]   ;;  %v2618_v61 = vld [vmem:[%s3455_s3 + $0xe0] sm:$0xff]  }
  0xa8   :  { %1560 = vmatpush1.bf16.msra.mxu1 %v2545_v6  ;;  %1524 = vmatprep.subr.bf16.mxu0 %v2550_v7  ;;  %v2566_v24 = vld [vmem:[%s3453_s1 + $0x348] ss:$16 sps:$4 sm:$0xff]   ;;  %v2574_v27 = vld [vmem:[%s3453_s1 + $0x32c] ss:$16 sps:$4 sm:$0xff]   ;;  %v2619_v62 = vld [vmem:[%s3455_s3 + $0xa0] sm:$0xff]  }
  0xa9   :  { %1561 = vmatprep.subr.bf16.mxu1 %v2553_v8  ;;  %v2569_v25 = vld [vmem:[%s3453_s1 + $0x588] ss:$16 sps:$4 sm:$0xff]   ;;  %v2577_v28 = vld [vmem:[%s3453_s1 + $0x56c] ss:$16 sps:$4 sm:$0xff]  }
  0xaa   :  { %v2572_v29 = vld [vmem:[%s3453_s1 + $0x328] ss:$16 sps:$4 sm:$0xff]   ;;  %v2580_v31 = vld [vmem:[%s3453_s1 + $0x30c] ss:$16 sps:$4 sm:$0xff]  }
  0xab   :  { %1525 = vmatpush2.bf16.msra.mxu0 %v2548_v9  ;;  %v2575_v30 = vld [vmem:[%s3453_s1 + $0x568] ss:$16 sps:$4 sm:$0xff]   ;;  %v2583_v35 = vld [vmem:[%s3453_s1 + $0x54c] ss:$16 sps:$4 sm:$0xff]  }
  0xac   :  { %1562 = vmatpush2.bf16.msra.mxu1 %v2551_v10  ;;  %1526 = vmatprep.subr.bf16.mxu0 %v2556_v11  ;;  %v2578_v36 = vld [vmem:[%s3453_s1 + $0x308] ss:$16 sps:$4 sm:$0xff]   ;;  %v2586_v13 = vld [vmem:[%s3453_s1 + $0x52c] ss:$16 sps:$4 sm:$0xff]   ;;  %v2622_v10 = vld [vmem:[%s3455_s3 + $0xd0] sm:$0xff]  }
  0xad   :  { %1563 = vmatprep.subr.bf16.mxu1 %v2559_v12  ;;  %v2581_v37 = vld [vmem:[%s3453_s1 + $0x548] ss:$16 sps:$4 sm:$0xff]   ;;  %v2589_v38 = vld [vmem:[%s3453_s1 + $0x62c] ss:$16 sps:$4 sm:$0xff]   ;;  %v2623_v11 = vld [vmem:[%s3455_s3 + $0x90] sm:$0xff]  }
  0xae   :  { %v2584_v39 = vld [vmem:[%s3453_s1 + $0x528] ss:$16 sps:$4 sm:$0xff]   ;;  %v2592_v41 = vld [vmem:[%s3453_s1 + $0x50c] ss:$16 sps:$4 sm:$0xff]  }
  0xaf   :  { %1527 = vmatpush2.bf16.msra.mxu0 %v2554_v14  ;;  %v2587_v40 = vld [vmem:[%s3453_s1 + $0x628] ss:$16 sps:$4 sm:$0xff]   ;;  %v2595_v42 = vld [vmem:[%s3453_s1 + $0x60c] ss:$16 sps:$4 sm:$0xff]  }
  0xb0   :  { %1564 = vmatpush2.bf16.msra.mxu1 %v2557_v15  ;;  %1528 = vmatprep.subr.bf16.mxu0 %v2562_v16  ;;  %v2590_v44 = vld [vmem:[%s3453_s1 + $0x508] ss:$16 sps:$4 sm:$0xff]  }
  0xb1   :  { %1565 = vmatprep.subr.bf16.mxu1 %v2565_v17  ;;  %v2593_v45 = vld [vmem:[%s3453_s1 + $0x608] ss:$16 sps:$4 sm:$0xff]  }
  0xb2   :  { %v2596_v46 = vld [vmem:[%s3455_s3 + $0x78] sm:$0xff]   ;;  %v2600_v3 = vld [vmem:[%s3455_s3 + $0x68] sm:$0xff]  }
  0xb3   :  { %1529 = vmatpush2.bf16.msra.mxu0 %v2560_v18  ;;  %v2601_v48 = vld [vmem:[%s3455_s3 + $0x28] sm:$0xff]   ;;  %v2613_v49 = vld [vmem:[%s3455_s3 + $0xb8] sm:$0xff]  }
  0xb4   :  { %1566 = vmatpush2.bf16.msra.mxu1 %v2563_v21  ;;  %1530 = vmatprep.subr.bf16.mxu0 %v2568_v22  ;;  %v2604_v52 = vld [vmem:[%s3455_s3 + $0x58] sm:$0xff]   ;;  %v2616_v53 = vld [vmem:[%s3455_s3 + $0xe8] sm:$0xff]   ;;  %v2626_v21 = vld [vmem:[%s3455_s3 + $0xc0] sm:$0xff]  }
  0xb5   :  { %1567 = vmatprep.subr.bf16.mxu1 %v2571_v23  ;;  %v2605_v26 = vld [vmem:[%s3455_s3 + $0x18] sm:$0xff]   ;;  %v2617_v54 = vld [vmem:[%s3455_s3 + $0xa8] sm:$0xff]   ;;  %v2627_v22 = vld [vmem:[%s3455_s3 + $0x80] sm:$0xff]   ;;  %v277_v23 = vsub.s32 0, %v2804_v43 }
  0xb6   :  { %v2608_v57 = vld [vmem:[%s3455_s3 + $0x48] sm:$0xff]   ;;  %v2620_v4 = vld [vmem:[%s3455_s3 + $0xd8] sm:$0xff]  }
  0xb7   :  { %1531 = vmatpush2.bf16.msra.mxu0 %v2566_v24  ;;  %v2609_v58 = vld [vmem:[%s3455_s3 + $0x8] sm:$0xff]   ;;  %v2621_v5 = vld [vmem:[%s3455_s3 + $0x98] sm:$0xff]   ;;  %v273_v24 = vld [vmem:[%s3454_s2] sm:$0xf] }
  0xb8   :  { %1568 = vmatpush2.bf16.msra.mxu1 %v2569_v25  ;;  %1532 = vmatprep.subr.bf16.mxu0 %v2574_v27  ;;  %v2624_v15 = vld [vmem:[%s3455_s3 + $0xc8] sm:$0xff]   ;;  %v281_v25 = vsub.s32 1, %v2804_v43  ;;  %v278_v27 = vrot.slane %v273_v24, %v277_v23 }
  0xb9   :  { %1569 = vmatprep.subr.bf16.mxu1 %v2577_v28  ;;  %v2625_v16 = vld [vmem:[%s3455_s3 + $0x88] sm:$0xff]  }
  0xba   :  { %v282_v28 = vrot.slane %v273_v24, %v281_v25 }
  0xbb   :  { %1533 = vmatpush2.bf16.msra.mxu0 %v2572_v29 }
  0xbc   :  { %1570 = vmatpush2.bf16.msra.mxu1 %v2575_v30  ;;  %1534 = vmatprep.subr.bf16.mxu0 %v2580_v31 }
  0xbd   :  { %1571 = vmatprep.subr.bf16.mxu1 %v2583_v35 }
  0xbf   :  { %1535 = vmatpush2.bf16.msra.mxu0 %v2578_v36 }
  0xc0   :  { %1572 = vmatpush2.bf16.msra.mxu1 %v2581_v37  ;;  %1598 = vmatprep.subr.bf16.mxu0 %v2589_v38 }
  0xc1   :  { %1573 = vmatprep.subr.bf16.mxu1 %v2586_v13 }
  0xc2   :  { %1537 = vmatmul.mubr.bf16.vlgmr.msra.gmra.mxu0 %v2911_v20  ;;  %v2597_v20 = vld [vmem:[%s3455_s3 + $0x38] sm:$0xff]  }
  0xc3   :  { %1599 = vmatpush1.bf16.msra.mxu0 %v2587_v40  ;;  %1618 = vmatprep.mubr.bf16.mxu0 %v2655_v32  ;;  %v2599_v32 = vld [vmem:[%s3455_s3 + $0x30] sm:$0xff]  }
  0xc4   :  { %1574 = vmatpush2.bf16.msra.mxu1 %v2584_v39  ;;  %1600 = vmatprep.subr.bf16.mxu0 %v2595_v42 }
  0xc5   :  { %1575 = vmatprep.subr.bf16.mxu1 %v2592_v41 }
  0xc7   :  { %1601 = vmatpush1.bf16.msra.mxu0 %v2593_v45 }
  0xc8   :  { %1576 = vmatpush2.bf16.msra.mxu1 %v2590_v44  ;;  %2246 = vmatprep.subr.bf16.mxu0 %v2596_v46 }
  0xca   :  { %2211 = vmatmul.mubr.msk.bf16.vlgmr.msra.gmra.mxu0 %vm1295_vm0, %v2944_v33  ;;  %v2612_v33 = vld [vmem:[%s3455_s3 + $0xf8] ss:$0 sps:$4 sm:$0x33]  }
  0xcb   :  { %1578 = vmatmul.mubr.bf16.vlgmr.msra.gmra.mxu1 %v3119_v34  ;;  %2247 = vmatpush3.bf16.msra.mxu0 %v2597_v20  ;;  %v2602_v34 = vld [vmem:[%s3455_s3 + $0x60] sm:$0xff]  }
  0xcc   :  { %2248 = vmatprep.subr.bf16.mxu0 %v2598_v47  ;;  %2290 = vmatprep.subr.msk.bf16.mxu1 %vm1898_vm1, %v2612_v33  ;;  %v289_v33 = vsub.s32 3, %v2804_v43 }
  0xcd   :  { %2269 = vmatpush3.bf16.msra.mxu1 %v2613_v49 }
  0xce   :  { %2270 = vmatprep.subr.bf16.mxu1 %v2614_v50 }
  0xcf   :  { %2249 = vmatpush3.bf16.msra.mxu0 %v2599_v32 }
  0xd0   :  { %2250 = vmatprep.subr.bf16.mxu0 %v2600_v3 }
  0xd1   :  { %2271 = vmatpush3.bf16.msra.mxu1 %v2615_v51  ;;  %v290_v51 = vrot.slane %v273_v24, %v289_v33 }
  0xd2   :  { %2272 = vmatprep.subr.bf16.mxu1 %v2616_v53 }
  0xd3   :  { %2251 = vmatpush3.bf16.msra.mxu0 %v2601_v48 }
  0xd4   :  { %2252 = vmatprep.subr.bf16.mxu0 %v2602_v34  ;;  %v285_v34 = vsub.s32 2, %v2804_v43 }
  0xd5   :  { %2273 = vmatpush3.bf16.msra.mxu1 %v2617_v54 }
  0xd6   :  { %2274 = vmatprep.subr.bf16.mxu1 %v2618_v61  ;;  %v286_v50 = vrot.slane %v273_v24, %v285_v34 }
  0xd7   :  { %2253 = vmatpush3.bf16.msra.mxu0 %v2603_v19 }
  0xd8   :  { %2254 = vmatprep.subr.bf16.mxu0 %v2604_v52 }
  0xd9   :  { %2275 = vmatpush3.bf16.msra.mxu1 %v2619_v62 }
  0xda   :  { %2276 = vmatprep.subr.bf16.mxu1 %v2620_v4 }
  0xdb   :  { %2255 = vmatpush3.bf16.msra.mxu0 %v2605_v26 }
  0xdc   :  { %2256 = vmatprep.subr.bf16.mxu0 %v2606_v55 }
  0xdd   :  { %2277 = vmatpush3.bf16.msra.mxu1 %v2621_v5 }
  0xde   :  { %2278 = vmatprep.subr.bf16.mxu1 %v2622_v10 }
  0xdf   :  { %2257 = vmatpush3.bf16.msra.mxu0 %v2607_v56 }
  0xe0   :  { %2258 = vmatprep.subr.bf16.mxu0 %v2608_v57 }
  0xe1   :  { %2279 = vmatpush3.bf16.msra.mxu1 %v2623_v11 }
  0xe2   :  { %2280 = vmatprep.subr.bf16.mxu1 %v2624_v15  ;;  %v2212_v15 = vld [vmem:[%s3456_s4] ss:$0 sm:$0xff]  ;;  %s2656_s4 = smov [#allocation2]  }
  0xe3   :  { %2259 = vmatpush3.bf16.msra.mxu0 %v2609_v58  ;;  %s2002_s22 = sshll.u32 %s2656_s4, 4  ;;  %s2003_s22 = int_to_ptr.vmem [resolvable:$true] %s2002_s22 }
  0xe4   :  { %2260 = vmatprep.subr.bf16.mxu0 %v2610_v59  ;;  %s2632_s23 = scalar_lea.vmem %s2003_s22, 32  ;;  %p2637_p1 = scmp.lt.s32.totalorder %s2003_s22, %s2003_s22 }
  0xe5   :  { %2281 = vmatpush3.bf16.msra.mxu1 %v2625_v16  ;;  %p2633_p0 = scmp.ne.s32.totalorder %s2003_s22, %s2632_s23  ;;  %p2638_p2 = scmp.lt.s32.totalorder %s2632_s23, %s2632_s23 }
  0xe6   :  { %2282 = vmatprep.subr.bf16.mxu1 %v2626_v21 }
  0xe7   :  { %2261 = vmatpush3.bf16.msra.mxu0 %v2611_v60  ;;  %p2639_p3 = por %p2638_p2, %p2637_p1 }
  0xe9   :  { %2283 = vmatpush3.bf16.msra.mxu1 %v2627_v22  ;;  %p2640_p4 = pnand %p2639_p3, %p2633_p0 }
 0x102   :  { %v1333_v63 = vpop.f32.mrf.mxu0 }
 0x103   :  { %v1374_v0 = vpop.f32.mrf.mxu1  ;;  %v1334_v29 = vadd.f32 %v1333_v63, %v278_v27 }
 0x104   :  { %v1335_v1 = vpop.f32.mrf.mxu0 }
 0x105   :  { %v1376_v2 = vpop.f32.mrf.mxu1  ;;  %v1336_v30 = vadd.f32 %v1335_v1, %v282_v28  ;;  %v1375_v31 = vadd.f32 %v1374_v0, %v1334_v29 }
 0x106   :  { %v1337_v6 = vpop.f32.mrf.mxu0 }
 0x107   :  { %v1378_v7 = vpop.f32.mrf.mxu1  ;;  %v1377_v36 = vadd.f32 %v1376_v2, %v1336_v30 }
 0x108   :  { %v1338_v8 = vpop.f32.mrf.mxu0 }
 0x109   :  { %v1379_v9 = vpop.f32.mrf.mxu1 }
 0x10b   :  { %v1456_v12 = vpop.f32.mrf.mxu1 }
 0x10d   :  { %v1458_v14 = vpop.f32.mrf.mxu1 }
 0x10f   :  { %v1460_v17 = vpop.f32.mrf.mxu1 }
 0x111   :  { %v1461_v18 = vpop.f32.mrf.mxu1 }
 0x142   :  { %v1415_v35 = vpop.f32.mrf.mxu0 }
 0x143   :  { %v1416_v37 = vadd.f32 %v1415_v35, %v1375_v31 }
 0x144   :  { %v1417_v13 = vpop.f32.mrf.mxu0 }
 0x145   :  { %v1457_v38 = vadd.f32 %v1456_v12, %v1416_v37  ;;  %v1418_v39 = vadd.f32 %v1417_v13, %v1377_v36 }
 0x146   :  { %v1419_v40 = vpop.f32.mrf.mxu0 }
 0x147   :  { %v1459_v41 = vadd.f32 %v1458_v14, %v1418_v39  ;;  %v1627_v42 = vmax.f32 %v1457_v38, 0.0 }
 0x148   :  { %v1420_v44 = vpop.f32.mrf.mxu0 }
 0x149   :  { %v1628_v45 = vmax.f32 %v1459_v41, 0.0  ;;  %v1694_v47 = vpack.c.bf16 %v1627_v42, %v1627_v42 }
 0x14b   :  { %v1497_v46 = vpop.f32.mrf.mxu1  ;;  %v1695_v20 = vpack.c.bf16 %v1628_v45, %v1628_v45 }
 0x14c   :  { %v1498_v53 = vadd.f32 %v1497_v46, %v286_v50 }
 0x14d   :  { %v1499_v32 = vpop.f32.mrf.mxu1  ;;  %1934 = vmatprep.mubr.bf16.mxu0 %v1695_v20 }
 0x14e   :  { %1935 = vmatmul.mubr.bf16.vlgmr.msra.gmra.mxu0 %v1694_v47  ;;  %v1500_v54 = vadd.f32 %v1499_v32, %v290_v51 }
 0x14f   :  { %v1501_v3 = vpop.f32.mrf.mxu1 }
 0x151   :  { %v1502_v48 = vpop.f32.mrf.mxu1 }
 0x182   :  { %v1538_v49 = vpop.f32.mrf.mxu0 }
 0x183   :  { %v1539_v55 = vadd.f32 %v1538_v49, %v1498_v53 }
 0x184   :  { %v1540_v19 = vpop.f32.mrf.mxu0 }
 0x185   :  { %v1541_v58 = vadd.f32 %v1540_v19, %v1500_v54 }
 0x186   :  { %v1542_v52 = vpop.f32.mrf.mxu0 }
 0x188   :  { %v1543_v26 = vpop.f32.mrf.mxu0 }
 0x18a   :  { %v1620_v57 = vpop.f32.mrf.mxu0 }
 0x18b   :  { %v1579_v56 = vpop.f32.mrf.mxu1 }
 0x18c   :  { %v1580_v59 = vadd.f32 %v1579_v56, %v1539_v55  ;;  %v1622_v61 = vpop.f32.mrf.mxu0 }
 0x18d   :  { %v1581_v60 = vpop.f32.mrf.mxu1 }
 0x18e   :  { %v1621_v62 = vadd.f32 %v1620_v57, %v1580_v59  ;;  %v1582_v63 = vadd.f32 %v1581_v60, %v1541_v58  ;;  %v1624_v1 = vpop.f32.mrf.mxu0 }
 0x18f   :  { %v1583_v0 = vpop.f32.mrf.mxu1 }
 0x190   :  { %v1623_v43 = vadd.f32 %v1622_v61, %v1582_v63  ;;  %v1629_v2 = vmax.f32 %v1621_v62, 0.0  ;;  %v1625_v5 = vpop.f32.mrf.mxu0 }
 0x191   :  { %v1584_v4 = vpop.f32.mrf.mxu1 }
 0x192   :  { %v1630_v6 = vmax.f32 %v1623_v43, 0.0  ;;  %v1696_v8 = vpack.c.bf16 %v1629_v2, %v1629_v2 }
 0x194   :  { %v1697_v7 = vpack.c.bf16 %v1630_v6, %v1630_v6 }
 0x196   :  { %2245 = vmatprep.mubr.msk.bf16.mxu1 %vm1894_vm2, %v1697_v7 }
 0x197   :  { %1975 = vmatmul.mubr.bf16.vlgmr.msra.gmra.mxu1 %v1696_v8 }
 0x20e   :  { %v2262_v9 = vpop.f32.mrf.mxu0 }
 0x210   :  { %v2263_v10 = vpop.f32.mrf.mxu0 }
 0x211   :  { %v2264_v11 = vadd.f32 %v2263_v10, %v2262_v9 }
 0x212   :  { %v2265_v12 = vpop.f32.mrf.mxu0 }
 0x213   :  { %v1937_v18 = vadd.f32 %v2264_v11, %v2212_v15 }
 0x214   :  { %v2266_v14 = vpop.f32.mrf.mxu0 }
 0x257   :  { %v2284_v16 = vpop.f32.mrf.mxu1 }
 0x259   :  { %v2285_v17 = vpop.f32.mrf.mxu1 }
 0x25a   :  { %v2286_v21 = vadd.f32 %v2285_v17, %v2284_v16 }
 0x25b   :  { %v2287_v22 = vpop.f32.mrf.mxu1 }
 0x25c   :  { %v1977_v23 = vadd.f32 %v2286_v21, %v1937_v18 }
 0x25d   :  { %v2288_v24 = vpop.f32.mrf.mxu1 }
 0x25e   :  { %v1983_v25 = vsel %vm1982_vm3, %v1977_v23, -inf }
 0x25f   :  { %1984 = vmax.xlane.f32.xlu0 %v1983_v25 }
 0x2e8   :  { %v1985_v27 = vpop.xlane.xlu0 %1984 }
 0x2e9   :  { %v1986_v28 = vsub.f32 %v1977_v23, %v1985_v27 }
 0x2eb   :  { %v1987_v29 = vmul.f32 1.442695, %v1986_v28 }
 0x2ed   :  { %2628 = vpow2.f32 %v1987_v29 }
 0x2fa   :  { %v2629_v30 = vpop.eup %2628 }
 0x2fb   :  { %v1989_v31 = vsel %vm1982_vm3, %v2629_v30, 0.0 }
 0x2fc   :  { %1990 = vadd.xlane.f32.xlu0 %v1989_v31 }
 0x385   :  { %v1991_v35 = vpop.xlane.xlu0 %1990 }
 0x386   :  { %2630 = vlog2.f32 %v1991_v35 }
 0x393   :  { %v2631_v36 = vpop.eup %2630 }
 0x394   :  { %v1993_v37 = vmul.f32 0.6931472, %v2631_v36 }
 0x396   :  { %v1994_v13 = vsub.f32 %v1986_v28, %v1993_v37 }
 0x398   :  { %1995 = vst.msk [vmem:[#allocation2] sm:$0x3] %vm1982_vm3, %v1994_v13 }
 0x399   :  { %2643 = shalt.err (!%p2640_p4)
}
 0x39a   :  { %2005 = dma.vmem_to_hbm [thread:$0]  %s2003_s22, 32, %s3457_s5, [#allocation3]  }
 0x39b   :  { %2652 = dma.done.wait [#allocation3], 32  }
 0x39c   :  { %2653 = vsyncadd [#allocation3], 4294967264 }
 0x39d   :  { %2009 = vsyncpa [#allocation3], 1 }

// kernel: net_forward.2
= control target key start
LH: loop header
LB: loop body
LE: loop exit
PB: predicated region body
PF: predicated region fallthrough
CT: control target
= control target key end

     0   :  { %s6804_s30 = smov 0   ;;  %s9539_s0 = inlined_call_operand.vmem [shape: f32[2,28,28], index: 0, kind: input, shape index: {}]   ;;  %s9540_s1 = inlined_call_operand.vmem [shape: bf16[5,28,480], index: 1, kind: input, shape index: {}]   ;;  %s9541_s2 = inlined_call_operand.vmem [shape: f32[1,480], index: 2, kind: input, shape index: {}]   ;;  %s9542_s3 = inlined_call_operand.vmem [shape: f32[2,12,24], index: 3, kind: input, shape index: {}]   ;;  %s9543_s4 = inlined_call_operand.vmem [shape: f32[2,480,240], index: 4, kind: input, shape index: {}]   ;;  %s9544_s5 = inlined_call_operand.vmem [shape: bf16[5,240,400], index: 5, kind: input, shape index: {}]   ;;  %s9545_s6 = inlined_call_operand.vmem [shape: f32[1,400], index: 6, kind: input, shape index: {}]   ;;  %s9546_s7 = inlined_call_operand.vmem [shape: f32[2,4,8], index: 7, kind: input, shape index: {}]   ;;  %s9547_s8 = inlined_call_operand.vmem [shape: f32[2,400,200], index: 8, kind: input, shape index: {}]   ;;  %s9548_s9 = inlined_call_operand.vmem [shape: f32[2,4,200], index: 9, kind: output, shape index: {}]  }
   0x1 LB: > { %s5318_s10 = sadd.s32 4294967295, %s6750_s30   ;;  %p5322_p0 = scmp.ge.s32.totalorder %s6750_s30, 1  ;;  %s6750_s30 = sphi %s6804_s30, %s19_s30  }
   0x2   : > { %p287_p1 = scmp.lt.s32.totalorder %s6750_s30, 3 }
   0x4   : > { %p288_p2 = pnand %p5322_p0, %p287_p1 }
   0x6   : > { %291 = sbr.rel (%p288_p2) target bundleno = 1701 (0x6a5), region = 56 }
   0xb   : > { %v6234_v0 = vld [vmem:[%s9540_s1 + $0x64] ss:$16 sps:$4 sm:$0x3f]   ;;  %vm417_vm0 = vcmask 1045504   ;;  %v6752_v3 = vmov 0   ;;  %p323_p3 = scmp.lt.s32.totalorder %s5318_s10, 1 }
   0xc   : > { %5343 = vmatprep.subr.msk.bf16.mxu0 %vm417_vm0, %v6234_v0  ;;  %v6236_v1 = vld [vmem:[%s9540_s1 + $0x6c] ss:$16 sps:$4 sm:$0x3f]   ;;  %v6238_v2 = vld [vmem:[%s9540_s1 + $0x60] ss:$16 sps:$4 sm:$0x3f]   ;;  %462 = vmatprep.mubr.bf16.mxu0 %v6752_v3 }
   0xd   : > { %v6239_v4 = vld [vmem:[%s9540_s1 + $0x68] ss:$16 sps:$4 sm:$0x3f]   ;;  %v6240_v5 = vld [vmem:[%s9540_s1 + $0x44] ss:$16 sps:$4 sm:$0xff]   ;;  %513 = vmatprep.mubr.bf16.mxu1 %v6752_v3  ;;  %5346 = vmatprep.subr.msk.bf16.mxu1 %vm417_vm0, %v6236_v1  ;;  %v419_v6 = vsel %vm417_vm0, %v6238_v2, 0 }
   0xe   : > { %v6242_v7 = vld [vmem:[%s9540_s1 + $0x4c] ss:$16 sps:$4 sm:$0xff]   ;;  %443 = vmatpush1.bf16.msra.mxu0 %v419_v6  ;;  %v425_v8 = vsel %vm417_vm0, %v6239_v4, 0  ;;  %v6244_v9 = vld [vmem:[%s9540_s1 + $0x40] ss:$16 sps:$4 sm:$0xff]   ;;  %s9562_s10 = smov (!%p323_p3, %s5318_s10), 1 }
   0xf   : > { %494 = vmatpush1.bf16.msra.mxu1 %v425_v8  ;;  %444 = vmatprep.subr.bf16.mxu0 %v6240_v5  ;;  %v6245_v10 = vld [vmem:[%s9540_s1 + $0x48] ss:$16 sps:$4 sm:$0xff]   ;;  %v6246_v11 = vld [vmem:[%s9540_s1 + $0x24] ss:$16 sps:$4 sm:$0x3f]   ;;  %s6222_s29 = sshll.u32 %s9562_s10, 5 }
  0x10   : > { %495 = vmatprep.subr.bf16.mxu1 %v6242_v7  ;;  %v6248_v12 = vld [vmem:[%s9540_s1 + $0x2c] ss:$16 sps:$4 sm:$0x3f]   ;;  %s327_s15 = scalar_lea.vmem %s9539_s0, %s6222_s29  ;;  %v6250_v21 = vld [vmem:[%s9540_s1 + $0x20] ss:$16 sps:$4 sm:$0x3f]  }
  0x11   : > { %v334_v13 = vld [vmem:[%s327_s15] sm:$0xff]  ;;  %v335_v14 = vld [vmem:[%s327_s15 + $0x8] sm:$0xff]  ;;  %v6854_v15 = vld [vmem:[%s327_s15 + $0x10] sm:$0xff]  ;;  %vm358_vm1 = vsmask.f32 7424  ;;  %vm410_vm2 = vcmask 228352  }
  0x12   : > { %445 = vmatpush1.bf16.msra.mxu0 %v6244_v9  ;;  %v337_v16 = vld [vmem:[%s327_s15 + $0x18] sm:$0xf]  ;;  %v6857_v17 = vpack.c.bf16 %v335_v14, %v334_v13  ;;  %v6254_v27 = vld [vmem:[%s9540_s1 + $0x4] ss:$16 sps:$4 sm:$0xff]   ;;  %v574_v29 = vsel %vm417_vm0, %v6250_v21, 0  ;;  %v347_v51 = vpack.c.bf16 %v6854_v15, %v6854_v15  ;;  %vm698_vm3 = vcmask 1046528  }
  0x13   : > { %496 = vmatpush1.bf16.msra.mxu1 %v6245_v10  ;;  %5357 = vmatprep.subr.msk.bf16.mxu0 %vm417_vm0, %v6246_v11  ;;  %v6861_v18 = vpack.c.bf16 %v337_v16, %v6854_v15  ;;  %v6251_v24 = vld [vmem:[%s9540_s1 + $0x28] ss:$16 sps:$4 sm:$0x3f]   ;;  %v6257_v31 = vld [vmem:[%s9540_s1 + $0xc] ss:$16 sps:$4 sm:$0xff]   ;;  %vm1272_vm5 = vcmask 195584  }
  0x14   : > { %5360 = vmatprep.subr.msk.bf16.mxu1 %vm417_vm0, %v6248_v12  ;;  %v360_v19 = vshrl.u32 %v6857_v17, 16  ;;  %v362_v20 = vshll.u32 %v6857_v17, 16  ;;  %v580_v30 = vsel %vm417_vm0, %v6251_v24, 0  ;;  %v6252_v33 = vld [vmem:[%s9540_s1] ss:$16 sps:$4 sm:$0xff]   ;;  %v1065_v38 = vrot.slane %v6857_v17, 2 }
  0x15   : > { %v367_v22 = vshll.u32 %v6861_v18, 16  ;;  %v371_v32 = vshrl.u32 %v6861_v18, 16  ;;  %v6255_v34 = vld [vmem:[%s9540_s1 + $0x8] ss:$16 sps:$4 sm:$0xff]   ;;  %v6907_v39 = vrot.slane %v6861_v18, 2  ;;  %v699_v52 = vrot.slane %v6857_v17, 1 }
  0x16   : > { %v364_v23 = vrot.slane %v362_v20, 1  ;;  %v6258_v35 = vld [vmem:[%s9540_s1 + $0xa4] ss:$16 sps:$4 sm:$0x3f]   ;;  %v6269_v44 = vld [vmem:[%s9540_s1 + $0x8c] ss:$16 sps:$4 sm:$0xff]  }
  0x17   : > { %v369_v25 = vrot.slane %v367_v22, 1  ;;  %v6260_v36 = vld [vmem:[%s9540_s1 + $0xac] ss:$16 sps:$4 sm:$0x3f]   ;;  %v6911_v40 = vsel %vm417_vm0, %v1065_v38, %v6907_v39  ;;  %v6266_v43 = vld [vmem:[%s9540_s1 + $0x84] ss:$16 sps:$4 sm:$0xff]  }
  0x18   : > { %v365_v26 = vor.u32 %v364_v23, %v360_v19  ;;  %v6262_v41 = vld [vmem:[%s9540_s1 + $0xa0] ss:$16 sps:$4 sm:$0x3f]   ;;  %v6263_v42 = vld [vmem:[%s9540_s1 + $0xa8] ss:$16 sps:$4 sm:$0x3f]  }
  0x19   : > { %v373_v37 = vor.u32 %v371_v32, %v369_v25  ;;  %v745_v45 = vsel %vm417_vm0, %v6262_v41, 0  ;;  %v751_v46 = vsel %vm417_vm0, %v6263_v42, 0  ;;  %v6264_v47 = vld [vmem:[%s9540_s1 + $0x80] ss:$16 sps:$4 sm:$0xff]   ;;  %v6267_v48 = vld [vmem:[%s9540_s1 + $0x88] ss:$16 sps:$4 sm:$0xff]  }
  0x1a   : > { %v370_v28 = vsel %vm358_vm1, %v365_v26, %v369_v25  ;;  %v6270_v49 = vld [vmem:[%s9540_s1 + $0xe4] ss:$16 sps:$4 sm:$0x3f]   ;;  %v6272_v50 = vld [vmem:[%s9540_s1 + $0xec] ss:$16 sps:$4 sm:$0x3f]  }
  0x1b   : > { %5344 = vmatmul.mubr.msk.bf16.vlgmr.msra.gmra.mxu0 %vm410_vm2, %v370_v28  ;;  %5347 = vmatmul.mubr.msk.bf16.vlgmr.msra.gmra.mxu1 %vm410_vm2, %v370_v28  ;;  %v700_v53 = vrot.slane %v6861_v18, 1  ;;  %v6274_v54 = vld [vmem:[%s9540_s1 + $0xe0] ss:$16 sps:$4 sm:$0x3f]   ;;  %v6278_v57 = vld [vmem:[%s9540_s1 + $0xc4] ss:$16 sps:$4 sm:$0xff]  }
  0x1c   : > { %472 = vmatprep.mubr.bf16.mxu0 %v6752_v3  ;;  %523 = vmatprep.mubr.bf16.mxu1 %v6752_v3  ;;  %v6275_v55 = vld [vmem:[%s9540_s1 + $0xe8] ss:$16 sps:$4 sm:$0x3f]   ;;  %v6281_v58 = vld [vmem:[%s9540_s1 + $0xcc] ss:$16 sps:$4 sm:$0xff]   ;;  %v930_v59 = vsel %vm417_vm0, %v6274_v54, 0 }
  0x1d   : > { %598 = vmatpush1.bf16.msra.mxu0 %v574_v29  ;;  %649 = vmatpush1.bf16.msra.mxu1 %v580_v30  ;;  %v701_v56 = vsel %vm698_vm3, %v699_v52, %v700_v53  ;;  %v936_v60 = vsel %vm417_vm0, %v6275_v55, 0  ;;  %v6276_v61 = vld [vmem:[%s9540_s1 + $0xc0] ss:$16 sps:$4 sm:$0xff]   ;;  %v6279_v62 = vld [vmem:[%s9540_s1 + $0xc8] ss:$16 sps:$4 sm:$0xff]   ;;  %v880_v1 = vrot.slane %v360_v19, 1 }
  0x1e   : > { %599 = vmatprep.subr.bf16.mxu0 %v6254_v27  ;;  %650 = vmatprep.subr.bf16.mxu1 %v6257_v31  ;;  %v6282_v63 = vld [vmem:[%s9540_s1 + $0x124] ss:$16 sps:$4 sm:$0x3f]   ;;  %v6284_v0 = vld [vmem:[%s9540_s1 + $0x12c] ss:$16 sps:$4 sm:$0x3f]  }
  0x1f   : > { %v881_v2 = vrot.slane %v362_v20, 2  ;;  %v884_v4 = vrot.slane %v367_v22, 2  ;;  %v883_v5 = vrot.slane %v371_v32, 1  ;;  %v6286_v8 = vld [vmem:[%s9540_s1 + $0x120] ss:$16 sps:$4 sm:$0x3f]  }
  0x20   : > { %v6287_v9 = vld [vmem:[%s9540_s1 + $0x128] ss:$16 sps:$4 sm:$0x3f]   ;;  %vm879_vm4 = vsmask.f32 6400  ;;  %v1111_v13 = vsel %vm417_vm0, %v6286_v8, 0  ;;  %v1238_v8 = vlaneseq }
  0x21   : > { %600 = vmatpush1.bf16.msra.mxu0 %v6252_v33  ;;  %651 = vmatpush1.bf16.msra.mxu1 %v6255_v34  ;;  %v882_v6 = vor.u32 %v881_v2, %v880_v1  ;;  %v885_v7 = vor.u32 %v884_v4, %v883_v5  ;;  %v6290_v11 = vld [vmem:[%s9540_s1 + $0x104] ss:$16 sps:$4 sm:$0xff]   ;;  %v6293_v12 = vld [vmem:[%s9540_s1 + $0x10c] ss:$16 sps:$4 sm:$0xff]   ;;  %v1117_v14 = vsel %vm417_vm0, %v6287_v9, 0  ;;  %vm1724_vm6 = vcmask 785408  }
  0x22   : > { %5379 = vmatprep.subr.msk.bf16.mxu0 %vm417_vm0, %v6258_v35  ;;  %5382 = vmatprep.subr.msk.bf16.mxu1 %vm417_vm0, %v6260_v36  ;;  %v6288_v15 = vld [vmem:[%s9540_s1 + $0x100] ss:$16 sps:$4 sm:$0xff]   ;;  %v6291_v16 = vld [vmem:[%s9540_s1 + $0x108] ss:$16 sps:$4 sm:$0xff]   ;;  %vm2604_vm7 = vcmask 916480   ;;  %vm4467_vm8 = vcmask 64512  }
  0x23   : > { %5345 = vmatmul.mubr.msk.bf16.gmra.mxu0 %vm410_vm2, %v373_v37  ;;  %5348 = vmatmul.mubr.msk.bf16.gmra.mxu1 %vm410_vm2, %v373_v37  ;;  %v886_v10 = vsel %vm879_vm4, %v882_v6, %v885_v7  ;;  %vm4864_vm9 = vcmask 130048   ;;  %vm5259_vm10 = vcmask 1043456   ;;  %s6223_s14 = sshll.u32 %s9562_s10, 3  ;;  %vm5260_vm11 = vcmask 588804  }
  0x24   : > { %617 = vmatprep.mubr.bf16.mxu0 %v6752_v3  ;;  %668 = vmatprep.mubr.bf16.mxu1 %v6752_v3  ;;  %s332_s17 = scalar_lea.vmem %s9548_s9, %s6223_s14  ;;  %vm5261_vm12 = vmor %vm5260_vm11, %vm5259_vm10 }
  0x2b   : > { %5358 = vmatmul.mubr.msk.bf16.vlgmr.msra.gmra.mxu0 %vm410_vm2, %v6857_v17  ;;  %5361 = vmatmul.mubr.msk.bf16.vlgmr.msra.gmra.mxu1 %vm410_vm2, %v6857_v17  ;;  %v9550_v17 = vmov 0.0  }
  0x2c   : > { %627 = vmatprep.mubr.bf16.mxu0 %v6752_v3  ;;  %678 = vmatprep.mubr.bf16.mxu1 %v6752_v3 }
  0x2d   : > { %769 = vmatpush1.bf16.msra.mxu0 %v745_v45  ;;  %820 = vmatpush1.bf16.msra.mxu1 %v751_v46 }
  0x2e   : > { %770 = vmatprep.subr.bf16.mxu0 %v6266_v43  ;;  %821 = vmatprep.subr.bf16.mxu1 %v6269_v44 }
  0x31   : > { %771 = vmatpush1.bf16.msra.mxu0 %v6264_v47  ;;  %822 = vmatpush1.bf16.msra.mxu1 %v6267_v48 }
  0x32   : > { %5401 = vmatprep.subr.msk.bf16.mxu0 %vm417_vm0, %v6270_v49  ;;  %5404 = vmatprep.subr.msk.bf16.mxu1 %vm417_vm0, %v6272_v50 }
  0x33   : > { %5359 = vmatmul.mubr.msk.bf16.gmra.mxu0 %vm410_vm2, %v347_v51  ;;  %5362 = vmatmul.mubr.msk.bf16.gmra.mxu1 %vm410_vm2, %v347_v51 }
  0x34   : > { %788 = vmatprep.mubr.bf16.mxu0 %v6752_v3  ;;  %839 = vmatprep.mubr.bf16.mxu1 %v6752_v3 }
  0x3b   : > { %5380 = vmatmul.mubr.msk.bf16.vlgmr.msra.gmra.mxu0 %vm410_vm2, %v701_v56  ;;  %5383 = vmatmul.mubr.msk.bf16.vlgmr.msra.gmra.mxu1 %vm410_vm2, %v701_v56 }
  0x3c   : > { %798 = vmatprep.mubr.bf16.mxu0 %v6752_v3  ;;  %849 = vmatprep.mubr.bf16.mxu1 %v6752_v3 }
  0x3d   : > { %954 = vmatpush1.bf16.msra.mxu0 %v930_v59  ;;  %1005 = vmatpush1.bf16.msra.mxu1 %v936_v60 }
  0x3e   : > { %955 = vmatprep.subr.bf16.mxu0 %v6278_v57  ;;  %1006 = vmatprep.subr.bf16.mxu1 %v6281_v58 }
  0x41   : > { %956 = vmatpush1.bf16.msra.mxu0 %v6276_v61  ;;  %1007 = vmatpush1.bf16.msra.mxu1 %v6279_v62 }
  0x42   : > { %5423 = vmatprep.subr.msk.bf16.mxu0 %vm417_vm0, %v6282_v63  ;;  %5426 = vmatprep.subr.msk.bf16.mxu1 %vm417_vm0, %v6284_v0 }
  0x43   : > { %5381 = vmatmul.mubr.msk.bf16.gmra.mxu0 %vm410_vm2, %v700_v53  ;;  %5384 = vmatmul.mubr.msk.bf16.gmra.mxu1 %vm410_vm2, %v700_v53 }
  0x44   : > { %973 = vmatprep.mubr.bf16.mxu0 %v6752_v3  ;;  %1024 = vmatprep.mubr.bf16.mxu1 %v6752_v3 }
  0x4b   : > { %5402 = vmatmul.mubr.msk.bf16.vlgmr.msra.gmra.mxu0 %vm410_vm2, %v886_v10  ;;  %5405 = vmatmul.mubr.msk.bf16.vlgmr.msra.gmra.mxu1 %vm410_vm2, %v886_v10 }
  0x4c   : > { %983 = vmatprep.mubr.bf16.mxu0 %v6752_v3  ;;  %1034 = vmatprep.mubr.bf16.mxu1 %v6752_v3 }
  0x4d   : > { %1135 = vmatpush1.bf16.msra.mxu0 %v1111_v13  ;;  %1186 = vmatpush1.bf16.msra.mxu1 %v1117_v14  ;;  %v7101_v13 = vshrl.u32 %v1238_v8, 7 }
  0x4e   : > { %1136 = vmatprep.subr.bf16.mxu0 %v6290_v11  ;;  %1187 = vmatprep.subr.bf16.mxu1 %v6293_v12 }
  0x51   : > { %1137 = vmatpush1.bf16.msra.mxu0 %v6288_v15  ;;  %1188 = vmatpush1.bf16.msra.mxu1 %v6291_v16 }
  0x53   : > { %5403 = vmatmul.mubr.msk.bf16.gmra.mxu0 %vm410_vm2, %v885_v7  ;;  %5406 = vmatmul.mubr.msk.bf16.gmra.mxu1 %vm410_vm2, %v885_v7 }
  0x54   : > { %1154 = vmatprep.mubr.bf16.mxu0 %v6752_v3  ;;  %1205 = vmatprep.mubr.bf16.mxu1 %v6752_v3 }
  0x5b   : > { %5424 = vmatmul.mubr.msk.bf16.vlgmr.msra.gmra.mxu0 %vm410_vm2, %v6911_v40  ;;  %5427 = vmatmul.mubr.msk.bf16.vlgmr.msra.gmra.mxu1 %vm410_vm2, %v6911_v40 }
  0x5c   : > { %1164 = vmatprep.mubr.bf16.mxu0 %v6752_v3  ;;  %1215 = vmatprep.mubr.bf16.mxu1 %v6752_v3 }
  0x63   : > { %5425 = vmatmul.mubr.msk.bf16.gmra.mxu0 %vm410_vm2, %v6907_v39  ;;  %5428 = vmatmul.mubr.msk.bf16.gmra.mxu1 %vm410_vm2, %v6907_v39 }
  0x64   : > { %1343 = vmatprep.mubr.f32.mxu0 %v9550_v17  ;;  %1420 = vmatprep.mubr.f32.mxu1 %v9550_v17 }
  0xdb   : > { %v7045_v18 = vpop.f32.mrf.mxu0  ;;  %v7047_v19 = vpop.f32.mrf.mxu1 }
  0xdd   : > { %v7049_v20 = vpop.f32.mrf.mxu0  ;;  %v7051_v21 = vpop.f32.mrf.mxu1 }
  0xdf   : > { %v7053_v3 = vpop.f32.mrf.mxu0  ;;  %v7055_v22 = vpop.f32.mrf.mxu1 }
  0xe1   : > { %v7057_v23 = vpop.f32.mrf.mxu0  ;;  %v7059_v24 = vpop.f32.mrf.mxu1 }
  0xe3   : > { %v7061_v25 = vpop.f32.mrf.mxu0  ;;  %v7063_v26 = vpop.f32.mrf.mxu1 }
  0xe5   : > { %v7065_v27 = vpop.f32.mrf.mxu0  ;;  %v7067_v28 = vpop.f32.mrf.mxu1 }
  0xe7   : > { %v478_v29 = vpop.f32.mrf.mxu0  ;;  %v529_v30 = vpop.f32.mrf.mxu1 }
  0xe8   : > { %v9549_v30 = vsub.s32 0, %v7101_v13 }
  0xe9   : > { %v479_v31 = vpop.f32.mrf.mxu0  ;;  %v530_v32 = vpop.f32.mrf.mxu1 }
  0xea   : > { %v9553_v31 = vsub.s32 2, %v7101_v13  ;;  %v9554_v32 = vsub.s32 1, %v7101_v13 }
  0xeb   : > { %v619_v33 = vpop.f32.mrf.mxu0  ;;  %v670_v34 = vpop.f32.mrf.mxu1 }
  0xed   : > { %v621_v35 = vpop.f32.mrf.mxu0  ;;  %v672_v36 = vpop.f32.mrf.mxu1 }
  0xef   : > { %v7069_v37 = vpop.f32.mrf.mxu0  ;;  %v7071_v38 = vpop.f32.mrf.mxu1 }
  0xf1   : > { %v7073_v39 = vpop.f32.mrf.mxu0  ;;  %v7075_v40 = vpop.f32.mrf.mxu1 }
  0xf3   : > { %v7077_v41 = vpop.f32.mrf.mxu0  ;;  %v7079_v42 = vpop.f32.mrf.mxu1 }
  0xf5   : > { %v7081_v43 = vpop.f32.mrf.mxu0  ;;  %v7083_v44 = vpop.f32.mrf.mxu1 }
  0xf7   : > { %v633_v45 = vpop.f32.mrf.mxu0  ;;  %v684_v46 = vpop.f32.mrf.mxu1 }
  0xf8   : > { %v1252_v45 = vsub.s32 3, %v7101_v13 }
  0xf9   : > { %v634_v47 = vpop.f32.mrf.mxu0  ;;  %v685_v48 = vpop.f32.mrf.mxu1 }
  0xfa   : > { %v1236_v48 = vld [vmem:[%s9541_s2] sm:$0xf] }
  0xfb   : > { %v790_v49 = vpop.f32.mrf.mxu0  ;;  %v841_v50 = vpop.f32.mrf.mxu1  ;;  %v7124_v8 = vrot.slane %v1236_v48, %v9554_v32  ;;  %v675_v32 = vadd.f32 %v7071_v38, %v7055_v22 }
  0xfd   : > { %v792_v51 = vpop.f32.mrf.mxu0  ;;  %v843_v52 = vpop.f32.mrf.mxu1 }
  0xff   : > { %v794_v53 = vpop.f32.mrf.mxu0  ;;  %v845_v54 = vpop.f32.mrf.mxu1 }
 0x101   : > { %v7085_v55 = vpop.f32.mrf.mxu0  ;;  %v7087_v56 = vpop.f32.mrf.mxu1 }
 0x103   : > { %v800_v57 = vpop.f32.mrf.mxu0  ;;  %v851_v58 = vpop.f32.mrf.mxu1 }
 0x105   : > { %v7089_v59 = vpop.f32.mrf.mxu0  ;;  %v7091_v60 = vpop.f32.mrf.mxu1 }
 0x107   : > { %v804_v61 = vpop.f32.mrf.mxu0  ;;  %v855_v62 = vpop.f32.mrf.mxu1 }
 0x109   : > { %v805_v63 = vpop.f32.mrf.mxu0  ;;  %v856_v0 = vpop.f32.mrf.mxu1 }
 0x10a   : > { %v7116_v63 = vrot.slane %v1236_v48, %v9549_v30  ;;  %v7120_v0 = vrot.slane %v1236_v48, %v9553_v31  ;;  %v673_v30 = vadd.f32 %v672_v36, %v7051_v21  ;;  %v624_v31 = vadd.f32 %v7069_v37, %v7053_v3 }
 0x10b   : > { %v7093_v1 = vpop.f32.mrf.mxu0  ;;  %v7095_v2 = vpop.f32.mrf.mxu1  ;;  %v632_v21 = vadd.f32 %v7081_v43, %v7065_v27  ;;  %v683_v3 = vadd.f32 %v7083_v44, %v7067_v28 }
 0x10c   : > { %9555 = vst [vmem:[#allocation2_spill] sm:$0xff] %v7116_v63  ;;  %v861_v36 = vadd.f32 %v843_v52, %v673_v30  ;;  %v862_v37 = vadd.f32 %v794_v53, %v624_v31 }
 0x10d   : > { %v977_v4 = vpop.f32.mrf.mxu0  ;;  %v1028_v5 = vpop.f32.mrf.mxu1  ;;  %v867_v27 = vadd.f32 %v7089_v59, %v632_v21  ;;  %v869_v28 = vadd.f32 %v7091_v60, %v683_v3 }
 0x10e   : > { %v1046_v43 = vadd.f32 %v1028_v5, %v861_v36  ;;  %v1634_v36 = vld [vmem:[%s9543_s4 + $0xf0] sm:$0xff] }
 0x10f   : > { %v7097_v6 = vpop.f32.mrf.mxu0  ;;  %v7099_v7 = vpop.f32.mrf.mxu1 }
 0x111   : > { %v981_v9 = vpop.f32.mrf.mxu0  ;;  %v1032_v10 = vpop.f32.mrf.mxu1 }
 0x113   : > { %v985_v11 = vpop.f32.mrf.mxu0  ;;  %v1036_v12 = vpop.f32.mrf.mxu1 }
 0x115   : > { %v987_v14 = vpop.f32.mrf.mxu0  ;;  %v1038_v15 = vpop.f32.mrf.mxu1 }
 0x117   : > { %v989_v16 = vpop.f32.mrf.mxu0  ;;  %v1040_v29 = vpop.f32.mrf.mxu1 }
 0x118   : > { %v7128_v16 = vrot.slane %v1236_v48, %v1252_v45  ;;  %v620_v29 = vadd.f32 %v619_v33, %v7045_v18  ;;  %v626_v48 = vadd.f32 %v7073_v39, %v7057_v23  ;;  %v677_v18 = vadd.f32 %v7075_v40, %v7059_v24 }
 0x119   : > { %v990_v46 = vpop.f32.mrf.mxu0  ;;  %v1041_v47 = vpop.f32.mrf.mxu1  ;;  %v864_v24 = vadd.f32 %v845_v54, %v675_v32  ;;  %v1052_v54 = vadd.f32 %v987_v14, %v867_v27  ;;  %v1630_v27 = vld [vmem:[%s9543_s4 + $0xd0] sm:$0xff] }
 0x11a   : > { %v671_v46 = vadd.f32 %v670_v34, %v7047_v19  ;;  %v622_v47 = vadd.f32 %v621_v35, %v7049_v20  ;;  %v630_v19 = vadd.f32 %v7077_v41, %v7061_v25  ;;  %v681_v20 = vadd.f32 %v7079_v42, %v7063_v26 }
 0x11b   : > { %v7110_v61 = vpop.f32.mrf.mxu0  ;;  %v7112_v62 = vpop.f32.mrf.mxu1  ;;  %v858_v34 = vadd.f32 %v790_v49, %v620_v29  ;;  %v863_v26 = vadd.f32 %v7085_v55, %v626_v48  ;;  %v865_v41 = vadd.f32 %v7087_v56, %v677_v18  ;;  %v1049_v55 = vadd.f32 %v7099_v7, %v864_v24  ;;  %v9556_v18 = vld [vmem:[#allocation2_spill] sm:$0xff]  ;;  %v5434_v24 = vld [vmem:[%s9542_s3 + $0x18] sm:$0xf] }
 0x11c   : > { %v860_v35 = vadd.f32 %v841_v50, %v671_v46  ;;  %v859_v23 = vadd.f32 %v792_v51, %v622_v47  ;;  %v866_v38 = vadd.f32 %v800_v57, %v630_v19  ;;  %v868_v39 = vadd.f32 %v851_v58, %v681_v20 }
 0x11d   : > { %v1158_v17 = vpop.f32.mrf.mxu0  ;;  %v1209_v63 = vpop.f32.mrf.mxu1  ;;  %v1048_v52 = vadd.f32 %v981_v9, %v863_v26  ;;  %v1050_v53 = vadd.f32 %v1032_v10, %v865_v41  ;;  %v1054_v57 = vadd.f32 %v1038_v15, %v869_v28  ;;  %v1047_v58 = vadd.f32 %v7097_v6, %v862_v37  ;;  %v1698_v37 = vld [vmem:[%s9543_s4 + $0x2f0] sm:$0xff]  ;;  %v1631_v26 = vld [vmem:[%s9543_s4 + $0xd8] sm:$0xff] }
 0x11e   : > { %v1044_v42 = vadd.f32 %v977_v4, %v859_v23  ;;  %v1051_v44 = vadd.f32 %v985_v11, %v866_v38  ;;  %v1053_v49 = vadd.f32 %v1036_v12, %v868_v39  ;;  %v1043_v11 = vadd.f32 %v7093_v1, %v858_v34  ;;  %v1270_v34 = vld [vmem:[%s9542_s3] sm:$0xff]  ;;  %v1699_v23 = vld [vmem:[%s9543_s4 + $0x2f8] sm:$0xff]  ;;  %v1633_v38 = vld [vmem:[%s9543_s4 + $0xe8] sm:$0xff] }
 0x11f   : > { %v1160_v33 = vpop.f32.mrf.mxu0  ;;  %v1211_v22 = vpop.f32.mrf.mxu1  ;;  %v1045_v12 = vadd.f32 %v7095_v2, %v860_v35  ;;  %v1227_v6 = vadd.f32 %v1209_v63, %v1046_v43  ;;  %v1635_v35 = vld [vmem:[%s9543_s4 + $0xf8] sm:$0xff]  ;;  %v1697_v39 = vld [vmem:[%s9543_s4 + $0x2e8] sm:$0xff]  ;;  %v1694_v28 = vld [vmem:[%s9543_s4 + $0x2d0] sm:$0xff] }
 0x120   : > { %v1228_v9 = vadd.f32 %v1160_v33, %v1047_v58  ;;  %v1230_v10 = vadd.f32 %v1211_v22, %v1049_v55  ;;  %v1225_v29 = vadd.f32 %v1158_v17, %v1044_v42  ;;  %v1224_v47 = vadd.f32 %v7110_v61, %v1043_v11  ;;  %v1695_v41 = vld [vmem:[%s9543_s4 + $0x2d8] sm:$0xff]  ;;  %v1629_v42 = vld [vmem:[%s9543_s4 + $0xc8] sm:$0xff]  ;;  %v1624_v58 = vld [vmem:[%s9543_s4 + $0xa0] sm:$0xff] }
 0x121   : > { %v1162_v25 = vpop.f32.mrf.mxu0  ;;  %v1213_v40 = vpop.f32.mrf.mxu1  ;;  %v1226_v48 = vadd.f32 %v7112_v62, %v1045_v12  ;;  %v1261_v62 = vadd.f32 %v7128_v16, %v1227_v6  ;;  %v1693_v43 = vld [vmem:[%s9543_s4 + $0x2c8] sm:$0xff]  ;;  %v1688_v55 = vld [vmem:[%s9543_s4 + $0x2a0] sm:$0xff]  ;;  %v1619_v11 = vld [vmem:[%s9543_s4 + $0x78] sm:$0xff] }
 0x122   : > { %v1229_v32 = vadd.f32 %v1162_v25, %v1048_v52  ;;  %v1231_v60 = vadd.f32 %v1213_v40, %v1050_v53  ;;  %v1262_v17 = vadd.f32 %v9556_v18, %v1228_v9  ;;  %v1264_v63 = vadd.f32 %v7120_v0, %v1230_v10  ;;  %v1632_v25 = vld [vmem:[%s9543_s4 + $0xe0] sm:$0xff]  ;;  %v1626_v52 = vld [vmem:[%s9543_s4 + $0xb0] sm:$0xff]  ;;  %v1683_v12 = vld [vmem:[%s9543_s4 + $0x278] sm:$0xff] }
 0x123   : > { %v1166_v50 = vpop.f32.mrf.mxu0  ;;  %v1217_v51 = vpop.f32.mrf.mxu1  ;;  %v1259_v61 = vadd.f32 %v7124_v8, %v1225_v29  ;;  %v1258_v33 = vadd.f32 %v9556_v18, %v1224_v47  ;;  %v1260_v22 = vadd.f32 %v7120_v0, %v1226_v48  ;;  %v1696_v40 = vld [vmem:[%s9543_s4 + $0x2e0] sm:$0xff]  ;;  %v1690_v53 = vld [vmem:[%s9543_s4 + $0x2b0] sm:$0xff] }
 0x124   : > { %v1232_v30 = vadd.f32 %v1166_v50, %v1051_v44  ;;  %v1234_v56 = vadd.f32 %v1217_v51, %v1053_v49  ;;  %v1263_v21 = vadd.f32 %v7124_v8, %v1229_v32  ;;  %v1265_v3 = vadd.f32 %v7128_v16, %v1231_v60  ;;  %v1628_v44 = vld [vmem:[%s9543_s4 + $0xc0] sm:$0xff]  ;;  %v1627_v50 = vld [vmem:[%s9543_s4 + $0xb8] sm:$0xff]  ;;  %v1621_v32 = vld [vmem:[%s9543_s4 + $0x88] sm:$0xff] }
 0x125   : > { %v1168_v31 = vpop.f32.mrf.mxu0  ;;  %v1219_v59 = vpop.f32.mrf.mxu1  ;;  %v1692_v49 = vld [vmem:[%s9543_s4 + $0x2c0] sm:$0xff]  ;;  %v1691_v51 = vld [vmem:[%s9543_s4 + $0x2b8] sm:$0xff]  ;;  %v1685_v60 = vld [vmem:[%s9543_s4 + $0x288] sm:$0xff] }
 0x126   : > { %v1233_v4 = vadd.f32 %v1168_v31, %v1052_v54  ;;  %v1235_v5 = vadd.f32 %v1219_v59, %v1054_v57  ;;  %v1266_v19 = vadd.f32 %v9556_v18, %v1232_v30  ;;  %v1268_v1 = vadd.f32 %v7120_v0, %v1234_v56  ;;  %v1271_v0 = vld [vmem:[%s9542_s3 + $0x8] sm:$0xf]  ;;  %v1623_v30 = vld [vmem:[%s9543_s4 + $0x98] sm:$0xff]  ;;  %v1622_v31 = vld [vmem:[%s9543_s4 + $0x90] sm:$0xff] }
 0x127   : > { %v1221_v14 = vpop.f32.mrf.mxu1  ;;  %v1170_v15 = vpop.f32.mrf.mxu0  ;;  %v1625_v54 = vld [vmem:[%s9543_s4 + $0xa8] sm:$0xff]  ;;  %v1687_v56 = vld [vmem:[%s9543_s4 + $0x298] sm:$0xff]  ;;  %v1686_v59 = vld [vmem:[%s9543_s4 + $0x290] sm:$0xff] }
 0x128   : > { %v1267_v7 = vadd.f32 %v7124_v8, %v1233_v4  ;;  %v1269_v46 = vadd.f32 %v7128_v16, %v1235_v5  ;;  %v9557_v8 = vmov 0.0   ;;  %v5433_v16 = vld [vmem:[%s9542_s3 + $0x10] sm:$0xff]  ;;  %v1689_v57 = vld [vmem:[%s9543_s4 + $0x2a8] sm:$0xff]  ;;  %v1620_v4 = vld [vmem:[%s9543_s4 + $0x80] sm:$0xff] }
 0x129   : > { %v1222_v20 = vpop.f32.mrf.mxu1  ;;  %v1171_v2 = vpop.f32.mrf.mxu0  ;;  %v1684_v5 = vld [vmem:[%s9543_s4 + $0x280] sm:$0xff]  ;;  %v1618_v9 = vld [vmem:[%s9543_s4 + $0x70] sm:$0xff]  ;;  %v1617_v14 = vld [vmem:[%s9543_s4 + $0x68] sm:$0xff] }
 0x12a   : > { %1305 = vmatprep.subr.mxu0 %v1267_v7  ;;  %1382 = vmatprep.subr.mxu1 %v1269_v46  ;;  %v1682_v10 = vld [vmem:[%s9543_s4 + $0x270] sm:$0xff]  ;;  %v1681_v15 = vld [vmem:[%s9543_s4 + $0x268] sm:$0xff]  ;;  %v1616_v29 = vld [vmem:[%s9543_s4 + $0x60] sm:$0xff] }
 0x12b   : > { %1306 = vmatpush1.msra.mxu0 %v1266_v19  ;;  %1383 = vmatpush1.msra.mxu1 %v1268_v1  ;;  %v1680_v6 = vld [vmem:[%s9543_s4 + $0x260] sm:$0xff]  ;;  %v1614_v47 = vld [vmem:[%s9543_s4 + $0x50] sm:$0xff]  ;;  %v1613_v18 = vld [vmem:[%s9543_s4 + $0x48] sm:$0xff] }
 0x12c   : > { %1307 = vmatprep.subr.mxu0 %v1263_v21  ;;  %1384 = vmatprep.subr.mxu1 %v1265_v3  ;;  %v1678_v48 = vld [vmem:[%s9543_s4 + $0x250] sm:$0xff]  ;;  %v1676_v20 = vld [vmem:[%s9543_s4 + $0x240] sm:$0xff]  ;;  %v1611_v2 = vld [vmem:[%s9543_s4 + $0x38] sm:$0xff] }
 0x12d   : > { %1308 = vmatpush1.msra.mxu0 %v1262_v17  ;;  %1385 = vmatpush1.msra.mxu1 %v1264_v63 }
 0x12e   : > { %1309 = vmatprep.subr.mxu0 %v1259_v61  ;;  %1386 = vmatprep.subr.mxu1 %v1261_v62 }
 0x12f   : > { %1310 = vmatpush1.msra.mxu0 %v1258_v33  ;;  %1387 = vmatpush1.msra.mxu1 %v1260_v22 }
 0x130   : > { %5429 = vmatmul.mubr.msk.f32.vlgmr.msra.gmra.mxu0 %vm1272_vm5, %v1270_v34  ;;  %5431 = vmatmul.mubr.msk.f32.vlgmr.msra.gmra.mxu1 %vm1272_vm5, %v1270_v34  ;;  %v1671_v34 = vld [vmem:[%s9543_s4 + $0x218] sm:$0xff] }
 0x131   : > { %1468 = vmatprep.subr.mxu0 %v1267_v7  ;;  %1545 = vmatprep.subr.mxu1 %v1269_v46  ;;  %v1615_v7 = vld [vmem:[%s9543_s4 + $0x58] sm:$0xff] }
 0x132   : > { %1469 = vmatpush1.msra.mxu0 %v1266_v19  ;;  %1546 = vmatpush1.msra.mxu1 %v1268_v1  ;;  %v1679_v46 = vld [vmem:[%s9543_s4 + $0x258] sm:$0xff]  ;;  %v1677_v19 = vld [vmem:[%s9543_s4 + $0x248] sm:$0xff]  ;;  %v1612_v1 = vld [vmem:[%s9543_s4 + $0x40] sm:$0xff] }
 0x133   : > { %1470 = vmatprep.subr.mxu0 %v1263_v21  ;;  %1547 = vmatprep.subr.mxu1 %v1265_v3  ;;  %v1675_v21 = vld [vmem:[%s9543_s4 + $0x238] sm:$0xff]  ;;  %v1610_v3 = vld [vmem:[%s9543_s4 + $0x30] sm:$0xff] }
 0x134   : > { %1349 = vmatprep.mubr.f32.mxu0 %v9557_v8  ;;  %1426 = vmatprep.mubr.f32.mxu1 %v9557_v8 }
 0x135   : > { %1471 = vmatpush1.msra.mxu0 %v1262_v17  ;;  %1548 = vmatpush1.msra.mxu1 %v1264_v63  ;;  %v1674_v17 = vld [vmem:[%s9543_s4 + $0x230] sm:$0xff]  ;;  %v1609_v63 = vld [vmem:[%s9543_s4 + $0x28] sm:$0xff] }
 0x136   : > { %5430 = vmatmul.mubr.msk.f32.gmra.mxu0 %vm1272_vm5, %v1271_v0  ;;  %5432 = vmatmul.mubr.msk.f32.gmra.mxu1 %vm1272_vm5, %v1271_v0  ;;  %v1606_v0 = vld [vmem:[%s9543_s4 + $0x10] sm:$0xff] }
 0x137   : > { %1472 = vmatprep.subr.mxu0 %v1259_v61  ;;  %1549 = vmatprep.subr.mxu1 %v1261_v62  ;;  %v1673_v61 = vld [vmem:[%s9543_s4 + $0x228] sm:$0xff]  ;;  %v1608_v62 = vld [vmem:[%s9543_s4 + $0x20] sm:$0xff] }
 0x138   : > { %1473 = vmatpush1.msra.mxu0 %v1258_v33  ;;  %1550 = vmatpush1.msra.mxu1 %v1260_v22  ;;  %v1672_v33 = vld [vmem:[%s9543_s4 + $0x220] sm:$0xff]  ;;  %v1607_v22 = vld [vmem:[%s9543_s4 + $0x18] sm:$0xff] }
 0x139   : > { %1506 = vmatprep.mubr.f32.mxu0 %v9557_v8  ;;  %1583 = vmatprep.mubr.f32.mxu1 %v9557_v8 }
 0x13a   : > { %5435 = vmatmul.mubr.msk.f32.vlgmr.msra.gmra.mxu0 %vm1272_vm5, %v5433_v16  ;;  %5437 = vmatmul.mubr.msk.f32.vlgmr.msra.gmra.mxu1 %vm1272_vm5, %v5433_v16  ;;  %v1670_v16 = vld [vmem:[%s9543_s4 + $0x210] sm:$0xff] }
 0x13b   : > { %1512 = vmatprep.mubr.f32.mxu0 %v9557_v8  ;;  %1589 = vmatprep.mubr.f32.mxu1 %v9557_v8 }
 0x13c   : > { %1731 = vmatprep.subr.mxu0 %v1635_v35  ;;  %1808 = vmatprep.subr.mxu1 %v1699_v23  ;;  %v1605_v35 = vld [vmem:[%s9543_s4 + $0x8] sm:$0xff] }
 0x13d   : > { %1732 = vmatpush1.msra.mxu0 %v1634_v36  ;;  %1809 = vmatpush1.msra.mxu1 %v1698_v37  ;;  %v1669_v23 = vld [vmem:[%s9543_s4 + $0x208] sm:$0xff]  ;;  %v1604_v36 = vld [vmem:[%s9543_s4] sm:$0xff] }
 0x13e   : > { %5436 = vmatmul.mubr.msk.f32.gmra.mxu0 %vm1272_vm5, %v5434_v24  ;;  %5438 = vmatmul.mubr.msk.f32.gmra.mxu1 %vm1272_vm5, %v5434_v24  ;;  %v1668_v37 = vld [vmem:[%s9543_s4 + $0x200] sm:$0xff]  ;;  %v1667_v24 = vld [vmem:[%s9543_s4 + $0x1f8] sm:$0xff] }
 0x13f   : > { %1733 = vmatprep.subr.mxu0 %v1633_v38  ;;  %1810 = vmatprep.subr.mxu1 %v1697_v39  ;;  %v1723_v38 = vld [vmem:[%s9543_s4 + $0x3b8] sm:$0xff]  ;;  %v1666_v39 = vld [vmem:[%s9543_s4 + $0x1f0] sm:$0xff] }
 0x140   : > { %1734 = vmatpush1.msra.mxu0 %v1632_v25  ;;  %1811 = vmatpush1.msra.mxu1 %v1696_v40  ;;  %v1722_v25 = vld [vmem:[%s9543_s4 + $0x3b0] sm:$0xff]  ;;  %v1665_v40 = vld [vmem:[%s9543_s4 + $0x1e8] sm:$0xff] }
 0x141   : > { %1735 = vmatprep.subr.mxu0 %v1631_v26  ;;  %1812 = vmatprep.subr.mxu1 %v1695_v41  ;;  %v1721_v26 = vld [vmem:[%s9543_s4 + $0x3a8] sm:$0xff]  ;;  %v1664_v41 = vld [vmem:[%s9543_s4 + $0x1e0] sm:$0xff] }
 0x142   : > { %1736 = vmatpush1.msra.mxu0 %v1630_v27  ;;  %1813 = vmatpush1.msra.mxu1 %v1694_v28  ;;  %v1720_v27 = vld [vmem:[%s9543_s4 + $0x3a0] sm:$0xff]  ;;  %v1663_v28 = vld [vmem:[%s9543_s4 + $0x1d8] sm:$0xff] }
 0x143   : > { %1737 = vmatprep.subr.mxu0 %v1629_v42  ;;  %1814 = vmatprep.subr.mxu1 %v1693_v43  ;;  %v1719_v42 = vld [vmem:[%s9543_s4 + $0x398] sm:$0xff]  ;;  %v1662_v43 = vld [vmem:[%s9543_s4 + $0x1d0] sm:$0xff] }
 0x144   : > { %1738 = vmatpush1.msra.mxu0 %v1628_v44  ;;  %1815 = vmatpush1.msra.mxu1 %v1692_v49  ;;  %v1718_v44 = vld [vmem:[%s9543_s4 + $0x390] sm:$0xff]  ;;  %v1661_v49 = vld [vmem:[%s9543_s4 + $0x1c8] sm:$0xff] }
 0x145   : > { %1739 = vmatprep.subr.mxu0 %v1627_v50  ;;  %1816 = vmatprep.subr.mxu1 %v1691_v51  ;;  %v1717_v50 = vld [vmem:[%s9543_s4 + $0x388] sm:$0xff]  ;;  %v1660_v51 = vld [vmem:[%s9543_s4 + $0x1c0] sm:$0xff] }
 0x146   : > { %1740 = vmatpush1.msra.mxu0 %v1626_v52  ;;  %1817 = vmatpush1.msra.mxu1 %v1690_v53  ;;  %v1716_v52 = vld [vmem:[%s9543_s4 + $0x380] sm:$0xff]  ;;  %v1659_v53 = vld [vmem:[%s9543_s4 + $0x1b8] sm:$0xff] }
 0x147   : > { %1741 = vmatprep.subr.mxu0 %v1625_v54  ;;  %1818 = vmatprep.subr.mxu1 %v1689_v57  ;;  %v1715_v54 = vld [vmem:[%s9543_s4 + $0x378] sm:$0xff]  ;;  %v1658_v57 = vld [vmem:[%s9543_s4 + $0x1b0] sm:$0xff] }
 0x148   : > { %1742 = vmatpush1.msra.mxu0 %v1624_v58  ;;  %1819 = vmatpush1.msra.mxu1 %v1688_v55  ;;  %v1714_v58 = vld [vmem:[%s9543_s4 + $0x370] sm:$0xff]  ;;  %v1657_v55 = vld [vmem:[%s9543_s4 + $0x1a8] sm:$0xff] }
 0x149   : > { %1743 = vmatprep.subr.mxu0 %v1623_v30  ;;  %1820 = vmatprep.subr.mxu1 %v1687_v56  ;;  %v1713_v30 = vld [vmem:[%s9543_s4 + $0x368] sm:$0xff]  ;;  %v1656_v56 = vld [vmem:[%s9543_s4 + $0x1a0] sm:$0xff] }
 0x14a   : > { %1744 = vmatpush1.msra.mxu0 %v1622_v31  ;;  %1821 = vmatpush1.msra.mxu1 %v1686_v59  ;;  %v1655_v31 = vld [vmem:[%s9543_s4 + $0x198] sm:$0xff]  ;;  %v1654_v59 = vld [vmem:[%s9543_s4 + $0x190] sm:$0xff] }
 0x14b   : > { %1745 = vmatprep.subr.mxu0 %v1621_v32  ;;  %1822 = vmatprep.subr.mxu1 %v1685_v60  ;;  %v1653_v32 = vld [vmem:[%s9543_s4 + $0x188] sm:$0xff]  ;;  %v1652_v60 = vld [vmem:[%s9543_s4 + $0x180] sm:$0xff] }
 0x14c   : > { %1746 = vmatpush1.msra.mxu0 %v1620_v4  ;;  %1823 = vmatpush1.msra.mxu1 %v1684_v5  ;;  %v1651_v4 = vld [vmem:[%s9543_s4 + $0x178] sm:$0xff]  ;;  %v1650_v5 = vld [vmem:[%s9543_s4 + $0x170] sm:$0xff] }
 0x14d   : > { %1747 = vmatprep.subr.mxu0 %v1619_v11  ;;  %1824 = vmatprep.subr.mxu1 %v1683_v12  ;;  %v1649_v11 = vld [vmem:[%s9543_s4 + $0x168] sm:$0xff]  ;;  %v1648_v12 = vld [vmem:[%s9543_s4 + $0x160] sm:$0xff] }
 0x14e   : > { %1748 = vmatpush1.msra.mxu0 %v1618_v9  ;;  %1825 = vmatpush1.msra.mxu1 %v1682_v10  ;;  %v1712_v9 = vld [vmem:[%s9543_s4 + $0x360] sm:$0xff]  ;;  %v1647_v10 = vld [vmem:[%s9543_s4 + $0x158] sm:$0xff] }
 0x14f   : > { %1749 = vmatprep.subr.mxu0 %v1617_v14  ;;  %1826 = vmatprep.subr.mxu1 %v1681_v15  ;;  %v1711_v14 = vld [vmem:[%s9543_s4 + $0x358] sm:$0xff]  ;;  %v1646_v15 = vld [vmem:[%s9543_s4 + $0x150] sm:$0xff] }
 0x150   : > { %1750 = vmatpush1.msra.mxu0 %v1616_v29  ;;  %1827 = vmatpush1.msra.mxu1 %v1680_v6  ;;  %v1710_v29 = vld [vmem:[%s9543_s4 + $0x350] sm:$0xff]  ;;  %v1645_v6 = vld [vmem:[%s9543_s4 + $0x148] sm:$0xff] }
 0x151   : > { %1751 = vmatprep.subr.mxu0 %v1615_v7  ;;  %1828 = vmatprep.subr.mxu1 %v1679_v46  ;;  %v1709_v7 = vld [vmem:[%s9543_s4 + $0x348] sm:$0xff]  ;;  %v1644_v46 = vld [vmem:[%s9543_s4 + $0x140] sm:$0xff] }
 0x152   : > { %1752 = vmatpush1.msra.mxu0 %v1614_v47  ;;  %1829 = vmatpush1.msra.mxu1 %v1678_v48  ;;  %v1708_v47 = vld [vmem:[%s9543_s4 + $0x340] sm:$0xff]  ;;  %v1643_v48 = vld [vmem:[%s9543_s4 + $0x138] sm:$0xff] }
 0x153   : > { %1753 = vmatprep.subr.mxu0 %v1613_v18  ;;  %1830 = vmatprep.subr.mxu1 %v1677_v19  ;;  %v1707_v18 = vld [vmem:[%s9543_s4 + $0x338] sm:$0xff]  ;;  %v1642_v19 = vld [vmem:[%s9543_s4 + $0x130] sm:$0xff] }
 0x154   : > { %1754 = vmatpush1.msra.mxu0 %v1612_v1  ;;  %1831 = vmatpush1.msra.mxu1 %v1676_v20  ;;  %v1706_v1 = vld [vmem:[%s9543_s4 + $0x330] sm:$0xff]  ;;  %v1641_v20 = vld [vmem:[%s9543_s4 + $0x128] sm:$0xff] }
 0x155   : > { %1755 = vmatprep.subr.mxu0 %v1611_v2  ;;  %1832 = vmatprep.subr.mxu1 %v1675_v21  ;;  %v1705_v2 = vld [vmem:[%s9543_s4 + $0x328] sm:$0xff]  ;;  %v1640_v21 = vld [vmem:[%s9543_s4 + $0x120] sm:$0xff] }
 0x156   : > { %1756 = vmatpush1.msra.mxu0 %v1610_v3  ;;  %1833 = vmatpush1.msra.mxu1 %v1674_v17  ;;  %v1704_v3 = vld [vmem:[%s9543_s4 + $0x320] sm:$0xff]  ;;  %v1639_v17 = vld [vmem:[%s9543_s4 + $0x118] sm:$0xff] }
 0x157   : > { %1757 = vmatprep.subr.mxu0 %v1609_v63  ;;  %1834 = vmatprep.subr.mxu1 %v1673_v61  ;;  %v1703_v63 = vld [vmem:[%s9543_s4 + $0x318] sm:$0xff]  ;;  %v1638_v61 = vld [vmem:[%s9543_s4 + $0x110] sm:$0xff] }
 0x158   : > { %1758 = vmatpush1.msra.mxu0 %v1608_v62  ;;  %1835 = vmatpush1.msra.mxu1 %v1672_v33  ;;  %v1702_v62 = vld [vmem:[%s9543_s4 + $0x310] sm:$0xff]  ;;  %v1637_v33 = vld [vmem:[%s9543_s4 + $0x108] sm:$0xff] }
 0x159   : > { %1759 = vmatprep.subr.mxu0 %v1607_v22  ;;  %1836 = vmatprep.subr.mxu1 %v1671_v34  ;;  %v1701_v22 = vld [vmem:[%s9543_s4 + $0x308] sm:$0xff]  ;;  %v1636_v34 = vld [vmem:[%s9543_s4 + $0x100] sm:$0xff] }
 0x15a   : > { %1760 = vmatpush1.msra.mxu0 %v1606_v0  ;;  %1837 = vmatpush1.msra.mxu1 %v1670_v16  ;;  %v1700_v0 = vld [vmem:[%s9543_s4 + $0x300] sm:$0xff]  ;;  %v5472_v16 = vld [vmem:[%s9543_s4 + $0x4b8] sm:$0xff] }
 0x15b   : > { %1761 = vmatprep.subr.mxu0 %v1605_v35  ;;  %1838 = vmatprep.subr.mxu1 %v1669_v23  ;;  %v5536_v35 = vld [vmem:[%s9543_s4 + $0x6b8] sm:$0xff] }
 0x15c   : > { %1762 = vmatpush1.msra.mxu0 %v1604_v36  ;;  %1839 = vmatpush1.msra.mxu1 %v1668_v37 }
 0x15d   : > { %1763 = vmatprep.subr.mxu0 %v1667_v24  ;;  %1848 = vmatprep.subr.mxu1 %v1723_v38 }
 0x15e   : > { %1764 = vmatpush2.msra.mxu0 %v1666_v39  ;;  %1849 = vmatpush2.msra.mxu1 %v1722_v25 }
 0x15f   : > { %1765 = vmatprep.subr.mxu0 %v1665_v40  ;;  %1850 = vmatprep.subr.mxu1 %v1721_v26 }
 0x160   : > { %1766 = vmatpush2.msra.mxu0 %v1664_v41  ;;  %1851 = vmatpush2.msra.mxu1 %v1720_v27 }
 0x161   : > { %1767 = vmatprep.subr.mxu0 %v1663_v28  ;;  %1852 = vmatprep.subr.mxu1 %v1719_v42 }
 0x162   : > { %1768 = vmatpush2.msra.mxu0 %v1662_v43  ;;  %1853 = vmatpush2.msra.mxu1 %v1718_v44 }
 0x163   : > { %1769 = vmatprep.subr.mxu0 %v1661_v49  ;;  %1854 = vmatprep.subr.mxu1 %v1717_v50 }
 0x164   : > { %1770 = vmatpush2.msra.mxu0 %v1660_v51  ;;  %1855 = vmatpush2.msra.mxu1 %v1716_v52  ;;  %v5471_v52 = vld [vmem:[%s9543_s4 + $0x4b0] sm:$0xff] }
 0x165   : > { %1771 = vmatprep.subr.mxu0 %v1659_v53  ;;  %1856 = vmatprep.subr.mxu1 %v1715_v54  ;;  %v5535_v53 = vld [vmem:[%s9543_s4 + $0x6b0] sm:$0xff]  ;;  %v5470_v54 = vld [vmem:[%s9543_s4 + $0x4a8] sm:$0xff] }
 0x166   : > { %1772 = vmatpush2.msra.mxu0 %v1658_v57  ;;  %1857 = vmatpush2.msra.mxu1 %v1714_v58  ;;  %v5534_v57 = vld [vmem:[%s9543_s4 + $0x6a8] sm:$0xff] }
 0x167   : > { %1773 = vmatprep.subr.mxu0 %v1657_v55  ;;  %1858 = vmatprep.subr.mxu1 %v1713_v30  ;;  %v5469_v30 = vld [vmem:[%s9543_s4 + $0x4a0] sm:$0xff] }
 0x168   : > { %1774 = vmatpush2.msra.mxu0 %v1656_v56  ;;  %1859 = vmatpush2.msra.mxu1 %v1712_v9  ;;  %v5533_v56 = vld [vmem:[%s9543_s4 + $0x6a0] sm:$0xff]  ;;  %v5466_v9 = vld [vmem:[%s9543_s4 + $0x488] sm:$0xff] }
 0x169   : > { %1775 = vmatprep.subr.mxu0 %v1655_v31  ;;  %1860 = vmatprep.subr.mxu1 %v1711_v14  ;;  %v5465_v14 = vld [vmem:[%s9543_s4 + $0x480] sm:$0xff] }
 0x16a   : > { %1776 = vmatpush2.msra.mxu0 %v1654_v59  ;;  %1861 = vmatpush2.msra.mxu1 %v1710_v29  ;;  %v5464_v29 = vld [vmem:[%s9543_s4 + $0x478] sm:$0xff] }
 0x16b   : > { %1777 = vmatprep.subr.mxu0 %v1653_v32  ;;  %1862 = vmatprep.subr.mxu1 %v1709_v7  ;;  %v5468_v32 = vld [vmem:[%s9543_s4 + $0x498] sm:$0xff]  ;;  %v5463_v7 = vld [vmem:[%s9543_s4 + $0x470] sm:$0xff] }
 0x16c   : > { %1778 = vmatpush2.msra.mxu0 %v1652_v60  ;;  %1863 = vmatpush2.msra.mxu1 %v1708_v47  ;;  %v5532_v60 = vld [vmem:[%s9543_s4 + $0x698] sm:$0xff]  ;;  %v5462_v47 = vld [vmem:[%s9543_s4 + $0x468] sm:$0xff] }
 0x16d   : > { %1779 = vmatprep.subr.mxu0 %v1651_v4  ;;  %1864 = vmatprep.subr.mxu1 %v1707_v18  ;;  %v5461_v18 = vld [vmem:[%s9543_s4 + $0x460] sm:$0xff] }
 0x16e   : > { %1780 = vmatpush2.msra.mxu0 %v1650_v5  ;;  %1865 = vmatpush2.msra.mxu1 %v1706_v1  ;;  %v5460_v1 = vld [vmem:[%s9543_s4 + $0x458] sm:$0xff] }
 0x16f   : > { %1781 = vmatprep.subr.mxu0 %v1649_v11  ;;  %1866 = vmatprep.subr.mxu1 %v1705_v2  ;;  %v5467_v11 = vld [vmem:[%s9543_s4 + $0x490] sm:$0xff] }
 0x170   : > { %1782 = vmatpush2.msra.mxu0 %v1648_v12  ;;  %1867 = vmatpush2.msra.mxu1 %v1704_v3  ;;  %v5531_v12 = vld [vmem:[%s9543_s4 + $0x690] sm:$0xff]  ;;  %v5458_v3 = vld [vmem:[%s9543_s4 + $0x448] sm:$0xff] }
 0x171   : > { %1783 = vmatprep.subr.mxu0 %v1647_v10  ;;  %1868 = vmatprep.subr.mxu1 %v1703_v63  ;;  %v5530_v10 = vld [vmem:[%s9543_s4 + $0x688] sm:$0xff]  ;;  %v5459_v2 = vld [vmem:[%s9543_s4 + $0x450] sm:$0xff]  ;;  %v5457_v63 = vld [vmem:[%s9543_s4 + $0x440] sm:$0xff] }
 0x172   : > { %1784 = vmatpush2.msra.mxu0 %v1646_v15  ;;  %1869 = vmatpush2.msra.mxu1 %v1702_v62  ;;  %v5529_v15 = vld [vmem:[%s9543_s4 + $0x680] sm:$0xff]  ;;  %v5456_v62 = vld [vmem:[%s9543_s4 + $0x438] sm:$0xff] }
 0x173   : > { %1785 = vmatprep.subr.mxu0 %v1645_v6  ;;  %1870 = vmatprep.subr.mxu1 %v1701_v22  ;;  %v5528_v6 = vld [vmem:[%s9543_s4 + $0x678] sm:$0xff]  ;;  %v5455_v22 = vld [vmem:[%s9543_s4 + $0x430] sm:$0xff] }
 0x174   : > { %1786 = vmatpush2.msra.mxu0 %v1644_v46  ;;  %1871 = vmatpush2.msra.mxu1 %v1700_v0  ;;  %v5527_v46 = vld [vmem:[%s9543_s4 + $0x670] sm:$0xff]  ;;  %v5454_v0 = vld [vmem:[%s9543_s4 + $0x428] sm:$0xff] }
 0x175   : > { %1787 = vmatprep.subr.mxu0 %v1643_v48  ;;  %2006 = vmatprep.subr.mxu1 %v5472_v16  ;;  %v5526_v48 = vld [vmem:[%s9543_s4 + $0x668] sm:$0xff] }
 0x176   : > { %1788 = vmatpush2.msra.mxu0 %v1642_v19  ;;  %v5525_v19 = vld [vmem:[%s9543_s4 + $0x660] sm:$0xff]  ;;  %v5518_v16 = vld [vmem:[%s9543_s4 + $0x628] sm:$0xff] }
 0x177   : > { %1789 = vmatprep.subr.mxu0 %v1641_v20  ;;  %v5524_v20 = vld [vmem:[%s9543_s4 + $0x658] sm:$0xff] }
 0x178   : > { %1790 = vmatpush2.msra.mxu0 %v1640_v21  ;;  %v5523_v21 = vld [vmem:[%s9543_s4 + $0x650] sm:$0xff] }
 0x179   : > { %1791 = vmatprep.subr.mxu0 %v1639_v17  ;;  %v5522_v17 = vld [vmem:[%s9543_s4 + $0x648] sm:$0xff] }
 0x17a   : > { %1792 = vmatpush2.msra.mxu0 %v1638_v61  ;;  %v5521_v61 = vld [vmem:[%s9543_s4 + $0x640] sm:$0xff] }
 0x17b   : > { %1793 = vmatprep.subr.mxu0 %v1637_v33  ;;  %v5520_v33 = vld [vmem:[%s9543_s4 + $0x638] sm:$0xff] }
 0x17c   : > { %1794 = vmatpush2.msra.mxu0 %v1636_v34  ;;  %v5519_v34 = vld [vmem:[%s9543_s4 + $0x630] sm:$0xff] }
 0x17d   : > { %2083 = vmatprep.subr.mxu0 %v5536_v35  ;;  %v5453_v35 = vld [vmem:[%s9543_s4 + $0x420] sm:$0xff] }
 0x1f0   : > { %v1345_v23 = vpop.f32.mrf.mxu0  ;;  %v1422_v36 = vpop.f32.mrf.mxu1 }
 0x1f2   : > { %v1347_v37 = vpop.f32.mrf.mxu0  ;;  %v1424_v24 = vpop.f32.mrf.mxu1 }
 0x1f6   : > { %v1351_v38 = vpop.f32.mrf.mxu0  ;;  %v1428_v39 = vpop.f32.mrf.mxu1 }
 0x1f8   : > { %v1353_v25 = vpop.f32.mrf.mxu0  ;;  %v1430_v40 = vpop.f32.mrf.mxu1 }
 0x1fa   : > { %v1508_v26 = vpop.f32.mrf.mxu0  ;;  %v1585_v41 = vpop.f32.mrf.mxu1 }
 0x1fb   : > { %v7564_v44 = vmax.f32 %v1345_v23, %v1508_v26  ;;  %v7566_v49 = vmax.f32 %v1422_v36, %v1585_v41  ;;  %v5517_v23 = vld [vmem:[%s9543_s4 + $0x620] sm:$0xff]  ;;  %v5452_v36 = vld [vmem:[%s9543_s4 + $0x418] sm:$0xff] }
 0x1fc   : > { %v1510_v27 = vpop.f32.mrf.mxu0  ;;  %v1587_v28 = vpop.f32.mrf.mxu1  ;;  %v5513_v26 = vld [vmem:[%s9543_s4 + $0x600] sm:$0xff]  ;;  %v5448_v41 = vld [vmem:[%s9543_s4 + $0x3f8] sm:$0xff] }
 0x1fd   : > { %v1597_v42 = vmax.f32 %v1347_v37, %v1510_v27  ;;  %v1599_v43 = vmax.f32 %v1424_v24, %v1587_v28  ;;  %v5516_v37 = vld [vmem:[%s9543_s4 + $0x618] sm:$0xff]  ;;  %v5451_v24 = vld [vmem:[%s9543_s4 + $0x410] sm:$0xff] }
 0x1fe   : > { %v1514_v50 = vpop.f32.mrf.mxu0  ;;  %v1591_v51 = vpop.f32.mrf.mxu1  ;;  %v5512_v27 = vld [vmem:[%s9543_s4 + $0x5f8] sm:$0xff]  ;;  %v5447_v28 = vld [vmem:[%s9543_s4 + $0x3f0] sm:$0xff] }
 0x1ff   : > { %1795 = vmatprep.mubr.f32.mxu0 %v1597_v42  ;;  %5439 = vmatprep.mubr.msk.f32.mxu1 %vm1724_vm6, %v1599_v43  ;;  %v7599_v4 = vmax.f32 %v1351_v38, %v1514_v50  ;;  %v7601_v5 = vmax.f32 %v1428_v39, %v1591_v51  ;;  %v5515_v38 = vld [vmem:[%s9543_s4 + $0x610] sm:$0xff]  ;;  %v5450_v39 = vld [vmem:[%s9543_s4 + $0x408] sm:$0xff]  ;;  %v5445_v51 = vld [vmem:[%s9543_s4 + $0x3e0] sm:$0xff] }
 0x200   : > { %v1516_v58 = vpop.f32.mrf.mxu0  ;;  %v1593_v55 = vpop.f32.mrf.mxu1  ;;  %1796 = vmatmul.mubr.f32.vlgmr.msra.gmra.mxu0 %v7564_v44  ;;  %1873 = vmatmul.mubr.f32.vlgmr.msra.gmra.mxu1 %v7566_v49  ;;  %v5510_v50 = vld [vmem:[%s9543_s4 + $0x5e8] sm:$0xff] }
 0x201   : > { %v7589_v31 = vmax.f32 %v1353_v25, %v1516_v58  ;;  %v7591_v59 = vmax.f32 %v1430_v40, %v1593_v55  ;;  %2007 = vmatpush1.msra.mxu1 %v5471_v52  ;;  %2084 = vmatpush1.msra.mxu0 %v5535_v53  ;;  %v5514_v25 = vld [vmem:[%s9543_s4 + $0x608] sm:$0xff]  ;;  %v5449_v40 = vld [vmem:[%s9543_s4 + $0x400] sm:$0xff]  ;;  %v5444_v53 = vld [vmem:[%s9543_s4 + $0x3d8] sm:$0xff] }
 0x202   : > { %2008 = vmatprep.subr.mxu1 %v5470_v54  ;;  %2085 = vmatprep.subr.mxu0 %v5534_v57  ;;  %v5509_v52 = vld [vmem:[%s9543_s4 + $0x5e0] sm:$0xff]  ;;  %v5508_v54 = vld [vmem:[%s9543_s4 + $0x5d8] sm:$0xff]  ;;  %v5443_v57 = vld [vmem:[%s9543_s4 + $0x3d0] sm:$0xff] }
 0x203   : > { %2009 = vmatpush1.msra.mxu1 %v5469_v30  ;;  %2086 = vmatpush1.msra.mxu0 %v5533_v56  ;;  %v5507_v58 = vld [vmem:[%s9543_s4 + $0x5d0] sm:$0xff]  ;;  %v5442_v55 = vld [vmem:[%s9543_s4 + $0x3c8] sm:$0xff]  ;;  %v5441_v56 = vld [vmem:[%s9543_s4 + $0x3c0] sm:$0xff] }
 0x204   : > { %1801 = vmatprep.mubr.f32.mxu0 %v7589_v31  ;;  %5440 = vmatprep.mubr.msk.f32.mxu1 %vm1724_vm6, %v7591_v59  ;;  %v5506_v30 = vld [vmem:[%s9543_s4 + $0x5c8] sm:$0xff] }
 0x205   : > { %2010 = vmatprep.subr.mxu1 %v5468_v32  ;;  %2087 = vmatprep.subr.mxu0 %v5532_v60  ;;  %v5505_v32 = vld [vmem:[%s9543_s4 + $0x5c0] sm:$0xff]  ;;  %v5504_v60 = vld [vmem:[%s9543_s4 + $0x5b8] sm:$0xff] }
 0x206   : > { %1802 = vmatmul.mubr.f32.gmra.mxu0 %v7599_v4  ;;  %1879 = vmatmul.mubr.f32.gmra.mxu1 %v7601_v5 }
 0x207   : > { %2011 = vmatpush1.msra.mxu1 %v5467_v11  ;;  %2088 = vmatpush1.msra.mxu0 %v5531_v12  ;;  %v5560_v11 = vld [vmem:[%s9543_s4 + $0x778] sm:$0xff]  ;;  %v5503_v12 = vld [vmem:[%s9543_s4 + $0x5b0] sm:$0xff] }
 0x208   : > { %2012 = vmatprep.subr.mxu1 %v5466_v9  ;;  %2070 = vmatprep.mubr.f32.mxu1 %v1597_v42  ;;  %v5511_v42 = vld [vmem:[%s9543_s4 + $0x5f0] sm:$0xff] }
 0x209   : > { %2089 = vmatprep.subr.mxu0 %v5530_v10  ;;  %5561 = vmatprep.mubr.msk.f32.mxu0 %vm1724_vm6, %v1599_v43  ;;  %v5446_v43 = vld [vmem:[%s9543_s4 + $0x3e8] sm:$0xff]  ;;  %v5559_v9 = vld [vmem:[%s9543_s4 + $0x770] sm:$0xff] }
 0x20a   : > { %2013 = vmatpush1.msra.mxu1 %v5465_v14  ;;  %2090 = vmatpush1.msra.mxu0 %v5529_v15  ;;  %v5502_v10 = vld [vmem:[%s9543_s4 + $0x5a8] sm:$0xff]  ;;  %v5501_v15 = vld [vmem:[%s9543_s4 + $0x5a0] sm:$0xff] }
 0x20b   : > { %2014 = vmatprep.subr.mxu1 %v5464_v29  ;;  %2091 = vmatprep.subr.mxu0 %v5528_v6  ;;  %v5558_v14 = vld [vmem:[%s9543_s4 + $0x768] sm:$0xff]  ;;  %v5557_v29 = vld [vmem:[%s9543_s4 + $0x760] sm:$0xff]  ;;  %v5500_v6 = vld [vmem:[%s9543_s4 + $0x598] sm:$0xff] }
 0x20c   : > { %2015 = vmatpush1.msra.mxu1 %v5463_v7  ;;  %2092 = vmatpush1.msra.mxu0 %v5527_v46  ;;  %v5556_v7 = vld [vmem:[%s9543_s4 + $0x758] sm:$0xff]  ;;  %v5499_v46 = vld [vmem:[%s9543_s4 + $0x590] sm:$0xff] }
 0x20d   : > { %2016 = vmatprep.subr.mxu1 %v5462_v47  ;;  %2093 = vmatprep.subr.mxu0 %v5526_v48  ;;  %v5555_v47 = vld [vmem:[%s9543_s4 + $0x750] sm:$0xff]  ;;  %v5498_v48 = vld [vmem:[%s9543_s4 + $0x588] sm:$0xff] }
 0x20e   : > { %2017 = vmatpush1.msra.mxu1 %v5461_v18  ;;  %2094 = vmatpush1.msra.mxu0 %v5525_v19  ;;  %v5554_v18 = vld [vmem:[%s9543_s4 + $0x748] sm:$0xff]  ;;  %v5497_v19 = vld [vmem:[%s9543_s4 + $0x580] sm:$0xff] }
 0x20f   : > { %2018 = vmatprep.subr.mxu1 %v5460_v1  ;;  %2095 = vmatprep.subr.mxu0 %v5524_v20  ;;  %v5553_v1 = vld [vmem:[%s9543_s4 + $0x740] sm:$0xff]  ;;  %v5496_v20 = vld [vmem:[%s9543_s4 + $0x578] sm:$0xff] }
 0x210   : > { %2019 = vmatpush1.msra.mxu1 %v5459_v2  ;;  %2096 = vmatpush1.msra.mxu0 %v5523_v21  ;;  %v5552_v2 = vld [vmem:[%s9543_s4 + $0x738] sm:$0xff]  ;;  %v5495_v21 = vld [vmem:[%s9543_s4 + $0x570] sm:$0xff] }
 0x211   : > { %2020 = vmatprep.subr.mxu1 %v5458_v3  ;;  %2097 = vmatprep.subr.mxu0 %v5522_v17  ;;  %v5551_v3 = vld [vmem:[%s9543_s4 + $0x730] sm:$0xff]  ;;  %v5494_v17 = vld [vmem:[%s9543_s4 + $0x568] sm:$0xff] }
 0x212   : > { %2021 = vmatpush1.msra.mxu1 %v5457_v63  ;;  %2098 = vmatpush1.msra.mxu0 %v5521_v61  ;;  %v5550_v63 = vld [vmem:[%s9543_s4 + $0x728] sm:$0xff]  ;;  %v5493_v61 = vld [vmem:[%s9543_s4 + $0x560] sm:$0xff] }
 0x213   : > { %2022 = vmatprep.subr.mxu1 %v5456_v62  ;;  %2099 = vmatprep.subr.mxu0 %v5520_v33  ;;  %v5549_v62 = vld [vmem:[%s9543_s4 + $0x720] sm:$0xff]  ;;  %v5492_v33 = vld [vmem:[%s9543_s4 + $0x558] sm:$0xff] }
 0x214   : > { %2023 = vmatpush1.msra.mxu1 %v5455_v22  ;;  %2100 = vmatpush1.msra.mxu0 %v5519_v34  ;;  %v5548_v22 = vld [vmem:[%s9543_s4 + $0x718] sm:$0xff]  ;;  %v5491_v34 = vld [vmem:[%s9543_s4 + $0x550] sm:$0xff] }
 0x215   : > { %2024 = vmatprep.subr.mxu1 %v5454_v0  ;;  %2101 = vmatprep.subr.mxu0 %v5518_v16  ;;  %v5547_v0 = vld [vmem:[%s9543_s4 + $0x710] sm:$0xff]  ;;  %v5490_v16 = vld [vmem:[%s9543_s4 + $0x548] sm:$0xff] }
 0x216   : > { %2025 = vmatpush1.msra.mxu1 %v5453_v35  ;;  %2102 = vmatpush1.msra.mxu0 %v5517_v23  ;;  %v5546_v35 = vld [vmem:[%s9543_s4 + $0x708] sm:$0xff]  ;;  %v5489_v23 = vld [vmem:[%s9543_s4 + $0x540] sm:$0xff] }
 0x217   : > { %2026 = vmatprep.subr.mxu1 %v5452_v36  ;;  %2103 = vmatprep.subr.mxu0 %v5516_v37  ;;  %v5545_v36 = vld [vmem:[%s9543_s4 + $0x700] sm:$0xff]  ;;  %v5488_v37 = vld [vmem:[%s9543_s4 + $0x538] sm:$0xff] }
 0x218   : > { %2027 = vmatpush1.msra.mxu1 %v5451_v24  ;;  %2104 = vmatpush1.msra.mxu0 %v5515_v38  ;;  %v5544_v24 = vld [vmem:[%s9543_s4 + $0x6f8] sm:$0xff]  ;;  %v5487_v38 = vld [vmem:[%s9543_s4 + $0x530] sm:$0xff] }
 0x219   : > { %2028 = vmatprep.subr.mxu1 %v5450_v39  ;;  %2105 = vmatprep.subr.mxu0 %v5514_v25  ;;  %v5543_v39 = vld [vmem:[%s9543_s4 + $0x6f0] sm:$0xff]  ;;  %v5486_v25 = vld [vmem:[%s9543_s4 + $0x528] sm:$0xff] }
 0x21a   : > { %2029 = vmatpush1.msra.mxu1 %v5449_v40  ;;  %2106 = vmatpush1.msra.mxu0 %v5513_v26  ;;  %v5542_v40 = vld [vmem:[%s9543_s4 + $0x6e8] sm:$0xff]  ;;  %v5485_v26 = vld [vmem:[%s9543_s4 + $0x520] sm:$0xff] }
 0x21b   : > { %2030 = vmatprep.subr.mxu1 %v5448_v41  ;;  %2107 = vmatprep.subr.mxu0 %v5512_v27  ;;  %v5541_v41 = vld [vmem:[%s9543_s4 + $0x6e0] sm:$0xff]  ;;  %v5484_v27 = vld [vmem:[%s9543_s4 + $0x518] sm:$0xff] }
 0x21c   : > { %2031 = vmatpush1.msra.mxu1 %v5447_v28  ;;  %2108 = vmatpush1.msra.mxu0 %v5511_v42  ;;  %v5540_v28 = vld [vmem:[%s9543_s4 + $0x6d8] sm:$0xff]  ;;  %v5483_v42 = vld [vmem:[%s9543_s4 + $0x510] sm:$0xff] }
 0x21d   : > { %2032 = vmatprep.subr.mxu1 %v5446_v43  ;;  %2109 = vmatprep.subr.mxu0 %v5510_v50  ;;  %v5539_v43 = vld [vmem:[%s9543_s4 + $0x6d0] sm:$0xff]  ;;  %v5482_v50 = vld [vmem:[%s9543_s4 + $0x508] sm:$0xff] }
 0x21e   : > { %2033 = vmatpush1.msra.mxu1 %v5445_v51  ;;  %2110 = vmatpush1.msra.mxu0 %v5509_v52  ;;  %v5538_v51 = vld [vmem:[%s9543_s4 + $0x6c8] sm:$0xff]  ;;  %v5481_v52 = vld [vmem:[%s9543_s4 + $0x500] sm:$0xff] }
 0x21f   : > { %2034 = vmatprep.subr.mxu1 %v5444_v53  ;;  %2111 = vmatprep.subr.mxu0 %v5508_v54  ;;  %v5537_v53 = vld [vmem:[%s9543_s4 + $0x6c0] sm:$0xff]  ;;  %v5480_v54 = vld [vmem:[%s9543_s4 + $0x4f8] sm:$0xff] }
 0x220   : > { %2035 = vmatpush1.msra.mxu1 %v5443_v57  ;;  %2112 = vmatpush1.msra.mxu0 %v5507_v58  ;;  %v5479_v57 = vld [vmem:[%s9543_s4 + $0x4f0] sm:$0xff]  ;;  %v5478_v58 = vld [vmem:[%s9543_s4 + $0x4e8] sm:$0xff] }
 0x221   : > { %2036 = vmatprep.subr.mxu1 %v5442_v55  ;;  %2113 = vmatprep.subr.mxu0 %v5506_v30  ;;  %v5477_v55 = vld [vmem:[%s9543_s4 + $0x4e0] sm:$0xff]  ;;  %v5476_v30 = vld [vmem:[%s9543_s4 + $0x4d8] sm:$0xff] }
 0x222   : > { %2037 = vmatpush1.msra.mxu1 %v5441_v56  ;;  %2114 = vmatpush1.msra.mxu0 %v5505_v32  ;;  %v5475_v56 = vld [vmem:[%s9543_s4 + $0x4d0] sm:$0xff] }
 0x223   : > { %2038 = vmatprep.subr.mxu1 %v5504_v60  ;;  %2123 = vmatprep.subr.mxu0 %v5560_v11  ;;  %v6294_v32 = vld [vmem:[%s9544_s5 + $0x2c0] ss:$16 sps:$4 sm:$0xff]   ;;  %v6297_v60 = vld [vmem:[%s9544_s5 + $0x2c8] ss:$16 sps:$4 sm:$0xff]  }
 0x224   : > { %2039 = vmatpush2.msra.mxu1 %v5503_v12  ;;  %2124 = vmatpush2.msra.mxu0 %v5559_v9  ;;  %v6300_v11 = vld [vmem:[%s9544_s5 + $0x2a0] ss:$16 sps:$4 sm:$0xff]   ;;  %v6303_v12 = vld [vmem:[%s9544_s5 + $0x2a8] ss:$16 sps:$4 sm:$0xff]   ;;  %v6308_v9 = vld [vmem:[%s9544_s5 + $0x284] ss:$16 sps:$4 sm:$0xff]  }
 0x225   : > { %2040 = vmatprep.subr.mxu1 %v5502_v10  ;;  %2125 = vmatprep.subr.mxu0 %v5558_v14  ;;  %v6311_v10 = vld [vmem:[%s9544_s5 + $0x28c] ss:$16 sps:$4 sm:$0xff]   ;;  %v6306_v14 = vld [vmem:[%s9544_s5 + $0x280] ss:$16 sps:$4 sm:$0xff]  }
 0x226   : > { %2041 = vmatpush2.msra.mxu1 %v5501_v15  ;;  %2126 = vmatpush2.msra.mxu0 %v5557_v29  ;;  %v6309_v15 = vld [vmem:[%s9544_s5 + $0x288] ss:$16 sps:$4 sm:$0xff]   ;;  %v6314_v29 = vld [vmem:[%s9544_s5 + $0x264] ss:$16 sps:$4 sm:$0xff]  }
 0x227   : > { %2042 = vmatprep.subr.mxu1 %v5500_v6  ;;  %2127 = vmatprep.subr.mxu0 %v5556_v7  ;;  %v6317_v6 = vld [vmem:[%s9544_s5 + $0x26c] ss:$16 sps:$4 sm:$0xff]   ;;  %v6312_v7 = vld [vmem:[%s9544_s5 + $0x260] ss:$16 sps:$4 sm:$0xff]  }
 0x228   : > { %2043 = vmatpush2.msra.mxu1 %v5499_v46  ;;  %2128 = vmatpush2.msra.mxu0 %v5555_v47  ;;  %v6315_v46 = vld [vmem:[%s9544_s5 + $0x268] ss:$16 sps:$4 sm:$0xff]   ;;  %v6320_v47 = vld [vmem:[%s9544_s5 + $0x244] ss:$16 sps:$4 sm:$0xff]  }
 0x229   : > { %2044 = vmatprep.subr.mxu1 %v5498_v48  ;;  %2129 = vmatprep.subr.mxu0 %v5554_v18  ;;  %v6323_v48 = vld [vmem:[%s9544_s5 + $0x24c] ss:$16 sps:$4 sm:$0xff]   ;;  %v6318_v18 = vld [vmem:[%s9544_s5 + $0x240] ss:$16 sps:$4 sm:$0xff]  }
 0x22a   : > { %2045 = vmatpush2.msra.mxu1 %v5497_v19  ;;  %2130 = vmatpush2.msra.mxu0 %v5553_v1  ;;  %v6321_v19 = vld [vmem:[%s9544_s5 + $0x248] ss:$16 sps:$4 sm:$0xff]   ;;  %v6326_v1 = vld [vmem:[%s9544_s5 + $0x224] ss:$16 sps:$4 sm:$0xff]  }
 0x22b   : > { %2046 = vmatprep.subr.mxu1 %v5496_v20  ;;  %2131 = vmatprep.subr.mxu0 %v5552_v2  ;;  %v6329_v20 = vld [vmem:[%s9544_s5 + $0x22c] ss:$16 sps:$4 sm:$0xff]   ;;  %v6324_v2 = vld [vmem:[%s9544_s5 + $0x220] ss:$16 sps:$4 sm:$0xff]  }
 0x22c   : > { %2047 = vmatpush2.msra.mxu1 %v5495_v21  ;;  %2132 = vmatpush2.msra.mxu0 %v5551_v3  ;;  %v6327_v21 = vld [vmem:[%s9544_s5 + $0x228] ss:$16 sps:$4 sm:$0xff]   ;;  %v6332_v3 = vld [vmem:[%s9544_s5 + $0x204] ss:$16 sps:$4 sm:$0xff]  }
 0x22d   : > { %2048 = vmatprep.subr.mxu1 %v5494_v17  ;;  %2133 = vmatprep.subr.mxu0 %v5550_v63  ;;  %v6335_v17 = vld [vmem:[%s9544_s5 + $0x20c] ss:$16 sps:$4 sm:$0xff]   ;;  %v6330_v63 = vld [vmem:[%s9544_s5 + $0x200] ss:$16 sps:$4 sm:$0xff]  }
 0x22e   : > { %2049 = vmatpush2.msra.mxu1 %v5493_v61  ;;  %2134 = vmatpush2.msra.mxu0 %v5549_v62  ;;  %v6333_v61 = vld [vmem:[%s9544_s5 + $0x208] ss:$16 sps:$4 sm:$0xff]   ;;  %v6338_v62 = vld [vmem:[%s9544_s5 + $0x1e4] ss:$16 sps:$4 sm:$0xff]  }
 0x22f   : > { %2050 = vmatprep.subr.mxu1 %v5492_v33  ;;  %2135 = vmatprep.subr.mxu0 %v5548_v22  ;;  %v6341_v33 = vld [vmem:[%s9544_s5 + $0x1ec] ss:$16 sps:$4 sm:$0xff]   ;;  %v6336_v22 = vld [vmem:[%s9544_s5 + $0x1e0] ss:$16 sps:$4 sm:$0xff]  }
 0x230   : > { %2051 = vmatpush2.msra.mxu1 %v5491_v34  ;;  %2136 = vmatpush2.msra.mxu0 %v5547_v0  ;;  %v6339_v34 = vld [vmem:[%s9544_s5 + $0x1e8] ss:$16 sps:$4 sm:$0xff]   ;;  %v6344_v0 = vld [vmem:[%s9544_s5 + $0x3a4] ss:$16 sps:$4 sm:$0xff]  }
 0x231   : > { %2052 = vmatprep.subr.mxu1 %v5490_v16  ;;  %2137 = vmatprep.subr.mxu0 %v5546_v35  ;;  %v6347_v16 = vld [vmem:[%s9544_s5 + $0x3ac] ss:$16 sps:$4 sm:$0xff]   ;;  %v6342_v35 = vld [vmem:[%s9544_s5 + $0x3a0] ss:$16 sps:$4 sm:$0xff]  }
 0x232   : > { %2053 = vmatpush2.msra.mxu1 %v5489_v23  ;;  %2138 = vmatpush2.msra.mxu0 %v5545_v36  ;;  %v6345_v23 = vld [vmem:[%s9544_s5 + $0x3a8] ss:$16 sps:$4 sm:$0xff]   ;;  %v6350_v36 = vld [vmem:[%s9544_s5 + $0x384] ss:$16 sps:$4 sm:$0xff]  }
 0x233   : > { %2054 = vmatprep.subr.mxu1 %v5488_v37  ;;  %2139 = vmatprep.subr.mxu0 %v5544_v24  ;;  %v6353_v37 = vld [vmem:[%s9544_s5 + $0x38c] ss:$16 sps:$4 sm:$0xff]   ;;  %v6348_v24 = vld [vmem:[%s9544_s5 + $0x380] ss:$16 sps:$4 sm:$0xff]  }
 0x234   : > { %2055 = vmatpush2.msra.mxu1 %v5487_v38  ;;  %2140 = vmatpush2.msra.mxu0 %v5543_v39  ;;  %v6351_v38 = vld [vmem:[%s9544_s5 + $0x388] ss:$16 sps:$4 sm:$0xff]   ;;  %v6356_v39 = vld [vmem:[%s9544_s5 + $0x364] ss:$16 sps:$4 sm:$0xff]  }
 0x235   : > { %2056 = vmatprep.subr.mxu1 %v5486_v25  ;;  %2141 = vmatprep.subr.mxu0 %v5542_v40  ;;  %v6359_v25 = vld [vmem:[%s9544_s5 + $0x36c] ss:$16 sps:$4 sm:$0xff]   ;;  %v6354_v40 = vld [vmem:[%s9544_s5 + $0x360] ss:$16 sps:$4 sm:$0xff]  }
 0x236   : > { %2057 = vmatpush2.msra.mxu1 %v5485_v26  ;;  %2142 = vmatpush2.msra.mxu0 %v5541_v41  ;;  %v6357_v26 = vld [vmem:[%s9544_s5 + $0x368] ss:$16 sps:$4 sm:$0xff]   ;;  %v6362_v41 = vld [vmem:[%s9544_s5 + $0x344] ss:$16 sps:$4 sm:$0xff]  }
 0x237   : > { %2058 = vmatprep.subr.mxu1 %v5484_v27  ;;  %2143 = vmatprep.subr.mxu0 %v5540_v28  ;;  %v6365_v27 = vld [vmem:[%s9544_s5 + $0x34c] ss:$16 sps:$4 sm:$0xff]   ;;  %v6360_v28 = vld [vmem:[%s9544_s5 + $0x340] ss:$16 sps:$4 sm:$0xff]  }
 0x238   : > { %2059 = vmatpush2.msra.mxu1 %v5483_v42  ;;  %2144 = vmatpush2.msra.mxu0 %v5539_v43  ;;  %v6363_v42 = vld [vmem:[%s9544_s5 + $0x348] ss:$16 sps:$4 sm:$0xff]   ;;  %v6368_v43 = vld [vmem:[%s9544_s5 + $0x324] ss:$16 sps:$4 sm:$0xff]  }
 0x239   : > { %2060 = vmatprep.subr.mxu1 %v5482_v50  ;;  %2145 = vmatprep.subr.mxu0 %v5538_v51  ;;  %v6371_v50 = vld [vmem:[%s9544_s5 + $0x32c] ss:$16 sps:$4 sm:$0xff]   ;;  %v6366_v51 = vld [vmem:[%s9544_s5 + $0x320] ss:$16 sps:$4 sm:$0xff]  }
 0x23a   : > { %2061 = vmatpush2.msra.mxu1 %v5481_v52  ;;  %2146 = vmatpush2.msra.mxu0 %v5537_v53  ;;  %v6369_v52 = vld [vmem:[%s9544_s5 + $0x328] ss:$16 sps:$4 sm:$0xff]   ;;  %v6374_v53 = vld [vmem:[%s9544_s5 + $0x304] ss:$16 sps:$4 sm:$0xff]  }
 0x23b   : > { %2062 = vmatprep.subr.mxu1 %v5480_v54  ;;  %2148 = vmatmul.mubr.f32.vlgmr.msra.gmra.mxu0 %v7566_v49  ;;  %v5474_v49 = vld [vmem:[%s9543_s4 + $0x4c8] sm:$0xff] }
 0x23c   : > { %2063 = vmatpush2.msra.mxu1 %v5479_v57  ;;  %5562 = vmatprep.mubr.msk.f32.mxu0 %vm1724_vm6, %v7591_v59  ;;  %v5473_v59 = vld [vmem:[%s9543_s4 + $0x4c0] sm:$0xff]  ;;  %v6377_v54 = vld [vmem:[%s9544_s5 + $0x30c] ss:$16 sps:$4 sm:$0xff]  }
 0x23d   : > { %2064 = vmatprep.subr.mxu1 %v5478_v58  ;;  %v6372_v57 = vld [vmem:[%s9544_s5 + $0x300] ss:$16 sps:$4 sm:$0xff]   ;;  %v6375_v58 = vld [vmem:[%s9544_s5 + $0x308] ss:$16 sps:$4 sm:$0xff]  }
 0x23e   : > { %2065 = vmatpush2.msra.mxu1 %v5477_v55  ;;  %v6380_v55 = vld [vmem:[%s9544_s5 + $0x2e4] ss:$16 sps:$4 sm:$0xff]  }
 0x23f   : > { %2066 = vmatprep.subr.mxu1 %v5476_v30  ;;  %2154 = vmatmul.mubr.f32.gmra.mxu0 %v7601_v5  ;;  %v6296_v5 = vld [vmem:[%s9544_s5 + $0x2c4] ss:$16 sps:$4 sm:$0xff]   ;;  %v6378_v30 = vld [vmem:[%s9544_s5 + $0x2e0] ss:$16 sps:$4 sm:$0xff]  }
 0x240   : > { %2067 = vmatpush2.msra.mxu1 %v5475_v56  ;;  %2608 = vmatprep.subr.bf16.mxu0 %v6296_v5  ;;  %v6381_v56 = vld [vmem:[%s9544_s5 + $0x2e8] ss:$16 sps:$4 sm:$0xff]  }
 0x241   : > { %2068 = vmatprep.subr.mxu1 %v5474_v49  ;;  %2609 = vmatpush1.bf16.msra.mxu0 %v6294_v32  ;;  %v6383_v49 = vld [vmem:[%s9544_s5 + $0x2ec] ss:$16 sps:$4 sm:$0xff]  }
 0x242   : > { %2069 = vmatpush2.msra.mxu1 %v5473_v59  ;;  %v6386_v59 = vld [vmem:[%s9544_s5 + $0xe4] ss:$16 sps:$4 sm:$0xff]   ;;  %v6389_v32 = vld [vmem:[%s9544_s5 + $0xec] ss:$16 sps:$4 sm:$0xff]  }
 0x243   : > { %2071 = vmatmul.mubr.f32.vlgmr.msra.gmra.mxu1 %v7564_v44  ;;  %v6299_v44 = vld [vmem:[%s9544_s5 + $0x2cc] ss:$16 sps:$4 sm:$0xff]  }
 0x244   : > { %2076 = vmatprep.mubr.f32.mxu1 %v7589_v31  ;;  %v6302_v31 = vld [vmem:[%s9544_s5 + $0x2a4] ss:$16 sps:$4 sm:$0xff]   ;;  %2649 = vmatprep.subr.bf16.mxu1 %v6299_v44 }
 0x245   : > { %2650 = vmatpush1.bf16.msra.mxu1 %v6297_v60  ;;  %2610 = vmatprep.subr.bf16.mxu0 %v6302_v31 }
 0x246   : > { %2611 = vmatpush1.bf16.msra.mxu0 %v6300_v11 }
 0x247   : > { %2077 = vmatmul.mubr.f32.gmra.mxu1 %v7599_v4  ;;  %v6305_v4 = vld [vmem:[%s9544_s5 + $0x2ac] ss:$16 sps:$4 sm:$0xff]   ;;  %2612 = vmatprep.subr.bf16.mxu0 %v6308_v9 }
 0x248   : > { %2651 = vmatprep.subr.bf16.mxu1 %v6305_v4 }
 0x249   : > { %2652 = vmatpush1.bf16.msra.mxu1 %v6303_v12 }
 0x24a   : > { %2653 = vmatprep.subr.bf16.mxu1 %v6311_v10  ;;  %2613 = vmatpush1.bf16.msra.mxu0 %v6306_v14 }
 0x24b   : > { %2614 = vmatprep.subr.bf16.mxu0 %v6314_v29 }
 0x24d   : > { %2654 = vmatpush1.bf16.msra.mxu1 %v6309_v15 }
 0x24e   : > { %2655 = vmatprep.subr.bf16.mxu1 %v6317_v6  ;;  %2615 = vmatpush1.bf16.msra.mxu0 %v6312_v7 }
 0x24f   : > { %2616 = vmatprep.subr.bf16.mxu0 %v6320_v47 }
 0x251   : > { %2656 = vmatpush1.bf16.msra.mxu1 %v6315_v46 }
 0x252   : > { %2657 = vmatprep.subr.bf16.mxu1 %v6323_v48  ;;  %2617 = vmatpush1.bf16.msra.mxu0 %v6318_v18 }
 0x253   : > { %2618 = vmatprep.subr.bf16.mxu0 %v6326_v1 }
 0x255   : > { %2658 = vmatpush1.bf16.msra.mxu1 %v6321_v19 }
 0x256   : > { %2659 = vmatprep.subr.bf16.mxu1 %v6329_v20  ;;  %2619 = vmatpush1.bf16.msra.mxu0 %v6324_v2 }
 0x257   : > { %2620 = vmatprep.subr.bf16.mxu0 %v6332_v3 }
 0x259   : > { %2660 = vmatpush1.bf16.msra.mxu1 %v6327_v21 }
 0x25a   : > { %2661 = vmatprep.subr.bf16.mxu1 %v6335_v17  ;;  %2621 = vmatpush1.bf16.msra.mxu0 %v6330_v63 }
 0x25b   : > { %2622 = vmatprep.subr.bf16.mxu0 %v6338_v62 }
 0x25d   : > { %2662 = vmatpush1.bf16.msra.mxu1 %v6333_v61 }
 0x25e   : > { %2663 = vmatprep.subr.bf16.mxu1 %v6341_v33  ;;  %2623 = vmatpush1.bf16.msra.mxu0 %v6336_v22 }
 0x25f   : > { %2626 = vmatprep.subr.bf16.mxu0 %v6344_v0 }
 0x261   : > { %2664 = vmatpush1.bf16.msra.mxu1 %v6339_v34 }
 0x262   : > { %2667 = vmatprep.subr.bf16.mxu1 %v6347_v16  ;;  %2627 = vmatpush2.bf16.msra.mxu0 %v6342_v35 }
 0x263   : > { %2628 = vmatprep.subr.bf16.mxu0 %v6350_v36 }
 0x265   : > { %2668 = vmatpush2.bf16.msra.mxu1 %v6345_v23 }
 0x266   : > { %2669 = vmatprep.subr.bf16.mxu1 %v6353_v37  ;;  %2629 = vmatpush2.bf16.msra.mxu0 %v6348_v24 }
 0x267   : > { %2630 = vmatprep.subr.bf16.mxu0 %v6356_v39 }
 0x269   : > { %2670 = vmatpush2.bf16.msra.mxu1 %v6351_v38 }
 0x26a   : > { %2671 = vmatprep.subr.bf16.mxu1 %v6359_v25  ;;  %2631 = vmatpush2.bf16.msra.mxu0 %v6354_v40 }
 0x26b   : > { %2632 = vmatprep.subr.bf16.mxu0 %v6362_v41  ;;  %v6387_v41 = vld [vmem:[%s9544_s5 + $0xe8] ss:$16 sps:$4 sm:$0xff]  }
 0x26d   : > { %2672 = vmatpush2.bf16.msra.mxu1 %v6357_v26  ;;  %v6384_v26 = vld [vmem:[%s9544_s5 + $0xe0] ss:$16 sps:$4 sm:$0xff]  }
 0x26e   : > { %2673 = vmatprep.subr.bf16.mxu1 %v6365_v27  ;;  %2633 = vmatpush2.bf16.msra.mxu0 %v6360_v28 }
 0x26f   : > { %2634 = vmatprep.subr.bf16.mxu0 %v6368_v43  ;;  %v6395_v43 = vld [vmem:[%s9544_s5 + $0xcc] ss:$16 sps:$4 sm:$0xff]  }
 0x271   : > { %2674 = vmatpush2.bf16.msra.mxu1 %v6363_v42  ;;  %v6392_v42 = vld [vmem:[%s9544_s5 + $0xc4] ss:$16 sps:$4 sm:$0xff]  }
 0x272   : > { %2675 = vmatprep.subr.bf16.mxu1 %v6371_v50  ;;  %2635 = vmatpush2.bf16.msra.mxu0 %v6366_v51  ;;  %v6390_v51 = vld [vmem:[%s9544_s5 + $0xc0] ss:$16 sps:$4 sm:$0xff]  }
 0x273   : > { %2636 = vmatprep.subr.bf16.mxu0 %v6374_v53  ;;  %v6398_v53 = vld [vmem:[%s9544_s5 + $0xa4] ss:$16 sps:$4 sm:$0xff]  }
 0x275   : > { %2676 = vmatpush2.bf16.msra.mxu1 %v6369_v52  ;;  %v6393_v52 = vld [vmem:[%s9544_s5 + $0xc8] ss:$16 sps:$4 sm:$0xff]  }
 0x276   : > { %2677 = vmatprep.subr.bf16.mxu1 %v6377_v54  ;;  %2637 = vmatpush2.bf16.msra.mxu0 %v6372_v57  ;;  %v6401_v54 = vld [vmem:[%s9544_s5 + $0xac] ss:$16 sps:$4 sm:$0xff]   ;;  %v6396_v57 = vld [vmem:[%s9544_s5 + $0xa0] ss:$16 sps:$4 sm:$0xff]  }
 0x277   : > { %2638 = vmatprep.subr.bf16.mxu0 %v6380_v55  ;;  %v6404_v55 = vld [vmem:[%s9544_s5 + $0x84] ss:$16 sps:$4 sm:$0xff]  }
 0x279   : > { %2678 = vmatpush2.bf16.msra.mxu1 %v6375_v58  ;;  %v6399_v58 = vld [vmem:[%s9544_s5 + $0xa8] ss:$16 sps:$4 sm:$0xff]  }
 0x27a   : > { %2679 = vmatprep.subr.bf16.mxu1 %v6383_v49  ;;  %2639 = vmatpush2.bf16.msra.mxu0 %v6378_v30  ;;  %v6407_v30 = vld [vmem:[%s9544_s5 + $0x8c] ss:$16 sps:$4 sm:$0xff]   ;;  %v6405_v49 = vld [vmem:[%s9544_s5 + $0x88] ss:$16 sps:$4 sm:$0xff]  }
 0x27b   : > { %2993 = vmatprep.subr.bf16.mxu0 %v6386_v59  ;;  %v6410_v59 = vld [vmem:[%s9544_s5 + $0x64] ss:$16 sps:$4 sm:$0xff]  }
 0x27d   : > { %2680 = vmatpush2.bf16.msra.mxu1 %v6381_v56  ;;  %v6402_v56 = vld [vmem:[%s9544_s5 + $0x80] ss:$16 sps:$4 sm:$0xff]  }
 0x27e   : > { %3034 = vmatprep.subr.bf16.mxu1 %v6389_v32  ;;  %v6413_v32 = vld [vmem:[%s9544_s5 + $0x6c] ss:$16 sps:$4 sm:$0xff]  }
 0x2c0   : > { %v1797_v5 = vpop.f32.mrf.mxu0  ;;  %v1874_v44 = vpop.f32.mrf.mxu1 }
 0x2c1   : > { %v1875_v47 = vadd.f32 %v1874_v44, %v1797_v5  ;;  %v6408_v5 = vld [vmem:[%s9544_s5 + $0x60] ss:$16 sps:$4 sm:$0xff]   ;;  %v6416_v44 = vld [vmem:[%s9544_s5 + $0x44] ss:$16 sps:$4 sm:$0xff]  }
 0x2c2   : > { %v1799_v60 = vpop.f32.mrf.mxu0  ;;  %v1876_v4 = vpop.f32.mrf.mxu1 }
 0x2c3   : > { %v1877_v1 = vadd.f32 %v1876_v4, %v1799_v60  ;;  %v6411_v60 = vld [vmem:[%s9544_s5 + $0x68] ss:$16 sps:$4 sm:$0xff]   ;;  %v6414_v4 = vld [vmem:[%s9544_s5 + $0x40] ss:$16 sps:$4 sm:$0xff]  }
 0x2c6   : > { %v1803_v31 = vpop.f32.mrf.mxu0  ;;  %v1880_v12 = vpop.f32.mrf.mxu1 }
 0x2c7   : > { %v1881_v48 = vadd.f32 %v1880_v12, %v1803_v31  ;;  %v6419_v31 = vld [vmem:[%s9544_s5 + $0x4c] ss:$16 sps:$4 sm:$0xff]   ;;  %v6422_v12 = vld [vmem:[%s9544_s5 + $0x24] ss:$16 sps:$4 sm:$0xff]  }
 0x2c8   : > { %v1805_v11 = vpop.f32.mrf.mxu0  ;;  %v1882_v10 = vpop.f32.mrf.mxu1 }
 0x2c9   : > { %v1883_v21 = vadd.f32 %v1882_v10, %v1805_v11  ;;  %v6417_v11 = vld [vmem:[%s9544_s5 + $0x48] ss:$16 sps:$4 sm:$0xff]   ;;  %v6420_v10 = vld [vmem:[%s9544_s5 + $0x20] ss:$16 sps:$4 sm:$0xff]  }
 0x2fb   : > { %v2149_v9 = vpop.f32.mrf.mxu0 }
 0x2fd   : > { %v2151_v14 = vpop.f32.mrf.mxu0 }
 0x2ff   : > { %v2155_v29 = vpop.f32.mrf.mxu0 }
 0x301   : > { %v2157_v20 = vpop.f32.mrf.mxu0 }
 0x303   : > { %v2072_v15 = vpop.f32.mrf.mxu1 }
 0x304   : > { %v2150_v7 = vadd.f32 %v2149_v9, %v2072_v15  ;;  %v6425_v9 = vld [vmem:[%s9544_s5 + $0x2c] ss:$16 sps:$4 sm:$0xff]   ;;  %v6428_v15 = vld [vmem:[%s9544_s5 + $0x4] ss:$16 sps:$4 sm:$0xff]  }
 0x305   : > { %v2074_v6 = vpop.f32.mrf.mxu1 }
 0x306   : > { %v2152_v18 = vadd.f32 %v2151_v14, %v2074_v6  ;;  %v8132_v3 = vmax.f32 %v1875_v47, %v2150_v7  ;;  %v6423_v14 = vld [vmem:[%s9544_s5 + $0x28] ss:$16 sps:$4 sm:$0xff]   ;;  %v6426_v6 = vld [vmem:[%s9544_s5] ss:$16 sps:$4 sm:$0xff]   ;;  %v6437_v47 = vld [vmem:[%s9544_s5 + $0x1cc] ss:$16 sps:$4 sm:$0xff]  }
 0x307   : > { %v2078_v46 = vpop.f32.mrf.mxu1  ;;  %v6429_v7 = vld [vmem:[%s9544_s5 + $0x8] ss:$16 sps:$4 sm:$0xff]  }
 0x308   : > { %v2156_v19 = vadd.f32 %v2155_v29, %v2078_v46  ;;  %v2161_v61 = vmax.f32 %v1877_v1, %v2152_v18  ;;  %v6431_v29 = vld [vmem:[%s9544_s5 + $0xc] ss:$16 sps:$4 sm:$0xff]   ;;  %v6434_v46 = vld [vmem:[%s9544_s5 + $0x1c4] ss:$16 sps:$4 sm:$0xff]   ;;  %v6435_v18 = vld [vmem:[%s9544_s5 + $0x1c8] ss:$16 sps:$4 sm:$0xff]  }
 0x309   : > { %v2080_v2 = vpop.f32.mrf.mxu1  ;;  %v6443_v1 = vld [vmem:[%s9544_s5 + $0x1ac] ss:$16 sps:$4 sm:$0xff]  }
 0x30a   : > { %v2162_v17 = vmax.f32 %v1881_v48, %v2156_v19  ;;  %v2158_v63 = vadd.f32 %v2157_v20, %v2080_v2  ;;  %v2225_v50 = vpack.c.bf16 %v2161_v61, %v2161_v61  ;;  %v6432_v48 = vld [vmem:[%s9544_s5 + $0x1c0] ss:$16 sps:$4 sm:$0xff]   ;;  %v6440_v19 = vld [vmem:[%s9544_s5 + $0x1a4] ss:$16 sps:$4 sm:$0xff]   ;;  %v6441_v2 = vld [vmem:[%s9544_s5 + $0x1a8] ss:$16 sps:$4 sm:$0xff]  }
 0x30b   : > { %v6438_v20 = vld [vmem:[%s9544_s5 + $0x1a0] ss:$16 sps:$4 sm:$0xff]  }
 0x30c   : > { %v8135_v62 = vpack.c.bf16 %v2162_v17, %v8132_v3  ;;  %v2163_v33 = vmax.f32 %v1883_v21, %v2158_v63  ;;  %v6446_v21 = vld [vmem:[%s9544_s5 + $0x184] ss:$16 sps:$4 sm:$0xff]   ;;  %v6449_v17 = vld [vmem:[%s9544_s5 + $0x18c] ss:$16 sps:$4 sm:$0xff]   ;;  %v6444_v63 = vld [vmem:[%s9544_s5 + $0x180] ss:$16 sps:$4 sm:$0xff]  }
 0x30e   : > { %v2290_v22 = vshrl.u32 %v8135_v62, 16  ;;  %v2292_v34 = vshll.u32 %v8135_v62, 16  ;;  %v8139_v0 = vpack.c.bf16 %v2163_v33, %v2161_v61  ;;  %v6447_v61 = vld [vmem:[%s9544_s5 + $0x188] ss:$16 sps:$4 sm:$0xff]   ;;  %v6452_v33 = vld [vmem:[%s9544_s5 + $0x164] ss:$16 sps:$4 sm:$0xff]  }
 0x310   : > { %v2297_v16 = vshrl.u32 %v8139_v0, 16  ;;  %v2299_v35 = vshll.u32 %v8139_v0, 16  ;;  %v2294_v23 = vrot.slane %v2292_v34, 1  ;;  %v3591_v36 = vrot.slane %v2290_v22, 1 }
 0x311   : > { %v3592_v37 = vrot.slane %v2292_v34, 2  ;;  %v6450_v34 = vld [vmem:[%s9544_s5 + $0x160] ss:$16 sps:$4 sm:$0xff]  }
 0x312   : > { %v2301_v24 = vrot.slane %v2299_v35, 1  ;;  %v3594_v38 = vrot.slane %v2297_v16, 1  ;;  %v3595_v39 = vrot.slane %v2299_v35, 2  ;;  %v2295_v28 = vor.u32 %v2294_v23, %v2290_v22  ;;  %v6455_v22 = vld [vmem:[%s9544_s5 + $0x16c] ss:$16 sps:$4 sm:$0xff]  }
 0x313   : > { %v8143_v25 = vor.u32 %v3592_v37, %v3591_v36  ;;  %v6458_v35 = vld [vmem:[%s9544_s5 + $0x144] ss:$16 sps:$4 sm:$0xff]   ;;  %v6461_v23 = vld [vmem:[%s9544_s5 + $0x14c] ss:$16 sps:$4 sm:$0xff]   ;;  %v6456_v36 = vld [vmem:[%s9544_s5 + $0x140] ss:$16 sps:$4 sm:$0xff]  }
 0x314   : > { %v2302_v40 = vor.u32 %v2301_v24, %v2297_v16  ;;  %v8151_v27 = vor.u32 %v3595_v39, %v3594_v38  ;;  %v6453_v16 = vld [vmem:[%s9544_s5 + $0x168] ss:$16 sps:$4 sm:$0xff]   ;;  %v6464_v24 = vld [vmem:[%s9544_s5 + $0x124] ss:$16 sps:$4 sm:$0xff]   ;;  %v6467_v38 = vld [vmem:[%s9544_s5 + $0x12c] ss:$16 sps:$4 sm:$0xff]  }
 0x315   : > { %v6459_v37 = vld [vmem:[%s9544_s5 + $0x148] ss:$16 sps:$4 sm:$0xff]   ;;  %v6462_v39 = vld [vmem:[%s9544_s5 + $0x120] ss:$16 sps:$4 sm:$0xff]  }
 0x316   : > { %5683 = vmatprep.mubr.msk.bf16.mxu0 %vm2604_vm7, %v2302_v40  ;;  %5684 = vmatprep.mubr.msk.bf16.mxu1 %vm2604_vm7, %v2302_v40  ;;  %v6465_v40 = vld [vmem:[%s9544_s5 + $0x128] ss:$16 sps:$4 sm:$0xff]  }
 0x317   : > { %2641 = vmatmul.mubr.bf16.vlgmr.msra.gmra.mxu0 %v2295_v28  ;;  %2682 = vmatmul.mubr.bf16.vlgmr.msra.gmra.mxu1 %v2295_v28  ;;  %v6468_v28 = vld [vmem:[%s9544_s5 + $0x100] ss:$16 sps:$4 sm:$0xff]  }
 0x318   : > { %2994 = vmatpush1.bf16.msra.mxu0 %v6384_v26  ;;  %3035 = vmatpush1.bf16.msra.mxu1 %v6387_v41  ;;  %v6470_v26 = vld [vmem:[%s9544_s5 + $0x104] ss:$16 sps:$4 sm:$0xff]   ;;  %v6473_v41 = vld [vmem:[%s9544_s5 + $0x10c] ss:$16 sps:$4 sm:$0xff]  }
 0x319   : > { %5745 = vmatprep.mubr.msk.bf16.mxu0 %vm2604_vm7, %v2225_v50  ;;  %5746 = vmatprep.mubr.msk.bf16.mxu1 %vm2604_vm7, %v2225_v50  ;;  %v6479_v50 = vld [vmem:[%s9544_s5 + $0x4ac] ss:$16 sps:$4 sm:$0xff]  }
 0x31a   : > { %2995 = vmatprep.subr.bf16.mxu0 %v6392_v42  ;;  %3036 = vmatprep.subr.bf16.mxu1 %v6395_v43  ;;  %v6471_v42 = vld [vmem:[%s9544_s5 + $0x108] ss:$16 sps:$4 sm:$0xff]   ;;  %v6476_v43 = vld [vmem:[%s9544_s5 + $0x4a4] ss:$16 sps:$4 sm:$0xff]  }
 0x31c   : > { %2996 = vmatpush1.bf16.msra.mxu0 %v6390_v51  ;;  %3037 = vmatpush1.bf16.msra.mxu1 %v6393_v52  ;;  %v6474_v51 = vld [vmem:[%s9544_s5 + $0x4a0] ss:$16 sps:$4 sm:$0xff]   ;;  %v2224_v52 = vpack.c.bf16 %v8132_v3, %v8132_v3 }
 0x31d   : > { %2997 = vmatprep.subr.bf16.mxu0 %v6398_v53  ;;  %3038 = vmatprep.subr.bf16.mxu1 %v6401_v54  ;;  %v6477_v53 = vld [vmem:[%s9544_s5 + $0x4a8] ss:$16 sps:$4 sm:$0xff]   ;;  %v3139_v54 = vrot.slane %v8139_v0, 1  ;;  %v6480_v3 = vld [vmem:[%s9544_s5 + $0x480] ss:$16 sps:$4 sm:$0xff]  }
 0x320   : > { %2998 = vmatpush1.bf16.msra.mxu0 %v6396_v57  ;;  %3039 = vmatpush1.bf16.msra.mxu1 %v6399_v58  ;;  %v6482_v57 = vld [vmem:[%s9544_s5 + $0x484] ss:$16 sps:$4 sm:$0xff]   ;;  %v6485_v58 = vld [vmem:[%s9544_s5 + $0x48c] ss:$16 sps:$4 sm:$0xff]  }
 0x321   : > { %2999 = vmatprep.subr.bf16.mxu0 %v6404_v55  ;;  %3040 = vmatprep.subr.bf16.mxu1 %v6407_v30  ;;  %v6483_v55 = vld [vmem:[%s9544_s5 + $0x488] ss:$16 sps:$4 sm:$0xff]   ;;  %v6488_v30 = vld [vmem:[%s9544_s5 + $0x464] ss:$16 sps:$4 sm:$0xff]  }
 0x324   : > { %3000 = vmatpush1.bf16.msra.mxu0 %v6402_v56  ;;  %3041 = vmatpush1.bf16.msra.mxu1 %v6405_v49  ;;  %v6491_v56 = vld [vmem:[%s9544_s5 + $0x46c] ss:$16 sps:$4 sm:$0xff]   ;;  %v6486_v49 = vld [vmem:[%s9544_s5 + $0x460] ss:$16 sps:$4 sm:$0xff]  }
 0x325   : > { %3001 = vmatprep.subr.bf16.mxu0 %v6410_v59  ;;  %3042 = vmatprep.subr.bf16.mxu1 %v6413_v32  ;;  %v6489_v59 = vld [vmem:[%s9544_s5 + $0x468] ss:$16 sps:$4 sm:$0xff]   ;;  %v6494_v32 = vld [vmem:[%s9544_s5 + $0x444] ss:$16 sps:$4 sm:$0xff]  }
 0x328   : > { %3002 = vmatpush1.bf16.msra.mxu0 %v6408_v5  ;;  %3043 = vmatpush1.bf16.msra.mxu1 %v6411_v60  ;;  %v6497_v5 = vld [vmem:[%s9544_s5 + $0x44c] ss:$16 sps:$4 sm:$0xff]   ;;  %v6492_v60 = vld [vmem:[%s9544_s5 + $0x440] ss:$16 sps:$4 sm:$0xff]  }
 0x329   : > { %3003 = vmatprep.subr.bf16.mxu0 %v6416_v44  ;;  %3044 = vmatprep.subr.bf16.mxu1 %v6419_v31  ;;  %v6495_v44 = vld [vmem:[%s9544_s5 + $0x448] ss:$16 sps:$4 sm:$0xff]   ;;  %v6500_v31 = vld [vmem:[%s9544_s5 + $0x424] ss:$16 sps:$4 sm:$0xff]  }
 0x32c   : > { %3004 = vmatpush1.bf16.msra.mxu0 %v6414_v4  ;;  %3045 = vmatpush1.bf16.msra.mxu1 %v6417_v11  ;;  %v6503_v4 = vld [vmem:[%s9544_s5 + $0x42c] ss:$16 sps:$4 sm:$0xff]   ;;  %v6498_v11 = vld [vmem:[%s9544_s5 + $0x420] ss:$16 sps:$4 sm:$0xff]  }
 0x32d   : > { %3005 = vmatprep.subr.bf16.mxu0 %v6422_v12  ;;  %3046 = vmatprep.subr.bf16.mxu1 %v6425_v9  ;;  %v6501_v12 = vld [vmem:[%s9544_s5 + $0x428] ss:$16 sps:$4 sm:$0xff]   ;;  %v6506_v9 = vld [vmem:[%s9544_s5 + $0x404] ss:$16 sps:$4 sm:$0xff]  }
 0x330   : > { %3006 = vmatpush1.bf16.msra.mxu0 %v6420_v10  ;;  %3047 = vmatpush1.bf16.msra.mxu1 %v6423_v14  ;;  %v6509_v10 = vld [vmem:[%s9544_s5 + $0x40c] ss:$16 sps:$4 sm:$0xff]   ;;  %v6504_v14 = vld [vmem:[%s9544_s5 + $0x400] ss:$16 sps:$4 sm:$0xff]  }
 0x331   : > { %3007 = vmatprep.subr.bf16.mxu0 %v6428_v15  ;;  %3048 = vmatprep.subr.bf16.mxu1 %v6431_v29  ;;  %v6507_v15 = vld [vmem:[%s9544_s5 + $0x408] ss:$16 sps:$4 sm:$0xff]   ;;  %v6512_v29 = vld [vmem:[%s9544_s5 + $0x3e4] ss:$16 sps:$4 sm:$0xff]  }
 0x334   : > { %3008 = vmatpush1.bf16.msra.mxu0 %v6426_v6  ;;  %3049 = vmatpush1.bf16.msra.mxu1 %v6429_v7  ;;  %v6515_v6 = vld [vmem:[%s9544_s5 + $0x3ec] ss:$16 sps:$4 sm:$0xff]   ;;  %v6510_v7 = vld [vmem:[%s9544_s5 + $0x3e0] ss:$16 sps:$4 sm:$0xff]  }
 0x335   : > { %3011 = vmatprep.subr.bf16.mxu0 %v6434_v46  ;;  %3052 = vmatprep.subr.bf16.mxu1 %v6437_v47  ;;  %v6513_v46 = vld [vmem:[%s9544_s5 + $0x3e8] ss:$16 sps:$4 sm:$0xff]   ;;  %v6518_v47 = vld [vmem:[%s9544_s5 + $0x3c4] ss:$16 sps:$4 sm:$0xff]  }
 0x338   : > { %3012 = vmatpush2.bf16.msra.mxu0 %v6432_v48  ;;  %3053 = vmatpush2.bf16.msra.mxu1 %v6435_v18  ;;  %v6521_v48 = vld [vmem:[%s9544_s5 + $0x3cc] ss:$16 sps:$4 sm:$0xff]   ;;  %v6516_v18 = vld [vmem:[%s9544_s5 + $0x3c0] ss:$16 sps:$4 sm:$0xff]  }
 0x339   : > { %3013 = vmatprep.subr.bf16.mxu0 %v6440_v19  ;;  %3054 = vmatprep.subr.bf16.mxu1 %v6443_v1  ;;  %v6519_v19 = vld [vmem:[%s9544_s5 + $0x3c8] ss:$16 sps:$4 sm:$0xff]   ;;  %v6524_v1 = vld [vmem:[%s9544_s5 + $0x584] ss:$16 sps:$4 sm:$0xff]  }
 0x33c   : > { %3014 = vmatpush2.bf16.msra.mxu0 %v6438_v20  ;;  %3055 = vmatpush2.bf16.msra.mxu1 %v6441_v2  ;;  %v6527_v20 = vld [vmem:[%s9544_s5 + $0x58c] ss:$16 sps:$4 sm:$0xff]   ;;  %v6522_v2 = vld [vmem:[%s9544_s5 + $0x580] ss:$16 sps:$4 sm:$0xff]  }
 0x33d   : > { %3015 = vmatprep.subr.bf16.mxu0 %v6446_v21  ;;  %3056 = vmatprep.subr.bf16.mxu1 %v6449_v17  ;;  %v6525_v21 = vld [vmem:[%s9544_s5 + $0x588] ss:$16 sps:$4 sm:$0xff]   ;;  %v6530_v17 = vld [vmem:[%s9544_s5 + $0x564] ss:$16 sps:$4 sm:$0xff]  }
 0x340   : > { %3016 = vmatpush2.bf16.msra.mxu0 %v6444_v63  ;;  %3057 = vmatpush2.bf16.msra.mxu1 %v6447_v61  ;;  %v6533_v63 = vld [vmem:[%s9544_s5 + $0x56c] ss:$16 sps:$4 sm:$0xff]   ;;  %v6528_v61 = vld [vmem:[%s9544_s5 + $0x560] ss:$16 sps:$4 sm:$0xff]  }
 0x341   : > { %3017 = vmatprep.subr.bf16.mxu0 %v6452_v33  ;;  %3058 = vmatprep.subr.bf16.mxu1 %v6455_v22  ;;  %v6531_v33 = vld [vmem:[%s9544_s5 + $0x568] ss:$16 sps:$4 sm:$0xff]   ;;  %v6536_v22 = vld [vmem:[%s9544_s5 + $0x544] ss:$16 sps:$4 sm:$0xff]  }
 0x344   : > { %3018 = vmatpush2.bf16.msra.mxu0 %v6450_v34  ;;  %3059 = vmatpush2.bf16.msra.mxu1 %v6453_v16  ;;  %v6539_v34 = vld [vmem:[%s9544_s5 + $0x54c] ss:$16 sps:$4 sm:$0xff]   ;;  %v6534_v16 = vld [vmem:[%s9544_s5 + $0x540] ss:$16 sps:$4 sm:$0xff]  }
 0x345   : > { %3019 = vmatprep.subr.bf16.mxu0 %v6458_v35  ;;  %3060 = vmatprep.subr.bf16.mxu1 %v6461_v23  ;;  %v6537_v35 = vld [vmem:[%s9544_s5 + $0x548] ss:$16 sps:$4 sm:$0xff]   ;;  %v6542_v23 = vld [vmem:[%s9544_s5 + $0x524] ss:$16 sps:$4 sm:$0xff]  }
 0x348   : > { %3020 = vmatpush2.bf16.msra.mxu0 %v6456_v36  ;;  %3061 = vmatpush2.bf16.msra.mxu1 %v6459_v37  ;;  %v6545_v36 = vld [vmem:[%s9544_s5 + $0x52c] ss:$16 sps:$4 sm:$0xff]   ;;  %v6540_v37 = vld [vmem:[%s9544_s5 + $0x520] ss:$16 sps:$4 sm:$0xff]  }
 0x349   : > { %3021 = vmatprep.subr.bf16.mxu0 %v6464_v24  ;;  %3062 = vmatprep.subr.bf16.mxu1 %v6467_v38  ;;  %v6543_v24 = vld [vmem:[%s9544_s5 + $0x528] ss:$16 sps:$4 sm:$0xff]   ;;  %v6548_v38 = vld [vmem:[%s9544_s5 + $0x504] ss:$16 sps:$4 sm:$0xff]  }
 0x34c   : > { %3022 = vmatpush2.bf16.msra.mxu0 %v6462_v39  ;;  %3063 = vmatpush2.bf16.msra.mxu1 %v6465_v40  ;;  %v6551_v39 = vld [vmem:[%s9544_s5 + $0x50c] ss:$16 sps:$4 sm:$0xff]   ;;  %v6546_v40 = vld [vmem:[%s9544_s5 + $0x500] ss:$16 sps:$4 sm:$0xff]  }
 0x34d   : > { %3023 = vmatprep.subr.bf16.mxu0 %v6470_v26  ;;  %3064 = vmatprep.subr.bf16.mxu1 %v6473_v41  ;;  %v6549_v26 = vld [vmem:[%s9544_s5 + $0x508] ss:$16 sps:$4 sm:$0xff]   ;;  %v6554_v41 = vld [vmem:[%s9544_s5 + $0x4e4] ss:$16 sps:$4 sm:$0xff]  }
 0x350   : > { %3024 = vmatpush2.bf16.msra.mxu0 %v6468_v28  ;;  %3065 = vmatpush2.bf16.msra.mxu1 %v6471_v42  ;;  %v6557_v28 = vld [vmem:[%s9544_s5 + $0x4ec] ss:$16 sps:$4 sm:$0xff]   ;;  %v6552_v42 = vld [vmem:[%s9544_s5 + $0x4e0] ss:$16 sps:$4 sm:$0xff]  }
 0x351   : > { %3444 = vmatprep.subr.bf16.mxu0 %v6476_v43  ;;  %3485 = vmatprep.subr.bf16.mxu1 %v6479_v50  ;;  %v6555_v43 = vld [vmem:[%s9544_s5 + $0x4e8] ss:$16 sps:$4 sm:$0xff]   ;;  %v6560_v50 = vld [vmem:[%s9544_s5 + $0x4c4] ss:$16 sps:$4 sm:$0xff]  }
 0x353   : > { %3026 = vmatmul.mubr.bf16.vlgmr.msra.gmra.mxu0 %v2224_v52  ;;  %3067 = vmatmul.mubr.bf16.vlgmr.msra.gmra.mxu1 %v2224_v52  ;;  %v6558_v52 = vld [vmem:[%s9544_s5 + $0x4c0] ss:$16 sps:$4 sm:$0xff]  }
 0x354   : > { %3445 = vmatpush1.bf16.msra.mxu0 %v6474_v51  ;;  %5867 = vmatprep.mubr.msk.bf16.mxu0 %vm2604_vm7, %v3139_v54  ;;  %v6563_v51 = vld [vmem:[%s9544_s5 + $0x4cc] ss:$16 sps:$4 sm:$0xff]  }
 0x355   : > { %3486 = vmatpush1.bf16.msra.mxu1 %v6477_v53  ;;  %5868 = vmatprep.mubr.msk.bf16.mxu1 %vm2604_vm7, %v3139_v54  ;;  %v6561_v53 = vld [vmem:[%s9544_s5 + $0x4c8] ss:$16 sps:$4 sm:$0xff]   ;;  %v6566_v54 = vld [vmem:[%s9544_s5 + $0x684] ss:$16 sps:$4 sm:$0xff]  }
 0x356   : > { %3446 = vmatprep.subr.bf16.mxu0 %v6482_v57  ;;  %3487 = vmatprep.subr.bf16.mxu1 %v6485_v58  ;;  %v6569_v57 = vld [vmem:[%s9544_s5 + $0x68c] ss:$16 sps:$4 sm:$0xff]   ;;  %v6564_v58 = vld [vmem:[%s9544_s5 + $0x680] ss:$16 sps:$4 sm:$0xff]  }
 0x358   : > { %3447 = vmatpush1.bf16.msra.mxu0 %v6480_v3  ;;  %v3138_v3 = vrot.slane %v8135_v62, 1 }
 0x359   : > { %3488 = vmatpush1.bf16.msra.mxu1 %v6483_v55  ;;  %3448 = vmatprep.subr.bf16.mxu0 %v6488_v30  ;;  %v6567_v55 = vld [vmem:[%s9544_s5 + $0x688] ss:$16 sps:$4 sm:$0xff]   ;;  %v6572_v30 = vld [vmem:[%s9544_s5 + $0x664] ss:$16 sps:$4 sm:$0xff]  }
 0x35a   : > { %3489 = vmatprep.subr.bf16.mxu1 %v6491_v56  ;;  %v6575_v56 = vld [vmem:[%s9544_s5 + $0x66c] ss:$16 sps:$4 sm:$0xff]  }
 0x35c   : > { %3449 = vmatpush1.bf16.msra.mxu0 %v6486_v49  ;;  %v6570_v49 = vld [vmem:[%s9544_s5 + $0x660] ss:$16 sps:$4 sm:$0xff]  }
 0x35d   : > { %3490 = vmatpush1.bf16.msra.mxu1 %v6489_v59  ;;  %3450 = vmatprep.subr.bf16.mxu0 %v6494_v32  ;;  %v6573_v59 = vld [vmem:[%s9544_s5 + $0x668] ss:$16 sps:$4 sm:$0xff]   ;;  %v6578_v32 = vld [vmem:[%s9544_s5 + $0x644] ss:$16 sps:$4 sm:$0xff]  }
 0x35e   : > { %3491 = vmatprep.subr.bf16.mxu1 %v6497_v5  ;;  %v6581_v5 = vld [vmem:[%s9544_s5 + $0x64c] ss:$16 sps:$4 sm:$0xff]  }
 0x360   : > { %3451 = vmatpush1.bf16.msra.mxu0 %v6492_v60  ;;  %v6576_v60 = vld [vmem:[%s9544_s5 + $0x640] ss:$16 sps:$4 sm:$0xff]  }
 0x361   : > { %3492 = vmatpush1.bf16.msra.mxu1 %v6495_v44  ;;  %3452 = vmatprep.subr.bf16.mxu0 %v6500_v31  ;;  %v6579_v44 = vld [vmem:[%s9544_s5 + $0x648] ss:$16 sps:$4 sm:$0xff]   ;;  %v6587_v31 = vld [vmem:[%s9544_s5 + $0x62c] ss:$16 sps:$4 sm:$0xff]  }
 0x362   : > { %3493 = vmatprep.subr.bf16.mxu1 %v6503_v4  ;;  %v6582_v4 = vld [vmem:[%s9544_s5 + $0x620] ss:$16 sps:$4 sm:$0xff]  }
 0x364   : > { %3453 = vmatpush1.bf16.msra.mxu0 %v6498_v11  ;;  %v6585_v11 = vld [vmem:[%s9544_s5 + $0x628] ss:$16 sps:$4 sm:$0xff]  }
 0x365   : > { %3494 = vmatpush1.bf16.msra.mxu1 %v6501_v12  ;;  %3454 = vmatprep.subr.bf16.mxu0 %v6506_v9  ;;  %v6590_v12 = vld [vmem:[%s9544_s5 + $0x604] ss:$16 sps:$4 sm:$0xff]   ;;  %v6593_v9 = vld [vmem:[%s9544_s5 + $0x60c] ss:$16 sps:$4 sm:$0xff]  }
 0x366   : > { %3495 = vmatprep.subr.bf16.mxu1 %v6509_v10  ;;  %v6588_v10 = vld [vmem:[%s9544_s5 + $0x600] ss:$16 sps:$4 sm:$0xff]  }
 0x368   : > { %3455 = vmatpush1.bf16.msra.mxu0 %v6504_v14  ;;  %v6591_v14 = vld [vmem:[%s9544_s5 + $0x608] ss:$16 sps:$4 sm:$0xff]  }
 0x369   : > { %3496 = vmatpush1.bf16.msra.mxu1 %v6507_v15  ;;  %3456 = vmatprep.subr.bf16.mxu0 %v6512_v29  ;;  %v6596_v15 = vld [vmem:[%s9544_s5 + $0x5e4] ss:$16 sps:$4 sm:$0xff]   ;;  %v6599_v29 = vld [vmem:[%s9544_s5 + $0x5ec] ss:$16 sps:$4 sm:$0xff]  }
 0x36a   : > { %3497 = vmatprep.subr.bf16.mxu1 %v6515_v6  ;;  %v6594_v6 = vld [vmem:[%s9544_s5 + $0x5e0] ss:$16 sps:$4 sm:$0xff]  }
 0x36c   : > { %3457 = vmatpush1.bf16.msra.mxu0 %v6510_v7  ;;  %v6597_v7 = vld [vmem:[%s9544_s5 + $0x5e8] ss:$16 sps:$4 sm:$0xff]  }
 0x36d   : > { %3498 = vmatpush1.bf16.msra.mxu1 %v6513_v46  ;;  %3458 = vmatprep.subr.bf16.mxu0 %v6518_v47  ;;  %v6602_v46 = vld [vmem:[%s9544_s5 + $0x5c4] ss:$16 sps:$4 sm:$0xff]   ;;  %v6605_v47 = vld [vmem:[%s9544_s5 + $0x5cc] ss:$16 sps:$4 sm:$0xff]  }
 0x36e   : > { %3499 = vmatprep.subr.bf16.mxu1 %v6521_v48  ;;  %v6600_v48 = vld [vmem:[%s9544_s5 + $0x5c0] ss:$16 sps:$4 sm:$0xff]  }
 0x370   : > { %3459 = vmatpush1.bf16.msra.mxu0 %v6516_v18  ;;  %v6603_v18 = vld [vmem:[%s9544_s5 + $0x5c8] ss:$16 sps:$4 sm:$0xff]  }
 0x371   : > { %3500 = vmatpush1.bf16.msra.mxu1 %v6519_v19  ;;  %3462 = vmatprep.subr.bf16.mxu0 %v6524_v1  ;;  %v6608_v19 = vld [vmem:[%s9544_s5 + $0x5a4] ss:$16 sps:$4 sm:$0xff]   ;;  %v6611_v1 = vld [vmem:[%s9544_s5 + $0x5ac] ss:$16 sps:$4 sm:$0xff]  }
 0x372   : > { %3503 = vmatprep.subr.bf16.mxu1 %v6527_v20  ;;  %v6606_v20 = vld [vmem:[%s9544_s5 + $0x5a0] ss:$16 sps:$4 sm:$0xff]  }
 0x374   : > { %3463 = vmatpush2.bf16.msra.mxu0 %v6522_v2  ;;  %v6609_v2 = vld [vmem:[%s9544_s5 + $0x5a8] ss:$16 sps:$4 sm:$0xff]  }
 0x375   : > { %3504 = vmatpush2.bf16.msra.mxu1 %v6525_v21  ;;  %3464 = vmatprep.subr.bf16.mxu0 %v6530_v17  ;;  %v6614_v21 = vld [vmem:[%s9544_s5 + $0x764] ss:$16 sps:$4 sm:$0xff]   ;;  %v6617_v17 = vld [vmem:[%s9544_s5 + $0x76c] ss:$16 sps:$4 sm:$0xff]  }
 0x376   : > { %3505 = vmatprep.subr.bf16.mxu1 %v6533_v63  ;;  %v6612_v63 = vld [vmem:[%s9544_s5 + $0x760] ss:$16 sps:$4 sm:$0xff]  }
 0x378   : > { %3465 = vmatpush2.bf16.msra.mxu0 %v6528_v61  ;;  %v6615_v61 = vld [vmem:[%s9544_s5 + $0x768] ss:$16 sps:$4 sm:$0xff]  }
 0x379   : > { %3506 = vmatpush2.bf16.msra.mxu1 %v6531_v33  ;;  %3466 = vmatprep.subr.bf16.mxu0 %v6536_v22  ;;  %v6620_v33 = vld [vmem:[%s9544_s5 + $0x744] ss:$16 sps:$4 sm:$0xff]   ;;  %v6623_v22 = vld [vmem:[%s9544_s5 + $0x74c] ss:$16 sps:$4 sm:$0xff]  }
 0x37a   : > { %3507 = vmatprep.subr.bf16.mxu1 %v6539_v34  ;;  %v6618_v34 = vld [vmem:[%s9544_s5 + $0x740] ss:$16 sps:$4 sm:$0xff]  }
 0x37c   : > { %3467 = vmatpush2.bf16.msra.mxu0 %v6534_v16  ;;  %v6621_v16 = vld [vmem:[%s9544_s5 + $0x748] ss:$16 sps:$4 sm:$0xff]  }
 0x37d   : > { %3508 = vmatpush2.bf16.msra.mxu1 %v6537_v35  ;;  %3468 = vmatprep.subr.bf16.mxu0 %v6542_v23  ;;  %v6626_v35 = vld [vmem:[%s9544_s5 + $0x724] ss:$16 sps:$4 sm:$0xff]   ;;  %v6629_v23 = vld [vmem:[%s9544_s5 + $0x72c] ss:$16 sps:$4 sm:$0xff]  }
 0x37e   : > { %3509 = vmatprep.subr.bf16.mxu1 %v6545_v36  ;;  %v6624_v36 = vld [vmem:[%s9544_s5 + $0x720] ss:$16 sps:$4 sm:$0xff]  }
 0x380   : > { %3469 = vmatpush2.bf16.msra.mxu0 %v6540_v37  ;;  %v6627_v37 = vld [vmem:[%s9544_s5 + $0x728] ss:$16 sps:$4 sm:$0xff]  }
 0x381   : > { %3510 = vmatpush2.bf16.msra.mxu1 %v6543_v24  ;;  %3470 = vmatprep.subr.bf16.mxu0 %v6548_v38  ;;  %v6632_v24 = vld [vmem:[%s9544_s5 + $0x704] ss:$16 sps:$4 sm:$0xff]   ;;  %v6635_v38 = vld [vmem:[%s9544_s5 + $0x70c] ss:$16 sps:$4 sm:$0xff]  }
 0x382   : > { %3511 = vmatprep.subr.bf16.mxu1 %v6551_v39  ;;  %v6630_v39 = vld [vmem:[%s9544_s5 + $0x700] ss:$16 sps:$4 sm:$0xff]  }
 0x384   : > { %3471 = vmatpush2.bf16.msra.mxu0 %v6546_v40  ;;  %v6633_v40 = vld [vmem:[%s9544_s5 + $0x708] ss:$16 sps:$4 sm:$0xff]  }
 0x385   : > { %3512 = vmatpush2.bf16.msra.mxu1 %v6549_v26  ;;  %3472 = vmatprep.subr.bf16.mxu0 %v6554_v41  ;;  %v6638_v26 = vld [vmem:[%s9544_s5 + $0x6e4] ss:$16 sps:$4 sm:$0xff]   ;;  %v6641_v41 = vld [vmem:[%s9544_s5 + $0x6ec] ss:$16 sps:$4 sm:$0xff]  }
 0x386   : > { %3513 = vmatprep.subr.bf16.mxu1 %v6557_v28  ;;  %v6636_v28 = vld [vmem:[%s9544_s5 + $0x6e0] ss:$16 sps:$4 sm:$0xff]  }
 0x388   : > { %3473 = vmatpush2.bf16.msra.mxu0 %v6552_v42  ;;  %v6639_v42 = vld [vmem:[%s9544_s5 + $0x6e8] ss:$16 sps:$4 sm:$0xff]  }
 0x389   : > { %3514 = vmatpush2.bf16.msra.mxu1 %v6555_v43  ;;  %3474 = vmatprep.subr.bf16.mxu0 %v6560_v50  ;;  %v6644_v43 = vld [vmem:[%s9544_s5 + $0x6c4] ss:$16 sps:$4 sm:$0xff]   ;;  %v6647_v50 = vld [vmem:[%s9544_s5 + $0x6cc] ss:$16 sps:$4 sm:$0xff]  }
 0x38a   : > { %3515 = vmatprep.subr.bf16.mxu1 %v6563_v51  ;;  %v6642_v51 = vld [vmem:[%s9544_s5 + $0x6c0] ss:$16 sps:$4 sm:$0xff]  }
 0x38c   : > { %3475 = vmatpush2.bf16.msra.mxu0 %v6558_v52  ;;  %v6645_v52 = vld [vmem:[%s9544_s5 + $0x6c8] ss:$16 sps:$4 sm:$0xff]  }
 0x38d   : > { %3516 = vmatpush2.bf16.msra.mxu1 %v6561_v53  ;;  %3901 = vmatprep.subr.bf16.mxu0 %v6566_v54  ;;  %v6650_v53 = vld [vmem:[%s9544_s5 + $0x6a4] ss:$16 sps:$4 sm:$0xff]   ;;  %v6653_v54 = vld [vmem:[%s9544_s5 + $0x6ac] ss:$16 sps:$4 sm:$0xff]  }
 0x38e   : > { %3942 = vmatprep.subr.bf16.mxu1 %v6569_v57  ;;  %v6648_v57 = vld [vmem:[%s9544_s5 + $0x6a0] ss:$16 sps:$4 sm:$0xff]  }
 0x38f   : > { %3477 = vmatmul.mubr.bf16.vlgmr.msra.gmra.mxu0 %v3138_v3 }
 0x390   : > { %3518 = vmatmul.mubr.bf16.vlgmr.msra.gmra.mxu1 %v3138_v3  ;;  %3902 = vmatpush1.bf16.msra.mxu0 %v6564_v58  ;;  %v6651_v58 = vld [vmem:[%s9544_s5 + $0x6a8] ss:$16 sps:$4 sm:$0xff]   ;;  %v6656_v3 = vld [vmem:[%s9544_s5 + $0x864] ss:$16 sps:$4 sm:$0xff]  }
 0x391   : > { %5989 = vmatprep.mubr.msk.bf16.mxu0 %vm2604_vm7, %v8151_v27  ;;  %3943 = vmatpush1.bf16.msra.mxu1 %v6567_v55  ;;  %v6659_v55 = vld [vmem:[%s9544_s5 + $0x86c] ss:$16 sps:$4 sm:$0xff]  }
 0x392   : > { %5990 = vmatprep.mubr.msk.bf16.mxu1 %vm2604_vm7, %v8151_v27  ;;  %3903 = vmatprep.subr.bf16.mxu0 %v6572_v30  ;;  %v6584_v27 = vld [vmem:[%s9544_s5 + $0x624] ss:$16 sps:$4 sm:$0xff]   ;;  %v6654_v30 = vld [vmem:[%s9544_s5 + $0x860] ss:$16 sps:$4 sm:$0xff]  }
 0x393   : > { %3944 = vmatprep.subr.bf16.mxu1 %v6575_v56  ;;  %v6657_v56 = vld [vmem:[%s9544_s5 + $0x868] ss:$16 sps:$4 sm:$0xff]  }
 0x394   : > { %3904 = vmatpush1.bf16.msra.mxu0 %v6570_v49  ;;  %v6662_v49 = vld [vmem:[%s9544_s5 + $0x844] ss:$16 sps:$4 sm:$0xff]  }
 0x395   : > { %3945 = vmatpush1.bf16.msra.mxu1 %v6573_v59  ;;  %3905 = vmatprep.subr.bf16.mxu0 %v6578_v32  ;;  %v4049_v59 = vrot.slane %v8139_v0, 2  ;;  %v6665_v32 = vld [vmem:[%s9544_s5 + $0x84c] ss:$16 sps:$4 sm:$0xff]   ;;  %v6668_v0 = vld [vmem:[%s9544_s5 + $0x824] ss:$16 sps:$4 sm:$0xff]  }
 0x396   : > { %3946 = vmatprep.subr.bf16.mxu1 %v6581_v5  ;;  %v6660_v5 = vld [vmem:[%s9544_s5 + $0x840] ss:$16 sps:$4 sm:$0xff]  }
 0x398   : > { %3906 = vmatpush1.bf16.msra.mxu0 %v6576_v60  ;;  %v6663_v60 = vld [vmem:[%s9544_s5 + $0x848] ss:$16 sps:$4 sm:$0xff]  }
 0x399   : > { %3947 = vmatpush1.bf16.msra.mxu1 %v6579_v44  ;;  %3907 = vmatprep.subr.bf16.mxu0 %v6584_v27  ;;  %v6666_v44 = vld [vmem:[%s9544_s5 + $0x820] ss:$16 sps:$4 sm:$0xff]   ;;  %v6669_v27 = vld [vmem:[%s9544_s5 + $0x828] ss:$16 sps:$4 sm:$0xff]  }
 0x39a   : > { %3948 = vmatprep.subr.bf16.mxu1 %v6587_v31  ;;  %v6674_v31 = vld [vmem:[%s9544_s5 + $0x804] ss:$16 sps:$4 sm:$0xff]  }
 0x39c   : > { %3908 = vmatpush1.bf16.msra.mxu0 %v6582_v4  ;;  %v6677_v4 = vld [vmem:[%s9544_s5 + $0x80c] ss:$16 sps:$4 sm:$0xff]  }
 0x39d   : > { %3949 = vmatpush1.bf16.msra.mxu1 %v6585_v11  ;;  %3909 = vmatprep.subr.bf16.mxu0 %v6590_v12  ;;  %v6672_v11 = vld [vmem:[%s9544_s5 + $0x800] ss:$16 sps:$4 sm:$0xff]   ;;  %v6675_v12 = vld [vmem:[%s9544_s5 + $0x808] ss:$16 sps:$4 sm:$0xff]  }
 0x39e   : > { %3950 = vmatprep.subr.bf16.mxu1 %v6593_v9  ;;  %v6680_v9 = vld [vmem:[%s9544_s5 + $0x7e4] ss:$16 sps:$4 sm:$0xff]  }
 0x3a0   : > { %3910 = vmatpush1.bf16.msra.mxu0 %v6588_v10  ;;  %v6683_v10 = vld [vmem:[%s9544_s5 + $0x7ec] ss:$16 sps:$4 sm:$0xff]  }
 0x3a1   : > { %3951 = vmatpush1.bf16.msra.mxu1 %v6591_v14  ;;  %3911 = vmatprep.subr.bf16.mxu0 %v6596_v15 }
 0x3a2   : > { %3952 = vmatprep.subr.bf16.mxu1 %v6599_v29  ;;  %v6678_v29 = vld [vmem:[%s9544_s5 + $0x7e0] ss:$16 sps:$4 sm:$0xff]  }
 0x3a4   : > { %3912 = vmatpush1.bf16.msra.mxu0 %v6594_v6 }
 0x3a5   : > { %3953 = vmatpush1.bf16.msra.mxu1 %v6597_v7  ;;  %3913 = vmatprep.subr.bf16.mxu0 %v6602_v46  ;;  %v6681_v46 = vld [vmem:[%s9544_s5 + $0x7e8] ss:$16 sps:$4 sm:$0xff]  }
 0x3a6   : > { %3954 = vmatprep.subr.bf16.mxu1 %v6605_v47  ;;  %v6686_v47 = vld [vmem:[%s9544_s5 + $0x7c4] ss:$16 sps:$4 sm:$0xff]  }
 0x3a8   : > { %3914 = vmatpush1.bf16.msra.mxu0 %v6600_v48  ;;  %v6689_v48 = vld [vmem:[%s9544_s5 + $0x7cc] ss:$16 sps:$4 sm:$0xff]  }
 0x3a9   : > { %3955 = vmatpush1.bf16.msra.mxu1 %v6603_v18  ;;  %3915 = vmatprep.subr.bf16.mxu0 %v6608_v19 }
 0x3aa   : > { %3956 = vmatprep.subr.bf16.mxu1 %v6611_v1  ;;  %v6684_v1 = vld [vmem:[%s9544_s5 + $0x7c0] ss:$16 sps:$4 sm:$0xff]  }
 0x3ac   : > { %3916 = vmatpush1.bf16.msra.mxu0 %v6606_v20 }
 0x3ad   : > { %3957 = vmatpush1.bf16.msra.mxu1 %v6609_v2  ;;  %3919 = vmatprep.subr.bf16.mxu0 %v6614_v21  ;;  %v6687_v21 = vld [vmem:[%s9544_s5 + $0x7c8] ss:$16 sps:$4 sm:$0xff]  }
 0x3ae   : > { %3960 = vmatprep.subr.bf16.mxu1 %v6617_v17  ;;  %v6692_v17 = vld [vmem:[%s9544_s5 + $0x7a4] ss:$16 sps:$4 sm:$0xff]  }
 0x3b0   : > { %3920 = vmatpush2.bf16.msra.mxu0 %v6612_v63  ;;  %v6695_v63 = vld [vmem:[%s9544_s5 + $0x7ac] ss:$16 sps:$4 sm:$0xff]  }
 0x3b1   : > { %3961 = vmatpush2.bf16.msra.mxu1 %v6615_v61  ;;  %3921 = vmatprep.subr.bf16.mxu0 %v6620_v33  ;;  %v6690_v61 = vld [vmem:[%s9544_s5 + $0x7a0] ss:$16 sps:$4 sm:$0xff]   ;;  %v6693_v33 = vld [vmem:[%s9544_s5 + $0x7a8] ss:$16 sps:$4 sm:$0xff]  }
 0x3b2   : > { %3962 = vmatprep.subr.bf16.mxu1 %v6623_v22  ;;  %v6698_v22 = vld [vmem:[%s9544_s5 + $0x784] ss:$16 sps:$4 sm:$0xff]  }
 0x3b4   : > { %3922 = vmatpush2.bf16.msra.mxu0 %v6618_v34  ;;  %v6701_v34 = vld [vmem:[%s9544_s5 + $0x78c] ss:$16 sps:$4 sm:$0xff]  }
 0x3b5   : > { %3963 = vmatpush2.bf16.msra.mxu1 %v6621_v16  ;;  %3923 = vmatprep.subr.bf16.mxu0 %v6626_v35  ;;  %v6696_v16 = vld [vmem:[%s9544_s5 + $0x780] ss:$16 sps:$4 sm:$0xff]   ;;  %v6699_v35 = vld [vmem:[%s9544_s5 + $0x788] ss:$16 sps:$4 sm:$0xff]  }
 0x3b6   : > { %3964 = vmatprep.subr.bf16.mxu1 %v6629_v23  ;;  %v6704_v23 = vld [vmem:[%s9544_s5 + $0x944] ss:$16 sps:$4 sm:$0xff]  }
 0x3b8   : > { %3924 = vmatpush2.bf16.msra.mxu0 %v6624_v36  ;;  %v6707_v36 = vld [vmem:[%s9544_s5 + $0x94c] ss:$16 sps:$4 sm:$0xff]  }
 0x3b9   : > { %3965 = vmatpush2.bf16.msra.mxu1 %v6627_v37  ;;  %3925 = vmatprep.subr.bf16.mxu0 %v6632_v24  ;;  %v6702_v37 = vld [vmem:[%s9544_s5 + $0x940] ss:$16 sps:$4 sm:$0xff]   ;;  %v6705_v24 = vld [vmem:[%s9544_s5 + $0x948] ss:$16 sps:$4 sm:$0xff]  }
 0x3ba   : > { %3966 = vmatprep.subr.bf16.mxu1 %v6635_v38  ;;  %v6710_v38 = vld [vmem:[%s9544_s5 + $0x924] ss:$16 sps:$4 sm:$0xff]  }
 0x3bc   : > { %3926 = vmatpush2.bf16.msra.mxu0 %v6630_v39  ;;  %v6713_v39 = vld [vmem:[%s9544_s5 + $0x92c] ss:$16 sps:$4 sm:$0xff]  }
 0x3bd   : > { %3967 = vmatpush2.bf16.msra.mxu1 %v6633_v40  ;;  %3927 = vmatprep.subr.bf16.mxu0 %v6638_v26  ;;  %v6708_v40 = vld [vmem:[%s9544_s5 + $0x920] ss:$16 sps:$4 sm:$0xff]   ;;  %v6711_v26 = vld [vmem:[%s9544_s5 + $0x928] ss:$16 sps:$4 sm:$0xff]  }
 0x3be   : > { %3968 = vmatprep.subr.bf16.mxu1 %v6641_v41  ;;  %v6716_v41 = vld [vmem:[%s9544_s5 + $0x904] ss:$16 sps:$4 sm:$0xff]  }
 0x3c0   : > { %3928 = vmatpush2.bf16.msra.mxu0 %v6636_v28  ;;  %v6719_v28 = vld [vmem:[%s9544_s5 + $0x90c] ss:$16 sps:$4 sm:$0xff]  }
 0x3c1   : > { %3969 = vmatpush2.bf16.msra.mxu1 %v6639_v42  ;;  %3929 = vmatprep.subr.bf16.mxu0 %v6644_v43  ;;  %v6714_v42 = vld [vmem:[%s9544_s5 + $0x900] ss:$16 sps:$4 sm:$0xff]   ;;  %v6717_v43 = vld [vmem:[%s9544_s5 + $0x908] ss:$16 sps:$4 sm:$0xff]  }
 0x3c2   : > { %3970 = vmatprep.subr.bf16.mxu1 %v6647_v50  ;;  %v6722_v50 = vld [vmem:[%s9544_s5 + $0x8e4] ss:$16 sps:$4 sm:$0xff]  }
 0x3c4   : > { %3930 = vmatpush2.bf16.msra.mxu0 %v6642_v51  ;;  %v6725_v51 = vld [vmem:[%s9544_s5 + $0x8ec] ss:$16 sps:$4 sm:$0xff]  }
 0x3c5   : > { %3971 = vmatpush2.bf16.msra.mxu1 %v6645_v52  ;;  %3931 = vmatprep.subr.bf16.mxu0 %v6650_v53  ;;  %v6720_v52 = vld [vmem:[%s9544_s5 + $0x8e0] ss:$16 sps:$4 sm:$0xff]   ;;  %v6723_v53 = vld [vmem:[%s9544_s5 + $0x8e8] ss:$16 sps:$4 sm:$0xff]  }
 0x3c6   : > { %3972 = vmatprep.subr.bf16.mxu1 %v6653_v54  ;;  %v6728_v54 = vld [vmem:[%s9544_s5 + $0x8c4] ss:$16 sps:$4 sm:$0xff]  }
 0x3c8   : > { %3932 = vmatpush2.bf16.msra.mxu0 %v6648_v57  ;;  %v6731_v57 = vld [vmem:[%s9544_s5 + $0x8cc] ss:$16 sps:$4 sm:$0xff]  }
 0x3c9   : > { %3973 = vmatpush2.bf16.msra.mxu1 %v6651_v58  ;;  %4354 = vmatprep.subr.bf16.mxu0 %v6656_v3  ;;  %v6726_v58 = vld [vmem:[%s9544_s5 + $0x8c0] ss:$16 sps:$4 sm:$0xff]   ;;  %v6729_v3 = vld [vmem:[%s9544_s5 + $0x8c8] ss:$16 sps:$4 sm:$0xff]  }
 0x3ca   : > { %4395 = vmatprep.subr.bf16.mxu1 %v6659_v55  ;;  %v6734_v55 = vld [vmem:[%s9544_s5 + $0x8a4] ss:$16 sps:$4 sm:$0xff]  }
 0x3cb   : > { %3934 = vmatmul.mubr.bf16.vlgmr.msra.gmra.mxu0 %v8143_v25 }
 0x3cc   : > { %3975 = vmatmul.mubr.bf16.vlgmr.msra.gmra.mxu1 %v8143_v25  ;;  %4355 = vmatpush1.bf16.msra.mxu0 %v6654_v30  ;;  %v6671_v25 = vld [vmem:[%s9544_s5 + $0x82c] ss:$16 sps:$4 sm:$0xff]  }
 0x3cd   : > { %6111 = vmatprep.mubr.msk.bf16.mxu0 %vm2604_vm7, %v4049_v59  ;;  %4396 = vmatpush1.bf16.msra.mxu1 %v6657_v56  ;;  %v6737_v30 = vld [vmem:[%s9544_s5 + $0x8ac] ss:$16 sps:$4 sm:$0xff]   ;;  %v6732_v56 = vld [vmem:[%s9544_s5 + $0x8a0] ss:$16 sps:$4 sm:$0xff]  }
 0x3ce   : > { %6112 = vmatprep.mubr.msk.bf16.mxu1 %vm2604_vm7, %v4049_v59  ;;  %4356 = vmatprep.subr.bf16.mxu0 %v6662_v49  ;;  %v6735_v49 = vld [vmem:[%s9544_s5 + $0x8a8] ss:$16 sps:$4 sm:$0xff]   ;;  %v6740_v59 = vld [vmem:[%s9544_s5 + $0x884] ss:$16 sps:$4 sm:$0xff]  }
 0x3cf   : > { %4397 = vmatprep.subr.bf16.mxu1 %v6665_v32  ;;  %v6743_v32 = vld [vmem:[%s9544_s5 + $0x88c] ss:$16 sps:$4 sm:$0xff]  }
 0x3d0   : > { %4357 = vmatpush1.bf16.msra.mxu0 %v6660_v5  ;;  %v6738_v5 = vld [vmem:[%s9544_s5 + $0x880] ss:$16 sps:$4 sm:$0xff]  }
 0x3d1   : > { %4398 = vmatpush1.bf16.msra.mxu1 %v6663_v60  ;;  %4358 = vmatprep.subr.bf16.mxu0 %v6668_v0  ;;  %v6741_v60 = vld [vmem:[%s9544_s5 + $0x888] ss:$16 sps:$4 sm:$0xff]   ;;  %v4048_v0 = vrot.slane %v8135_v62, 2 }
 0x3d2   : > { %4399 = vmatprep.subr.bf16.mxu1 %v6671_v25 }
 0x3d4   : > { %4359 = vmatpush1.bf16.msra.mxu0 %v6666_v44 }
 0x3d5   : > { %4400 = vmatpush1.bf16.msra.mxu1 %v6669_v27  ;;  %4360 = vmatprep.subr.bf16.mxu0 %v6674_v31 }
 0x3d6   : > { %4401 = vmatprep.subr.bf16.mxu1 %v6677_v4 }
 0x3d7   : > { %v8754_v14 = vpop.f32.mrf.mxu0  ;;  %v8756_v15 = vpop.f32.mrf.mxu1 }
 0x3d8   : > { %4361 = vmatpush1.bf16.msra.mxu0 %v6672_v11 }
 0x3d9   : > { %4402 = vmatpush1.bf16.msra.mxu1 %v6675_v12  ;;  %v8761_v6 = vpop.f32.mrf.mxu0  ;;  %v8763_v7 = vpop.f32.mrf.mxu1  ;;  %4362 = vmatprep.subr.bf16.mxu0 %v6680_v9 }
 0x3da   : > { %4403 = vmatprep.subr.bf16.mxu1 %v6683_v10 }
 0x3db   : > { %v2646_v18 = vpop.f32.mrf.mxu0  ;;  %v2687_v19 = vpop.f32.mrf.mxu1 }
 0x3dc   : > { %4363 = vmatpush1.bf16.msra.mxu0 %v6678_v29 }
 0x3dd   : > { %4404 = vmatpush1.bf16.msra.mxu1 %v6681_v46  ;;  %v2647_v20 = vpop.f32.mrf.mxu0  ;;  %v2688_v2 = vpop.f32.mrf.mxu1  ;;  %4364 = vmatprep.subr.bf16.mxu0 %v6686_v47 }
 0x3de   : > { %4405 = vmatprep.subr.bf16.mxu1 %v6689_v48 }
 0x3e0   : > { %4365 = vmatpush1.bf16.msra.mxu0 %v6684_v1 }
 0x3e1   : > { %4406 = vmatpush1.bf16.msra.mxu1 %v6687_v21  ;;  %4366 = vmatprep.subr.bf16.mxu0 %v6692_v17 }
 0x3e2   : > { %4407 = vmatprep.subr.bf16.mxu1 %v6695_v63 }
 0x3e4   : > { %4367 = vmatpush1.bf16.msra.mxu0 %v6690_v61 }
 0x3e5   : > { %4408 = vmatpush1.bf16.msra.mxu1 %v6693_v33  ;;  %4368 = vmatprep.subr.bf16.mxu0 %v6698_v22 }
 0x3e6   : > { %4409 = vmatprep.subr.bf16.mxu1 %v6701_v34 }
 0x3e8   : > { %4369 = vmatpush1.bf16.msra.mxu0 %v6696_v16 }
 0x3e9   : > { %4410 = vmatpush1.bf16.msra.mxu1 %v6699_v35  ;;  %4372 = vmatprep.subr.bf16.mxu0 %v6704_v23  ;;  %v4440_v23 = vld [vmem:[%s9545_s6] sm:$0xf] }
 0x3ea   : > { %4413 = vmatprep.subr.bf16.mxu1 %v6707_v36 }
 0x3ec   : > { %4373 = vmatpush2.bf16.msra.mxu0 %v6702_v37 }
 0x3ed   : > { %4414 = vmatpush2.bf16.msra.mxu1 %v6705_v24  ;;  %4374 = vmatprep.subr.bf16.mxu0 %v6710_v38 }
 0x3ee   : > { %4415 = vmatprep.subr.bf16.mxu1 %v6713_v39 }
 0x3f0   : > { %4375 = vmatpush2.bf16.msra.mxu0 %v6708_v40  ;;  %v9558_v40 = vsub.s32 1, %v7101_v13 }
 0x3f1   : > { %4416 = vmatpush2.bf16.msra.mxu1 %v6711_v26  ;;  %4376 = vmatprep.subr.bf16.mxu0 %v6716_v41 }
 0x3f2   : > { %4417 = vmatprep.subr.bf16.mxu1 %v6719_v28  ;;  %v4449_v26 = vrot.slane %v4440_v23, %v9558_v40  ;;  %v4840_v40 = vld [vmem:[%s9547_s8 + $0x260] sm:$0xff] }
 0x3f4   : > { %4377 = vmatpush2.bf16.msra.mxu0 %v6714_v42  ;;  %v9559_v42 = vsub.s32 0, %v7101_v13 }
 0x3f5   : > { %4418 = vmatpush2.bf16.msra.mxu1 %v6717_v43  ;;  %4378 = vmatprep.subr.bf16.mxu0 %v6722_v50 }
 0x3f6   : > { %4419 = vmatprep.subr.bf16.mxu1 %v6725_v51  ;;  %v4445_v43 = vrot.slane %v4440_v23, %v9559_v42  ;;  %v4457_v51 = vrot.slane %v4440_v23, %v1252_v45  ;;  %v4838_v42 = vld [vmem:[%s9547_s8 + $0x250] sm:$0xff] }
 0x3f8   : > { %4379 = vmatpush2.bf16.msra.mxu0 %v6720_v52 }
 0x3f9   : > { %4420 = vmatpush2.bf16.msra.mxu1 %v6723_v53  ;;  %4380 = vmatprep.subr.bf16.mxu0 %v6728_v54  ;;  %v9560_v53 = vsub.s32 2, %v7101_v13  ;;  %v6115_v13 = vld [vmem:[%s9546_s7 + $0x4] sm:$0xf] }
 0x3fa   : > { %4421 = vmatprep.subr.bf16.mxu1 %v6731_v57 }
 0x3fb   : > { %v4453_v54 = vrot.slane %v4440_v23, %v9560_v53  ;;  %v4843_v23 = vld [vmem:[%s9547_s8 + $0x278] sm:$0xff]  ;;  %v4770_v53 = vld [vmem:[%s9547_s8 + $0x30] sm:$0xff] }
 0x3fc   : > { %4381 = vmatpush2.bf16.msra.mxu0 %v6726_v58 }
 0x3fd   : > { %4422 = vmatpush2.bf16.msra.mxu1 %v6729_v3  ;;  %4382 = vmatprep.subr.bf16.mxu0 %v6734_v55 }
 0x3fe   : > { %4423 = vmatprep.subr.bf16.mxu1 %v6737_v30 }
 0x400   : > { %4383 = vmatpush2.bf16.msra.mxu0 %v6732_v56 }
 0x401   : > { %4424 = vmatpush2.bf16.msra.mxu1 %v6735_v49  ;;  %4384 = vmatprep.subr.bf16.mxu0 %v6740_v59 }
 0x402   : > { %4425 = vmatprep.subr.bf16.mxu1 %v6743_v32 }
 0x404   : > { %4385 = vmatpush2.bf16.msra.mxu0 %v6738_v5  ;;  %v4466_v5 = vld [vmem:[%s9546_s7] sm:$0xf] }
 0x405   : > { %4426 = vmatpush2.bf16.msra.mxu1 %v6741_v60 }
 0x407   : > { %4387 = vmatmul.mubr.bf16.vlgmr.msra.gmra.mxu0 %v4048_v0 }
 0x408   : > { %4428 = vmatmul.mubr.bf16.vlgmr.msra.gmra.mxu1 %v4048_v0  ;;  %4535 = vmatprep.mubr.f32.mxu0 %v9557_v8  ;;  %v4795_v0 = vld [vmem:[%s9547_s8 + $0xf8] sm:$0xff] }
 0x409   : > { %4606 = vmatprep.mubr.f32.mxu1 %v9557_v8 }
 0x413   : > { %v3027_v25 = vpop.f32.mrf.mxu0  ;;  %v3068_v44 = vpop.f32.mrf.mxu1 }
 0x414   : > { %v3028_v27 = vadd.f32 %v3027_v25, %v8754_v14  ;;  %v3069_v31 = vadd.f32 %v3068_v44, %v8756_v15  ;;  %v4794_v25 = vld [vmem:[%s9547_s8 + $0xf0] sm:$0xff]  ;;  %v4859_v44 = vld [vmem:[%s9547_s8 + $0x2f8] sm:$0xff] }
 0x415   : > { %v3029_v4 = vpop.f32.mrf.mxu0  ;;  %v3070_v11 = vpop.f32.mrf.mxu1 }
 0x416   : > { %v3030_v12 = vadd.f32 %v3029_v4, %v8761_v6  ;;  %v3071_v9 = vadd.f32 %v3070_v11, %v8763_v7  ;;  %v4792_v4 = vld [vmem:[%s9547_s8 + $0xe0] sm:$0xff]  ;;  %v4791_v11 = vld [vmem:[%s9547_s8 + $0xd8] sm:$0xff] }
 0x417   : > { %v3031_v10 = vpop.f32.mrf.mxu0  ;;  %v3072_v62 = vpop.f32.mrf.mxu1 }
 0x418   : > { %v4855_v10 = vld [vmem:[%s9547_s8 + $0x2d8] sm:$0xff]  ;;  %v4789_v62 = vld [vmem:[%s9547_s8 + $0xc8] sm:$0xff] }
 0x419   : > { %v3032_v29 = vpop.f32.mrf.mxu0  ;;  %v3073_v46 = vpop.f32.mrf.mxu1 }
 0x41a   : > { %v4854_v29 = vld [vmem:[%s9547_s8 + $0x2d0] sm:$0xff]  ;;  %v4788_v46 = vld [vmem:[%s9547_s8 + $0xc0] sm:$0xff] }
 0x44f   : > { %v3478_v47 = vpop.f32.mrf.mxu0 }
 0x450   : > { %v3526_v48 = vadd.f32 %v3478_v47, %v3028_v27  ;;  %v3519_v18 = vpop.f32.mrf.mxu1  ;;  %v4793_v27 = vld [vmem:[%s9547_s8 + $0xe8] sm:$0xff] }
 0x451   : > { %v3528_v19 = vadd.f32 %v3519_v18, %v3069_v31  ;;  %v3480_v1 = vpop.f32.mrf.mxu0  ;;  %v4858_v31 = vld [vmem:[%s9547_s8 + $0x2f0] sm:$0xff]  ;;  %v4853_v47 = vld [vmem:[%s9547_s8 + $0x2c8] sm:$0xff]  ;;  %v4852_v18 = vld [vmem:[%s9547_s8 + $0x2c0] sm:$0xff] }
 0x452   : > { %v3527_v20 = vadd.f32 %v3480_v1, %v3030_v12  ;;  %v3521_v2 = vpop.f32.mrf.mxu1  ;;  %v4856_v12 = vld [vmem:[%s9547_s8 + $0x2e0] sm:$0xff]  ;;  %v4851_v1 = vld [vmem:[%s9547_s8 + $0x2b8] sm:$0xff] }
 0x453   : > { %v3529_v14 = vadd.f32 %v3521_v2, %v3071_v9  ;;  %v3482_v21 = vpop.f32.mrf.mxu0  ;;  %v4790_v9 = vld [vmem:[%s9547_s8 + $0xd0] sm:$0xff] }
 0x454   : > { %v3523_v15 = vpop.f32.mrf.mxu1  ;;  %v4850_v2 = vld [vmem:[%s9547_s8 + $0x2b0] sm:$0xff]  ;;  %v4849_v21 = vld [vmem:[%s9547_s8 + $0x2a8] sm:$0xff] }
 0x455   : > { %v3483_v17 = vpop.f32.mrf.mxu0  ;;  %v4783_v15 = vld [vmem:[%s9547_s8 + $0x98] sm:$0xff] }
 0x456   : > { %v3524_v63 = vpop.f32.mrf.mxu1  ;;  %v4848_v17 = vld [vmem:[%s9547_s8 + $0x2a0] sm:$0xff] }
 0x457   : > { %v4782_v63 = vld [vmem:[%s9547_s8 + $0x90] sm:$0xff] }
 0x48b   : > { %v3935_v61 = vpop.f32.mrf.mxu0 }
 0x48c   : > { %v3976_v6 = vpop.f32.mrf.mxu1  ;;  %v3983_v36 = vadd.f32 %v3935_v61, %v3526_v48  ;;  %v4787_v48 = vld [vmem:[%s9547_s8 + $0xb8] sm:$0xff] }
 0x48d   : > { %v3937_v33 = vpop.f32.mrf.mxu0  ;;  %v3985_v24 = vadd.f32 %v3976_v6, %v3528_v19  ;;  %v4786_v19 = vld [vmem:[%s9547_s8 + $0xb0] sm:$0xff]  ;;  %v4847_v61 = vld [vmem:[%s9547_s8 + $0x298] sm:$0xff]  ;;  %v4781_v6 = vld [vmem:[%s9547_s8 + $0x88] sm:$0xff] }
 0x48e   : > { %v3978_v7 = vpop.f32.mrf.mxu1  ;;  %v3984_v38 = vadd.f32 %v3937_v33, %v3527_v20  ;;  %v4785_v20 = vld [vmem:[%s9547_s8 + $0xa8] sm:$0xff]  ;;  %v4846_v33 = vld [vmem:[%s9547_s8 + $0x290] sm:$0xff] }
 0x48f   : > { %v3939_v22 = vpop.f32.mrf.mxu0  ;;  %v3986_v41 = vadd.f32 %v3978_v7, %v3529_v14  ;;  %v4784_v14 = vld [vmem:[%s9547_s8 + $0xa0] sm:$0xff] }
 0x490   : > { %v3980_v34 = vpop.f32.mrf.mxu1  ;;  %v4780_v7 = vld [vmem:[%s9547_s8 + $0x80] sm:$0xff]  ;;  %v4845_v22 = vld [vmem:[%s9547_s8 + $0x288] sm:$0xff] }
 0x491   : > { %v3940_v16 = vpop.f32.mrf.mxu0  ;;  %v4779_v34 = vld [vmem:[%s9547_s8 + $0x78] sm:$0xff] }
 0x492   : > { %v3981_v35 = vpop.f32.mrf.mxu1  ;;  %v4844_v16 = vld [vmem:[%s9547_s8 + $0x280] sm:$0xff] }
 0x493   : > { %v4778_v35 = vld [vmem:[%s9547_s8 + $0x70] sm:$0xff] }
 0x4c7   : > { %v4388_v37 = vpop.f32.mrf.mxu0 }
 0x4c8   : > { %v4429_v39 = vpop.f32.mrf.mxu1  ;;  %v4436_v28 = vadd.f32 %v4388_v37, %v3983_v36  ;;  %v4777_v36 = vld [vmem:[%s9547_s8 + $0x68] sm:$0xff]  ;;  %v4842_v37 = vld [vmem:[%s9547_s8 + $0x270] sm:$0xff] }
 0x4c9   : > { %v4390_v50 = vpop.f32.mrf.mxu0  ;;  %v4438_v52 = vadd.f32 %v4429_v39, %v3985_v24  ;;  %v4776_v24 = vld [vmem:[%s9547_s8 + $0x60] sm:$0xff]  ;;  %v4775_v39 = vld [vmem:[%s9547_s8 + $0x58] sm:$0xff] }
 0x4ca   : > { %v4437_v57 = vadd.f32 %v4390_v50, %v3984_v38  ;;  %v4431_v58 = vpop.f32.mrf.mxu1  ;;  %v4462_v49 = vadd.f32 %v4445_v43, %v4436_v28  ;;  %v4841_v38 = vld [vmem:[%s9547_s8 + $0x268] sm:$0xff]  ;;  %v4772_v43 = vld [vmem:[%s9547_s8 + $0x40] sm:$0xff] }
 0x4cb   : > { %v4439_v3 = vadd.f32 %v4431_v58, %v3986_v41  ;;  %v4392_v55 = vpop.f32.mrf.mxu0  ;;  %v4464_v60 = vadd.f32 %v4453_v54, %v4438_v52  ;;  %v4839_v41 = vld [vmem:[%s9547_s8 + $0x258] sm:$0xff]  ;;  %v4773_v28 = vld [vmem:[%s9547_s8 + $0x48] sm:$0xff]  ;;  %v4836_v52 = vld [vmem:[%s9547_s8 + $0x240] sm:$0xff] }
 0x4cc   : > { %v4463_v30 = vadd.f32 %v4449_v26, %v4437_v57  ;;  %v4433_v56 = vpop.f32.mrf.mxu1  ;;  %v4774_v26 = vld [vmem:[%s9547_s8 + $0x50] sm:$0xff]  ;;  %v4837_v50 = vld [vmem:[%s9547_s8 + $0x248] sm:$0xff]  ;;  %v4835_v54 = vld [vmem:[%s9547_s8 + $0x238] sm:$0xff] }
 0x4cd   : > { %v4465_v59 = vadd.f32 %v4457_v51, %v4439_v3  ;;  %v4393_v32 = vpop.f32.mrf.mxu0  ;;  %v4771_v51 = vld [vmem:[%s9547_s8 + $0x38] sm:$0xff]  ;;  %v4769_v57 = vld [vmem:[%s9547_s8 + $0x28] sm:$0xff]  ;;  %v4834_v58 = vld [vmem:[%s9547_s8 + $0x230] sm:$0xff] }
 0x4ce   : > { %v4434_v45 = vpop.f32.mrf.mxu1  ;;  %4501 = vmatprep.subr.mxu0 %v4463_v30  ;;  %v4768_v3 = vld [vmem:[%s9547_s8 + $0x20] sm:$0xff]  ;;  %v4833_v55 = vld [vmem:[%s9547_s8 + $0x228] sm:$0xff]  ;;  %v4766_v56 = vld [vmem:[%s9547_s8 + $0x10] sm:$0xff] }
 0x4cf   : > { %4572 = vmatprep.subr.mxu1 %v4465_v59  ;;  %4502 = vmatpush1.msra.mxu0 %v4462_v49  ;;  %v4827_v32 = vld [vmem:[%s9547_s8 + $0x1f8] sm:$0xff]  ;;  %v4824_v45 = vld [vmem:[%s9547_s8 + $0x1e0] sm:$0xff] }
 0x4d0   : > { %4573 = vmatpush1.msra.mxu1 %v4464_v60  ;;  %6113 = vmatmul.mubr.msk.f32.vlgmr.msra.gmra.mxu0 %vm4467_vm8, %v4466_v5 }
 0x4d1   : > { %6114 = vmatmul.mubr.msk.f32.vlgmr.msra.gmra.mxu1 %vm4467_vm8, %v4466_v5  ;;  %4648 = vmatprep.subr.mxu0 %v4463_v30  ;;  %v4767_v30 = vld [vmem:[%s9547_s8 + $0x18] sm:$0xff]  ;;  %v4826_v5 = vld [vmem:[%s9547_s8 + $0x1f0] sm:$0xff] }
 0x4d2   : > { %4719 = vmatprep.subr.mxu1 %v4465_v59  ;;  %4649 = vmatpush1.msra.mxu0 %v4462_v49  ;;  %v4765_v49 = vld [vmem:[%s9547_s8 + $0x8] sm:$0xff]  ;;  %v4764_v59 = vld [vmem:[%s9547_s8] sm:$0xff] }
 0x4d3   : > { %4720 = vmatpush1.msra.mxu1 %v4464_v60  ;;  %4682 = vmatprep.mubr.f32.mxu0 %v9557_v8  ;;  %v4825_v60 = vld [vmem:[%s9547_s8 + $0x1e8] sm:$0xff] }
 0x4d4   : > { %4753 = vmatprep.mubr.f32.mxu1 %v9557_v8  ;;  %6116 = vmatmul.mubr.msk.f32.vlgmr.msra.gmra.mxu0 %vm4467_vm8, %v6115_v13  ;;  %v4857_v8 = vld [vmem:[%s9547_s8 + $0x2e8] sm:$0xff] }
 0x4d5   : > { %6117 = vmatmul.mubr.msk.f32.vlgmr.msra.gmra.mxu1 %vm4467_vm8, %v6115_v13  ;;  %4868 = vmatprep.subr.mxu0 %v4795_v0  ;;  %v4823_v13 = vld [vmem:[%s9547_s8 + $0x1d8] sm:$0xff]  ;;  %v4822_v0 = vld [vmem:[%s9547_s8 + $0x1d0] sm:$0xff] }
 0x4d6   : > { %4869 = vmatpush1.msra.mxu0 %v4794_v25  ;;  %4939 = vmatprep.subr.mxu1 %v4859_v44  ;;  %v4821_v25 = vld [vmem:[%s9547_s8 + $0x1c8] sm:$0xff]  ;;  %v4820_v44 = vld [vmem:[%s9547_s8 + $0x1c0] sm:$0xff] }
 0x4d7   : > { %4870 = vmatprep.subr.mxu0 %v4793_v27  ;;  %4940 = vmatpush1.msra.mxu1 %v4858_v31  ;;  %v4819_v27 = vld [vmem:[%s9547_s8 + $0x1b8] sm:$0xff]  ;;  %v4818_v31 = vld [vmem:[%s9547_s8 + $0x1b0] sm:$0xff] }
 0x4d8   : > { %4871 = vmatpush1.msra.mxu0 %v4792_v4  ;;  %4941 = vmatprep.subr.mxu1 %v4857_v8  ;;  %v4817_v4 = vld [vmem:[%s9547_s8 + $0x1a8] sm:$0xff]  ;;  %v4816_v8 = vld [vmem:[%s9547_s8 + $0x1a0] sm:$0xff] }
 0x4d9   : > { %4872 = vmatprep.subr.mxu0 %v4791_v11  ;;  %4942 = vmatpush1.msra.mxu1 %v4856_v12  ;;  %v4815_v11 = vld [vmem:[%s9547_s8 + $0x198] sm:$0xff]  ;;  %v4814_v12 = vld [vmem:[%s9547_s8 + $0x190] sm:$0xff] }
 0x4da   : > { %4873 = vmatpush1.msra.mxu0 %v4790_v9  ;;  %4943 = vmatprep.subr.mxu1 %v4855_v10  ;;  %v4813_v9 = vld [vmem:[%s9547_s8 + $0x188] sm:$0xff]  ;;  %v4812_v10 = vld [vmem:[%s9547_s8 + $0x180] sm:$0xff] }
 0x4db   : > { %4874 = vmatprep.subr.mxu0 %v4789_v62  ;;  %4944 = vmatpush1.msra.mxu1 %v4854_v29  ;;  %v4811_v62 = vld [vmem:[%s9547_s8 + $0x178] sm:$0xff]  ;;  %v4810_v29 = vld [vmem:[%s9547_s8 + $0x170] sm:$0xff] }
 0x4dc   : > { %4875 = vmatpush1.msra.mxu0 %v4788_v46  ;;  %4945 = vmatprep.subr.mxu1 %v4853_v47  ;;  %v4809_v46 = vld [vmem:[%s9547_s8 + $0x168] sm:$0xff]  ;;  %v4808_v47 = vld [vmem:[%s9547_s8 + $0x160] sm:$0xff] }
 0x4dd   : > { %4876 = vmatprep.subr.mxu0 %v4787_v48  ;;  %4946 = vmatpush1.msra.mxu1 %v4852_v18  ;;  %v4807_v48 = vld [vmem:[%s9547_s8 + $0x158] sm:$0xff]  ;;  %v4806_v18 = vld [vmem:[%s9547_s8 + $0x150] sm:$0xff] }
 0x4de   : > { %4877 = vmatpush1.msra.mxu0 %v4786_v19  ;;  %4947 = vmatprep.subr.mxu1 %v4851_v1  ;;  %v4805_v19 = vld [vmem:[%s9547_s8 + $0x148] sm:$0xff]  ;;  %v4804_v1 = vld [vmem:[%s9547_s8 + $0x140] sm:$0xff] }
 0x4df   : > { %4878 = vmatprep.subr.mxu0 %v4785_v20  ;;  %4948 = vmatpush1.msra.mxu1 %v4850_v2  ;;  %v4832_v20 = vld [vmem:[%s9547_s8 + $0x220] sm:$0xff]  ;;  %v4803_v2 = vld [vmem:[%s9547_s8 + $0x138] sm:$0xff] }
 0x4e0   : > { %4879 = vmatpush1.msra.mxu0 %v4784_v14  ;;  %4949 = vmatprep.subr.mxu1 %v4849_v21  ;;  %v4831_v14 = vld [vmem:[%s9547_s8 + $0x218] sm:$0xff]  ;;  %v4802_v21 = vld [vmem:[%s9547_s8 + $0x130] sm:$0xff] }
 0x4e1   : > { %4880 = vmatprep.subr.mxu0 %v4783_v15  ;;  %4950 = vmatpush1.msra.mxu1 %v4848_v17  ;;  %v4830_v15 = vld [vmem:[%s9547_s8 + $0x210] sm:$0xff]  ;;  %v4801_v17 = vld [vmem:[%s9547_s8 + $0x128] sm:$0xff] }
 0x4e2   : > { %4881 = vmatpush1.msra.mxu0 %v4782_v63  ;;  %4951 = vmatprep.subr.mxu1 %v4847_v61  ;;  %v4829_v63 = vld [vmem:[%s9547_s8 + $0x208] sm:$0xff]  ;;  %v4800_v61 = vld [vmem:[%s9547_s8 + $0x120] sm:$0xff] }
 0x4e3   : > { %4882 = vmatprep.subr.mxu0 %v4781_v6  ;;  %4952 = vmatpush1.msra.mxu1 %v4846_v33  ;;  %v4828_v6 = vld [vmem:[%s9547_s8 + $0x200] sm:$0xff]  ;;  %v4799_v33 = vld [vmem:[%s9547_s8 + $0x118] sm:$0xff] }
 0x4e4   : > { %4883 = vmatpush1.msra.mxu0 %v4780_v7  ;;  %4953 = vmatprep.subr.mxu1 %v4845_v22  ;;  %v4863_v7 = vld [vmem:[%s9547_s8 + $0x318] sm:$0xff]  ;;  %v4798_v22 = vld [vmem:[%s9547_s8 + $0x110] sm:$0xff] }
 0x4e5   : > { %4884 = vmatprep.subr.mxu0 %v4779_v34  ;;  %4954 = vmatpush1.msra.mxu1 %v4844_v16  ;;  %v4862_v34 = vld [vmem:[%s9547_s8 + $0x310] sm:$0xff]  ;;  %v4797_v16 = vld [vmem:[%s9547_s8 + $0x108] sm:$0xff] }
 0x4e6   : > { %4885 = vmatpush1.msra.mxu0 %v4778_v35  ;;  %4955 = vmatprep.subr.mxu1 %v4843_v23  ;;  %v4861_v35 = vld [vmem:[%s9547_s8 + $0x308] sm:$0xff]  ;;  %v4796_v23 = vld [vmem:[%s9547_s8 + $0x100] sm:$0xff] }
 0x4e7   : > { %4886 = vmatprep.subr.mxu0 %v4777_v36  ;;  %4956 = vmatpush1.msra.mxu1 %v4842_v37  ;;  %v4860_v36 = vld [vmem:[%s9547_s8 + $0x300] sm:$0xff]  ;;  %v6150_v37 = vld [vmem:[%s9547_s8 + $0x418] sm:$0xff] }
 0x4e8   : > { %4887 = vmatpush1.msra.mxu0 %v4776_v24  ;;  %4957 = vmatprep.subr.mxu1 %v4841_v38  ;;  %v6214_v24 = vld [vmem:[%s9547_s8 + $0x618] sm:$0xff] }
 0x4e9   : > { %4888 = vmatprep.subr.mxu0 %v4775_v39  ;;  %4958 = vmatpush1.msra.mxu1 %v4840_v40 }
 0x4ea   : > { %4889 = vmatpush1.msra.mxu0 %v4774_v26  ;;  %4959 = vmatprep.subr.mxu1 %v4839_v41 }
 0x4eb   : > { %4890 = vmatprep.subr.mxu0 %v4773_v28  ;;  %4960 = vmatpush1.msra.mxu1 %v4838_v42 }
 0x4ec   : > { %4891 = vmatpush1.msra.mxu0 %v4772_v43  ;;  %4961 = vmatprep.subr.mxu1 %v4837_v50 }
 0x4ed   : > { %4892 = vmatprep.subr.mxu0 %v4771_v51  ;;  %4962 = vmatpush1.msra.mxu1 %v4836_v52 }
 0x4ee   : > { %4893 = vmatpush1.msra.mxu0 %v4770_v53  ;;  %4963 = vmatprep.subr.mxu1 %v4835_v54  ;;  %v6213_v53 = vld [vmem:[%s9547_s8 + $0x610] sm:$0xff] }
 0x4ef   : > { %4894 = vmatprep.subr.mxu0 %v4769_v57  ;;  %4964 = vmatpush1.msra.mxu1 %v4834_v58  ;;  %v6149_v57 = vld [vmem:[%s9547_s8 + $0x410] sm:$0xff]  ;;  %v6212_v58 = vld [vmem:[%s9547_s8 + $0x608] sm:$0xff] }
 0x4f0   : > { %4895 = vmatpush1.msra.mxu0 %v4768_v3  ;;  %4965 = vmatprep.subr.mxu1 %v4833_v55  ;;  %v6148_v3 = vld [vmem:[%s9547_s8 + $0x408] sm:$0xff]  ;;  %v6211_v55 = vld [vmem:[%s9547_s8 + $0x600] sm:$0xff] }
 0x4f1   : > { %4896 = vmatprep.subr.mxu0 %v4767_v30  ;;  %4966 = vmatpush1.msra.mxu1 %v4832_v20  ;;  %v6147_v30 = vld [vmem:[%s9547_s8 + $0x400] sm:$0xff]  ;;  %v6197_v20 = vld [vmem:[%s9547_s8 + $0x590] sm:$0xff] }
 0x4f2   : > { %4897 = vmatpush1.msra.mxu0 %v4766_v56  ;;  %4967 = vmatprep.subr.mxu1 %v4831_v14  ;;  %v6210_v56 = vld [vmem:[%s9547_s8 + $0x5f8] sm:$0xff]  ;;  %v6196_v14 = vld [vmem:[%s9547_s8 + $0x588] sm:$0xff] }
 0x4f3   : > { %4898 = vmatprep.subr.mxu0 %v4765_v49  ;;  %4968 = vmatpush1.msra.mxu1 %v4830_v15  ;;  %v6146_v49 = vld [vmem:[%s9547_s8 + $0x3f8] sm:$0xff]  ;;  %v6195_v15 = vld [vmem:[%s9547_s8 + $0x580] sm:$0xff] }
 0x4f4   : > { %4899 = vmatpush1.msra.mxu0 %v4764_v59  ;;  %4969 = vmatprep.subr.mxu1 %v4829_v63  ;;  %v6209_v59 = vld [vmem:[%s9547_s8 + $0x5f0] sm:$0xff]  ;;  %v6194_v63 = vld [vmem:[%s9547_s8 + $0x578] sm:$0xff] }
 0x4f5   : > { %4900 = vmatprep.subr.mxu0 %v4827_v32  ;;  %4970 = vmatpush1.msra.mxu1 %v4828_v6  ;;  %v6145_v32 = vld [vmem:[%s9547_s8 + $0x3f0] sm:$0xff] }
 0x4f6   : > { %4901 = vmatpush2.msra.mxu0 %v4826_v5  ;;  %4999 = vmatprep.subr.mxu1 %v4863_v7  ;;  %v6144_v5 = vld [vmem:[%s9547_s8 + $0x3e8] sm:$0xff]  ;;  %v6193_v6 = vld [vmem:[%s9547_s8 + $0x570] sm:$0xff] }
 0x4f7   : > { %4902 = vmatprep.subr.mxu0 %v4825_v60  ;;  %5000 = vmatpush2.msra.mxu1 %v4862_v34  ;;  %v6208_v60 = vld [vmem:[%s9547_s8 + $0x5e8] sm:$0xff]  ;;  %v6191_v34 = vld [vmem:[%s9547_s8 + $0x560] sm:$0xff] }
 0x4f8   : > { %4903 = vmatpush2.msra.mxu0 %v4824_v45  ;;  %5001 = vmatprep.subr.mxu1 %v4861_v35  ;;  %v6143_v45 = vld [vmem:[%s9547_s8 + $0x3e0] sm:$0xff]  ;;  %v6192_v7 = vld [vmem:[%s9547_s8 + $0x568] sm:$0xff]  ;;  %v6190_v35 = vld [vmem:[%s9547_s8 + $0x558] sm:$0xff] }
 0x4f9   : > { %4904 = vmatprep.subr.mxu0 %v4823_v13  ;;  %5002 = vmatpush2.msra.mxu1 %v4860_v36  ;;  %v6207_v13 = vld [vmem:[%s9547_s8 + $0x5e0] sm:$0xff]  ;;  %v6189_v36 = vld [vmem:[%s9547_s8 + $0x550] sm:$0xff] }
 0x4fa   : > { %4905 = vmatpush2.msra.mxu0 %v4822_v0  ;;  %5111 = vmatprep.subr.mxu1 %v6150_v37  ;;  %v6142_v0 = vld [vmem:[%s9547_s8 + $0x3d8] sm:$0xff]  ;;  %v6124_v37 = vld [vmem:[%s9547_s8 + $0x348] sm:$0xff] }
 0x4fb   : > { %4906 = vmatprep.subr.mxu0 %v4821_v25  ;;  %v6206_v25 = vld [vmem:[%s9547_s8 + $0x5d8] sm:$0xff] }
 0x4fc   : > { %4907 = vmatpush2.msra.mxu0 %v4820_v44  ;;  %v6141_v44 = vld [vmem:[%s9547_s8 + $0x3d0] sm:$0xff] }
 0x4fd   : > { %4908 = vmatprep.subr.mxu0 %v4819_v27  ;;  %v6205_v27 = vld [vmem:[%s9547_s8 + $0x5d0] sm:$0xff] }
 0x4fe   : > { %4909 = vmatpush2.msra.mxu0 %v4818_v31  ;;  %v6140_v31 = vld [vmem:[%s9547_s8 + $0x3c8] sm:$0xff] }
 0x4ff   : > { %4910 = vmatprep.subr.mxu0 %v4817_v4  ;;  %v6204_v4 = vld [vmem:[%s9547_s8 + $0x5c8] sm:$0xff] }
 0x500   : > { %4911 = vmatpush2.msra.mxu0 %v4816_v8  ;;  %v6139_v8 = vld [vmem:[%s9547_s8 + $0x3c0] sm:$0xff] }
 0x501   : > { %4912 = vmatprep.subr.mxu0 %v4815_v11  ;;  %v6203_v11 = vld [vmem:[%s9547_s8 + $0x5c0] sm:$0xff] }
 0x502   : > { %4913 = vmatpush2.msra.mxu0 %v4814_v12  ;;  %v6138_v12 = vld [vmem:[%s9547_s8 + $0x3b8] sm:$0xff] }
 0x503   : > { %4914 = vmatprep.subr.mxu0 %v4813_v9  ;;  %v6202_v9 = vld [vmem:[%s9547_s8 + $0x5b8] sm:$0xff] }
 0x504   : > { %4915 = vmatpush2.msra.mxu0 %v4812_v10  ;;  %v6137_v10 = vld [vmem:[%s9547_s8 + $0x3b0] sm:$0xff] }
 0x505   : > { %4916 = vmatprep.subr.mxu0 %v4811_v62  ;;  %v6201_v62 = vld [vmem:[%s9547_s8 + $0x5b0] sm:$0xff] }
 0x506   : > { %4917 = vmatpush2.msra.mxu0 %v4810_v29  ;;  %v6136_v29 = vld [vmem:[%s9547_s8 + $0x3a8] sm:$0xff] }
 0x507   : > { %4918 = vmatprep.subr.mxu0 %v4809_v46  ;;  %v6200_v46 = vld [vmem:[%s9547_s8 + $0x5a8] sm:$0xff] }
 0x508   : > { %4919 = vmatpush2.msra.mxu0 %v4808_v47  ;;  %v6135_v47 = vld [vmem:[%s9547_s8 + $0x3a0] sm:$0xff] }
 0x509   : > { %4920 = vmatprep.subr.mxu0 %v4807_v48  ;;  %v6199_v48 = vld [vmem:[%s9547_s8 + $0x5a0] sm:$0xff] }
 0x50a   : > { %4921 = vmatpush2.msra.mxu0 %v4806_v18  ;;  %v6134_v18 = vld [vmem:[%s9547_s8 + $0x398] sm:$0xff] }
 0x50b   : > { %4922 = vmatprep.subr.mxu0 %v4805_v19  ;;  %v6198_v19 = vld [vmem:[%s9547_s8 + $0x598] sm:$0xff] }
 0x50c   : > { %4923 = vmatpush2.msra.mxu0 %v4804_v1  ;;  %v6133_v1 = vld [vmem:[%s9547_s8 + $0x390] sm:$0xff] }
 0x50d   : > { %4924 = vmatprep.subr.mxu0 %v4803_v2  ;;  %v6132_v2 = vld [vmem:[%s9547_s8 + $0x388] sm:$0xff] }
 0x50e   : > { %4925 = vmatpush2.msra.mxu0 %v4802_v21  ;;  %v6131_v21 = vld [vmem:[%s9547_s8 + $0x380] sm:$0xff] }
 0x50f   : > { %4926 = vmatprep.subr.mxu0 %v4801_v17  ;;  %v6130_v17 = vld [vmem:[%s9547_s8 + $0x378] sm:$0xff] }
 0x510   : > { %4927 = vmatpush2.msra.mxu0 %v4800_v61  ;;  %v6129_v61 = vld [vmem:[%s9547_s8 + $0x370] sm:$0xff] }
 0x511   : > { %4928 = vmatprep.subr.mxu0 %v4799_v33  ;;  %v6128_v33 = vld [vmem:[%s9547_s8 + $0x368] sm:$0xff] }
 0x512   : > { %4929 = vmatpush2.msra.mxu0 %v4798_v22  ;;  %v6127_v22 = vld [vmem:[%s9547_s8 + $0x360] sm:$0xff] }
 0x513   : > { %4930 = vmatprep.subr.mxu0 %v4797_v16  ;;  %v6126_v16 = vld [vmem:[%s9547_s8 + $0x358] sm:$0xff] }
 0x514   : > { %4931 = vmatpush2.msra.mxu0 %v4796_v23  ;;  %v6125_v23 = vld [vmem:[%s9547_s8 + $0x350] sm:$0xff] }
 0x515   : > { %5182 = vmatprep.subr.mxu0 %v6214_v24  ;;  %v6188_v24 = vld [vmem:[%s9547_s8 + $0x548] sm:$0xff] }
 0x590   : > { %v4537_v38 = vpop.f32.mrf.mxu0 }
 0x591   : > { %v4608_v39 = vpop.f32.mrf.mxu1 }
 0x592   : > { %v4539_v40 = vpop.f32.mrf.mxu0 }
 0x593   : > { %v4610_v26 = vpop.f32.mrf.mxu1 }
 0x594   : > { %v4684_v41 = vpop.f32.mrf.mxu0 }
 0x595   : > { %v4755_v28 = vpop.f32.mrf.mxu1  ;;  %v9224_v42 = vmax.f32 %v4537_v38, %v4684_v41  ;;  %v6123_v38 = vld [vmem:[%s9547_s8 + $0x340] sm:$0xff]  ;;  %v6121_v41 = vld [vmem:[%s9547_s8 + $0x330] sm:$0xff] }
 0x596   : > { %v4686_v43 = vpop.f32.mrf.mxu0  ;;  %v9231_v54 = vmax.f32 %v4608_v39, %v4755_v28  ;;  %v6187_v39 = vld [vmem:[%s9547_s8 + $0x540] sm:$0xff]  ;;  %v6185_v28 = vld [vmem:[%s9547_s8 + $0x530] sm:$0xff] }
 0x597   : > { %v9226_v50 = vmax.f32 %v4539_v40, %v4686_v43  ;;  %v4757_v51 = vpop.f32.mrf.mxu1  ;;  %v6122_v40 = vld [vmem:[%s9547_s8 + $0x338] sm:$0xff]  ;;  %v6120_v43 = vld [vmem:[%s9547_s8 + $0x328] sm:$0xff] }
 0x598   : > { %v4763_v52 = vmax.f32 %v4610_v26, %v4757_v51  ;;  %v6186_v26 = vld [vmem:[%s9547_s8 + $0x538] sm:$0xff]  ;;  %v6184_v51 = vld [vmem:[%s9547_s8 + $0x528] sm:$0xff] }
 0x599   : > { %4932 = vmatprep.mubr.f32.mxu0 %v9226_v50 }
 0x59a   : > { %6118 = vmatprep.mubr.msk.f32.mxu1 %vm4864_vm9, %v4763_v52  ;;  %4933 = vmatmul.mubr.f32.vlgmr.msra.gmra.mxu0 %v9224_v42 }
 0x59b   : > { %5004 = vmatmul.mubr.f32.vlgmr.msra.gmra.mxu1 %v9231_v54  ;;  %5183 = vmatpush1.msra.mxu0 %v6213_v53  ;;  %v6183_v53 = vld [vmem:[%s9547_s8 + $0x520] sm:$0xff] }
 0x59c   : > { %5112 = vmatpush1.msra.mxu1 %v6149_v57  ;;  %5184 = vmatprep.subr.mxu0 %v6212_v58  ;;  %v6182_v57 = vld [vmem:[%s9547_s8 + $0x518] sm:$0xff] }
 0x59d   : > { %5113 = vmatprep.subr.mxu1 %v6148_v3  ;;  %5185 = vmatpush1.msra.mxu0 %v6211_v55  ;;  %v6218_v58 = vld [vmem:[%s9547_s8 + $0x638] sm:$0xff]  ;;  %v6181_v3 = vld [vmem:[%s9547_s8 + $0x510] sm:$0xff] }
 0x59e   : > { %5114 = vmatpush1.msra.mxu1 %v6147_v30  ;;  %5186 = vmatprep.subr.mxu0 %v6210_v56  ;;  %v6217_v55 = vld [vmem:[%s9547_s8 + $0x630] sm:$0xff]  ;;  %v6180_v30 = vld [vmem:[%s9547_s8 + $0x508] sm:$0xff] }
 0x59f   : > { %5115 = vmatprep.subr.mxu1 %v6146_v49  ;;  %5187 = vmatpush1.msra.mxu0 %v6209_v59  ;;  %v6216_v56 = vld [vmem:[%s9547_s8 + $0x628] sm:$0xff]  ;;  %v6179_v49 = vld [vmem:[%s9547_s8 + $0x500] sm:$0xff] }
 0x5a0   : > { %5116 = vmatpush1.msra.mxu1 %v6145_v32  ;;  %6219 = vmatprep.mubr.msk.f32.mxu0 %vm4864_vm9, %v4763_v52  ;;  %v6119_v52 = vld [vmem:[%s9547_s8 + $0x320] sm:$0xff]  ;;  %v6178_v32 = vld [vmem:[%s9547_s8 + $0x4f8] sm:$0xff] }
 0x5a1   : > { %5117 = vmatprep.subr.mxu1 %v6144_v5  ;;  %5188 = vmatprep.subr.mxu0 %v6208_v60  ;;  %v6215_v59 = vld [vmem:[%s9547_s8 + $0x620] sm:$0xff]  ;;  %v6177_v5 = vld [vmem:[%s9547_s8 + $0x4f0] sm:$0xff] }
 0x5a2   : > { %5118 = vmatpush1.msra.mxu1 %v6143_v45  ;;  %5189 = vmatpush1.msra.mxu0 %v6207_v13  ;;  %v6175_v60 = vld [vmem:[%s9547_s8 + $0x4e0] sm:$0xff]  ;;  %v6174_v45 = vld [vmem:[%s9547_s8 + $0x4d8] sm:$0xff]  ;;  %v6173_v13 = vld [vmem:[%s9547_s8 + $0x4d0] sm:$0xff] }
 0x5a3   : > { %5119 = vmatprep.subr.mxu1 %v6142_v0  ;;  %5190 = vmatprep.subr.mxu0 %v6206_v25  ;;  %v6172_v0 = vld [vmem:[%s9547_s8 + $0x4c8] sm:$0xff]  ;;  %v6170_v25 = vld [vmem:[%s9547_s8 + $0x4b8] sm:$0xff] }
 0x5a4   : > { %5120 = vmatpush1.msra.mxu1 %v6141_v44  ;;  %5191 = vmatpush1.msra.mxu0 %v6205_v27  ;;  %v6169_v44 = vld [vmem:[%s9547_s8 + $0x4b0] sm:$0xff]  ;;  %v6168_v27 = vld [vmem:[%s9547_s8 + $0x4a8] sm:$0xff] }
 0x5a5   : > { %5121 = vmatprep.subr.mxu1 %v6140_v31  ;;  %5192 = vmatprep.subr.mxu0 %v6204_v4  ;;  %v6167_v31 = vld [vmem:[%s9547_s8 + $0x4a0] sm:$0xff]  ;;  %v6166_v4 = vld [vmem:[%s9547_s8 + $0x498] sm:$0xff] }
 0x5a6   : > { %5122 = vmatpush1.msra.mxu1 %v6139_v8  ;;  %5193 = vmatpush1.msra.mxu0 %v6203_v11  ;;  %v6165_v8 = vld [vmem:[%s9547_s8 + $0x490] sm:$0xff]  ;;  %v6164_v11 = vld [vmem:[%s9547_s8 + $0x488] sm:$0xff] }
 0x5a7   : > { %5123 = vmatprep.subr.mxu1 %v6138_v12  ;;  %5194 = vmatprep.subr.mxu0 %v6202_v9  ;;  %v6163_v12 = vld [vmem:[%s9547_s8 + $0x480] sm:$0xff]  ;;  %v6162_v9 = vld [vmem:[%s9547_s8 + $0x478] sm:$0xff] }
 0x5a8   : > { %5124 = vmatpush1.msra.mxu1 %v6137_v10  ;;  %5195 = vmatpush1.msra.mxu0 %v6201_v62  ;;  %v6161_v10 = vld [vmem:[%s9547_s8 + $0x470] sm:$0xff]  ;;  %v6160_v62 = vld [vmem:[%s9547_s8 + $0x468] sm:$0xff] }
 0x5a9   : > { %5125 = vmatprep.subr.mxu1 %v6136_v29  ;;  %5196 = vmatprep.subr.mxu0 %v6200_v46  ;;  %v6159_v29 = vld [vmem:[%s9547_s8 + $0x460] sm:$0xff]  ;;  %v6158_v46 = vld [vmem:[%s9547_s8 + $0x458] sm:$0xff] }
 0x5aa   : > { %5126 = vmatpush1.msra.mxu1 %v6135_v47  ;;  %5197 = vmatpush1.msra.mxu0 %v6199_v48  ;;  %v6157_v47 = vld [vmem:[%s9547_s8 + $0x450] sm:$0xff]  ;;  %v6156_v48 = vld [vmem:[%s9547_s8 + $0x448] sm:$0xff] }
 0x5ab   : > { %5127 = vmatprep.subr.mxu1 %v6134_v18  ;;  %5198 = vmatprep.subr.mxu0 %v6198_v19  ;;  %v6155_v18 = vld [vmem:[%s9547_s8 + $0x440] sm:$0xff]  ;;  %v6154_v19 = vld [vmem:[%s9547_s8 + $0x438] sm:$0xff] }
 0x5ac   : > { %5128 = vmatpush1.msra.mxu1 %v6133_v1  ;;  %5199 = vmatpush1.msra.mxu0 %v6197_v20  ;;  %v6153_v1 = vld [vmem:[%s9547_s8 + $0x430] sm:$0xff]  ;;  %v6152_v20 = vld [vmem:[%s9547_s8 + $0x428] sm:$0xff] }
 0x5ad   : > { %5129 = vmatprep.subr.mxu1 %v6132_v2  ;;  %5200 = vmatprep.subr.mxu0 %v6196_v14  ;;  %v6151_v2 = vld [vmem:[%s9547_s8 + $0x420] sm:$0xff] }
 0x5ae   : > { %5130 = vmatpush1.msra.mxu1 %v6131_v21  ;;  %5201 = vmatpush1.msra.mxu0 %v6195_v15 }
 0x5af   : > { %5131 = vmatprep.subr.mxu1 %v6130_v17  ;;  %5202 = vmatprep.subr.mxu0 %v6194_v63 }
 0x5b0   : > { %5132 = vmatpush1.msra.mxu1 %v6129_v61  ;;  %5203 = vmatpush1.msra.mxu0 %v6193_v6 }
 0x5b1   : > { %5133 = vmatprep.subr.mxu1 %v6128_v33  ;;  %5204 = vmatprep.subr.mxu0 %v6192_v7 }
 0x5b2   : > { %5134 = vmatpush1.msra.mxu1 %v6127_v22  ;;  %5205 = vmatpush1.msra.mxu0 %v6191_v34 }
 0x5b3   : > { %5135 = vmatprep.subr.mxu1 %v6126_v16  ;;  %5206 = vmatprep.subr.mxu0 %v6190_v35 }
 0x5b4   : > { %5136 = vmatpush1.msra.mxu1 %v6125_v23  ;;  %5207 = vmatpush1.msra.mxu0 %v6189_v36 }
 0x5b5   : > { %5137 = vmatprep.subr.mxu1 %v6124_v37  ;;  %5208 = vmatprep.subr.mxu0 %v6188_v24 }
 0x5b6   : > { %5138 = vmatpush1.msra.mxu1 %v6123_v38  ;;  %5209 = vmatpush1.msra.mxu0 %v6187_v39 }
 0x5b7   : > { %5139 = vmatprep.subr.mxu1 %v6122_v40  ;;  %5210 = vmatprep.subr.mxu0 %v6186_v26 }
 0x5b8   : > { %5140 = vmatpush1.msra.mxu1 %v6121_v41  ;;  %5211 = vmatpush1.msra.mxu0 %v6185_v28 }
 0x5b9   : > { %5141 = vmatprep.subr.mxu1 %v6120_v43  ;;  %5212 = vmatprep.subr.mxu0 %v6184_v51 }
 0x5ba   : > { %5142 = vmatpush1.msra.mxu1 %v6119_v52  ;;  %5213 = vmatpush1.msra.mxu0 %v6183_v53 }
 0x5bb   : > { %5143 = vmatprep.subr.mxu1 %v6182_v57  ;;  %5242 = vmatprep.subr.mxu0 %v6218_v58 }
 0x5bc   : > { %5144 = vmatpush2.msra.mxu1 %v6181_v3  ;;  %5175 = vmatprep.mubr.f32.mxu1 %v9226_v50  ;;  %v6176_v50 = vld [vmem:[%s9547_s8 + $0x4e8] sm:$0xff] }
 0x5bd   : > { %5243 = vmatpush2.msra.mxu0 %v6217_v55  ;;  %5145 = vmatprep.subr.mxu1 %v6180_v30 }
 0x5be   : > { %5244 = vmatprep.subr.mxu0 %v6216_v56  ;;  %5146 = vmatpush2.msra.mxu1 %v6179_v49 }
 0x5bf   : > { %5245 = vmatpush2.msra.mxu0 %v6215_v59  ;;  %5147 = vmatprep.subr.mxu1 %v6178_v32 }
 0x5c0   : > { %5247 = vmatmul.mubr.f32.vlgmr.msra.gmra.mxu0 %v9231_v54  ;;  %5148 = vmatpush2.msra.mxu1 %v6177_v5  ;;  %v6171_v54 = vld [vmem:[%s9547_s8 + $0x4c0] sm:$0xff] }
 0x5c1   : > { %5149 = vmatprep.subr.mxu1 %v6176_v50 }
 0x5c2   : > { %5150 = vmatpush2.msra.mxu1 %v6175_v60 }
 0x5c3   : > { %5151 = vmatprep.subr.mxu1 %v6174_v45 }
 0x5c4   : > { %5152 = vmatpush2.msra.mxu1 %v6173_v13 }
 0x5c5   : > { %5153 = vmatprep.subr.mxu1 %v6172_v0 }
 0x5c6   : > { %5154 = vmatpush2.msra.mxu1 %v6171_v54 }
 0x5c7   : > { %5155 = vmatprep.subr.mxu1 %v6170_v25 }
 0x5c8   : > { %5156 = vmatpush2.msra.mxu1 %v6169_v44 }
 0x5c9   : > { %5157 = vmatprep.subr.mxu1 %v6168_v27 }
 0x5ca   : > { %5158 = vmatpush2.msra.mxu1 %v6167_v31 }
 0x5cb   : > { %5159 = vmatprep.subr.mxu1 %v6166_v4 }
 0x5cc   : > { %5160 = vmatpush2.msra.mxu1 %v6165_v8 }
 0x5cd   : > { %5161 = vmatprep.subr.mxu1 %v6164_v11 }
 0x5ce   : > { %5162 = vmatpush2.msra.mxu1 %v6163_v12 }
 0x5cf   : > { %5163 = vmatprep.subr.mxu1 %v6162_v9 }
 0x5d0   : > { %5164 = vmatpush2.msra.mxu1 %v6161_v10 }
 0x5d1   : > { %5165 = vmatprep.subr.mxu1 %v6160_v62 }
 0x5d2   : > { %5166 = vmatpush2.msra.mxu1 %v6159_v29 }
 0x5d3   : > { %5167 = vmatprep.subr.mxu1 %v6158_v46 }
 0x5d4   : > { %5168 = vmatpush2.msra.mxu1 %v6157_v47 }
 0x5d5   : > { %5169 = vmatprep.subr.mxu1 %v6156_v48 }
 0x5d6   : > { %5170 = vmatpush2.msra.mxu1 %v6155_v18 }
 0x5d7   : > { %5171 = vmatprep.subr.mxu1 %v6154_v19 }
 0x5d8   : > { %5172 = vmatpush2.msra.mxu1 %v6153_v1 }
 0x5d9   : > { %5173 = vmatprep.subr.mxu1 %v6152_v20 }
 0x5da   : > { %5174 = vmatpush2.msra.mxu1 %v6151_v2 }
 0x5db   : > { %5176 = vmatmul.mubr.f32.vlgmr.msra.gmra.mxu1 %v9224_v42 }
 0x65a   : > { %v4934_v14 = vpop.f32.mrf.mxu0 }
 0x65b   : > { %v5005_v21 = vpop.f32.mrf.mxu1 }
 0x65c   : > { %v4936_v15 = vpop.f32.mrf.mxu0  ;;  %v5006_v22 = vadd.f32 %v5005_v21, %v4934_v14 }
 0x65d   : > { %v5007_v17 = vpop.f32.mrf.mxu1 }
 0x65e   : > { %v5008_v34 = vadd.f32 %v5007_v17, %v4936_v15 }
 0x680   : > { %v5248_v63 = vpop.f32.mrf.mxu0 }
 0x682   : > { %v5250_v33 = vpop.f32.mrf.mxu0 }
 0x69b   : > { %v5177_v61 = vpop.f32.mrf.mxu1 }
 0x69c   : > { %v5249_v6 = vadd.f32 %v5248_v63, %v5177_v61 }
 0x69d   : > { %v5179_v7 = vpop.f32.mrf.mxu1 }
 0x69e   : > { %v5251_v16 = vadd.f32 %v5250_v33, %v5179_v7  ;;  %v5253_v35 = vmax.f32 %v5006_v22, %v5249_v6 }
 0x6a0   : > { %v5254_v23 = vmax.f32 %v5008_v34, %v5251_v16 }
 0x6a2   : > { %v5257_v42 = vcombine.low %v5253_v35, %v5254_v23 }
 0x6a4   : > { %5262 = vst.msk [vmem:[%s332_s17] sm:$0xff] %vm5261_vm12, %v5257_v42 }
 0x6a5 PF: > { %s19_s30 = sadd.s32 1, %s6750_s30  }
 0x6a6   : > { %p16_p4 = scmp.ge.s32.totalorder %s19_s30, 4  }
 0x6a8   :  { %18 = sbr.rel (!%p16_p4) target bundleno = 1 (0x1), region = 98 }

</bundles_post_ra>
